<compile_context>
chip_gen: v7x
topology: tpu7x:2x2x1
jax: 0.10.0
libtpu: 0.0.40
codegen_flags: <defaults>
</compile_context>

<pallas_src>
import functools

import jax
import jax.numpy as jnp
from jax.experimental import pallas as pl
from jax.experimental.pallas import tpu as pltpu


_H = 32                    # input spatial size (required: fc1 expects 6272 feats)
_W = 32
_S = 36 * 32               # per-sample flat lane footprint (>= 32*32 + 2*32 + 2)
_VMEM_LIMIT = 32 * 1024 * 1024


def _round_up(x, m):
    return ((x + m - 1) // m) * m


def _pick_conv_tile(n):
    # Samples per conv grid step; keep >=2 grid steps whenever possible so
    # v7x's two TensorCores both get work on the "parallel" axis.
    for t in (16, 8, 4, 2, 1):
        if n >= 2 * t:
            return t
    return 1


def _pick_fc_tile(n):
    n8 = _round_up(max(n, 1), 8)
    if n8 <= 8:
        return n8
    for t in (256, 128, 64, 32, 16, 8):
        if n8 >= 2 * t and _round_up(n8, t) - n8 <= max(n8 // 4, 8):
            return t
    return 8


# -----------------------------------------------------------------------------
# Conv kernel: valid 3x3 conv with in-kernel im2col on the flat "wide" layout.
# -----------------------------------------------------------------------------
def _conv_kernel(x_ref, w_ref, b_ref, o_ref, *, relu, row_stride):
    """x_ref: (Cin, Lb) bf16, Lb = tile_n*_S, per-sample lane stride _S.
    w_ref: (9, OC, Cin) bf16 (tap index = ki*3 + kj).  b_ref: (OC, 1) f32.
    o_ref: (OC, Lb) bf16, same layout.  Lane q = n_local*_S + oh*32 + ow holds
    output pixel (oh, ow) of local sample n_local; lanes outside the valid
    (oh, ow) range are don't-care (never consumed as valid data downstream).
    """
    oc, lb = o_ref.shape
    L = lb - 128            # last 128 lanes would need inputs past the block
    acc = jnp.zeros((oc, L), jnp.float32)
    for ki in range(3):
        for kj in range(3):
            off = ki * row_stride + kj
            acc = acc + jnp.dot(w_ref[ki * 3 + kj], x_ref[:, off:off + L],
                                preferred_element_type=jnp.float32)
    acc = acc + b_ref[...]
    if relu:
        acc = jnp.maximum(acc, 0.0)
    o_ref[:, :L] = acc.astype(o_ref.dtype)
    o_ref[:, L:] = jnp.zeros((oc, 128), o_ref.dtype)


def conv3x3_flat(x2d, w9, b, *, tile_n, relu):
    """3x3 valid conv on flat wide-layout activations.

    x2d: (Cin, Np*_S) bf16;  w9: (9, OC, Cin) bf16;  b: (OC, 1) f32.
    Returns (OC, Np*_S) bf16 in the same layout.
    """
    cin, mtot = x2d.shape
    _, oc, cin_w = w9.shape
    assert cin == cin_w
    lb = tile_n * _S
    assert mtot % lb == 0
    flops = 2 * oc * cin * 9 * mtot
    bytes_accessed = cin * mtot * 2 + oc * mtot * 2 + w9.size * 2 + b.size * 4
    return pl.pallas_call(
        functools.partial(_conv_kernel, relu=relu, row_stride=_W),
        out_shape=jax.ShapeDtypeStruct((oc, mtot), jnp.bfloat16),
        grid=(mtot // lb,),
        in_specs=[
            pl.BlockSpec((cin, lb), lambda i: (0, i)),        # activations: lane tiled
            pl.BlockSpec((9, oc, cin), lambda i: (0, 0, 0)),  # taps: resident
            pl.BlockSpec((oc, 1), lambda i: (0, 0)),          # bias: resident
        ],
        out_specs=pl.BlockSpec((oc, lb), lambda i: (0, i)),
        compiler_params=pltpu.CompilerParams(
            dimension_semantics=("parallel",),
            vmem_limit_bytes=_VMEM_LIMIT,
        ),
        cost_estimate=pl.CostEstimate(
            flops=flops, transcendentals=0, bytes_accessed=bytes_accessed),
    )(x2d, w9, b)


# -----------------------------------------------------------------------------
# Fused FC head: fc1 + ReLU + fc2 (padded to 128 classes) + log_softmax.
# -----------------------------------------------------------------------------
def _fc_head_kernel(x_ref, w1_ref, b1_ref, w2_ref, b2_ref, o_ref):
    h = jnp.dot(x_ref[...], w1_ref[...], preferred_element_type=jnp.float32)
    h = jnp.maximum(h + b1_ref[...], 0.0)
    logits = jnp.dot(h.astype(w2_ref.dtype), w2_ref[...],
                     preferred_element_type=jnp.float32)
    logits = logits + b2_ref[...]
    m = jnp.max(logits, axis=-1, keepdims=True)
    s = logits - m
    lse = jnp.log(jnp.sum(jnp.exp(s), axis=-1, keepdims=True))
    o_ref[...] = (s - lse).astype(o_ref.dtype)


def fc_head(x, w1t, b1, w2t, b2, *, tile_b):
    npf, k1 = x.shape
    k1b, h = w1t.shape
    hb, c = w2t.shape
    assert k1 == k1b and h == hb and npf % tile_b == 0
    flops = 2 * npf * (k1 * h + h * c)
    bytes_accessed = (x.size * 2 + w1t.size * 2 + w2t.size * 2
                      + b1.size * 4 + b2.size * 4 + npf * c * 4)
    return pl.pallas_call(
        _fc_head_kernel,
        out_shape=jax.ShapeDtypeStruct((npf, c), jnp.float32),
        grid=(npf // tile_b,),
        in_specs=[
            pl.BlockSpec((tile_b, k1), lambda i: (i, 0)),   # features: row tiled
            pl.BlockSpec((k1, h), lambda i: (0, 0)),        # fc1 weights: resident
            pl.BlockSpec((1, h), lambda i: (0, 0)),
            pl.BlockSpec((h, c), lambda i: (0, 0)),         # fc2 weights: resident
            pl.BlockSpec((1, c), lambda i: (0, 0)),
        ],
        out_specs=pl.BlockSpec((tile_b, c), lambda i: (i, 0)),
        compiler_params=pltpu.CompilerParams(
            dimension_semantics=("parallel",),
            vmem_limit_bytes=_VMEM_LIMIT,
        ),
        cost_estimate=pl.CostEstimate(
            flops=flops, transcendentals=npf * (c + 1),
            bytes_accessed=bytes_accessed),
    )(x, w1t, b1, w2t, b2)


# -----------------------------------------------------------------------------
# Parameters (torch layout -> kernel layout) and forward pass.
# -----------------------------------------------------------------------------
def init_params(key):
    """Deterministic synthetic params in PyTorch layout (uniform +-1/sqrt(fan_in))."""
    ks = jax.random.split(key, 8)

    def u(k, shape, fan_in):
        bound = 1.0 / (fan_in ** 0.5)
        return jax.random.uniform(k, shape, jnp.float32, -bound, bound)

    return {
        "conv1_w": u(ks[0], (16, 3, 3, 3), 3 * 3 * 3),
        "conv1_b": u(ks[1], (16,), 3 * 3 * 3),
        "conv2_w": u(ks[2], (32, 16, 3, 3), 16 * 3 * 3),
        "conv2_b": u(ks[3], (32,), 16 * 3 * 3),
        "fc1_w":   u(ks[4], (128, 6272), 6272),   # torch Linear: (out, in)
        "fc1_b":   u(ks[5], (128,), 6272),
        "fc2_w":   u(ks[6], (10, 128), 128),
        "fc2_b":   u(ks[7], (10,), 128),
    }


def prepare_params(p):
    """One-time (outside jit) re-layout of torch-style params into kernel layout."""
    def conv_taps(w, cin_pad):
        oc, cin, kh, kw = w.shape
        w = jnp.pad(w, ((0, 0), (0, cin_pad - cin), (0, 0), (0, 0)))
        # (oc, cin, ki, kj) -> (ki, kj, oc, cin) -> (9, oc, cin), tap = ki*3 + kj
        return w.transpose(2, 3, 0, 1).reshape(kh * kw, oc, cin_pad).astype(jnp.bfloat16)

    n_cls, c_pad = 10, 128                          # lane-dense fc2 / log_softmax
    w2t = jnp.pad(p["fc2_w"].T, ((0, 0), (0, c_pad - n_cls)))          # (128, 128)
    b2 = jnp.pad(p["fc2_b"], (0, c_pad - n_cls), constant_values=-1e30)

    return {
        "c1_w": conv_taps(p["conv1_w"], 8),         # (9, 16, 8)  (Cin padded 3->8)
        "c1_b": p["conv1_b"].reshape(16, 1).astype(jnp.float32),
        "c2_w": conv_taps(p["conv2_w"], 16),        # (9, 32, 16)
        "c2_b": p["conv2_b"].reshape(32, 1).astype(jnp.float32),
        "fc1_wt": p["fc1_w"].T.astype(jnp.bfloat16),                   # (6272, 128)
        "fc1_b": p["fc1_b"].reshape(1, 128).astype(jnp.float32),
        "fc2_wt": w2t.astype(jnp.bfloat16),                            # (128, 128)
        "fc2_b": b2.reshape(1, 128).astype(jnp.float32),
    }


def net1_forward(kp, x):
    """x: (N, 3, 32, 32) NCHW f32 -> (N, 10) log-probabilities (eval mode)."""
    n, cin, h, w = x.shape
    assert (cin, h, w) == (3, _H, _W), "fc1 expects 32*14*14 = 6272 features"
    tile_n = _pick_conv_tile(n)
    np_ = _round_up(n, tile_n)

    # Channel-major flat "wide" layout: (Cin_pad, Np*_S) bf16; input pixel
    # (hh, ww) of sample i sits at lane i*_S + hh*32 + ww (tail lanes zero).
    x_cm = x.transpose(1, 0, 2, 3).reshape(3, n, _H * _W)
    x_cm = jnp.pad(x_cm, ((0, 8 - 3), (0, np_ - n), (0, _S - _H * _W)))
    x0 = x_cm.reshape(8, np_ * _S).astype(jnp.bfloat16)

    y1 = conv3x3_flat(x0, kp["c1_w"], kp["c1_b"], tile_n=tile_n, relu=True)
    # conv2 has NO ReLU in the reference forward.
    y2 = conv3x3_flat(y1, kp["c2_w"], kp["c2_b"], tile_n=tile_n, relu=False)

    # Valid conv2 output pixel (oh, ow) lives at lane i*_S + oh*32 + ow.
    # TODO(synk): pool + flatten are small XLA ops on bf16, not a kernel epilogue.
    y2 = y2.reshape(32, np_, _S // _W, _W)[:, :n, :28, :28]          # (32, N, 28, 28)
    pooled = jnp.max(y2.reshape(32, n, 14, 2, 14, 2), axis=(3, 5))   # (32, N, 14, 14)
    # dropout1 / dropout2: identity in eval mode.
    feat = pooled.transpose(1, 0, 2, 3).reshape(n, 32 * 14 * 14)     # torch flatten order

    tile_b = _pick_fc_tile(n)
    npf = _round_up(n, tile_b)
    feat = jnp.pad(feat, ((0, npf - n), (0, 0))).astype(jnp.bfloat16)
    out = fc_head(feat, kp["fc1_wt"], kp["fc1_b"], kp["fc2_wt"], kp["fc2_b"],
                  tile_b=tile_b)
    return out[:n, :10]


def net1_reference(p, x):
    """Pure-XLA reference at matched precision (bf16 operands, f32 accumulate)."""
    bf = lambda a: a.astype(jnp.bfloat16)
    dn = ("NCHW", "OIHW", "NCHW")
    y = jax.lax.conv_general_dilated(bf(x), bf(p["conv1_w"]), (1, 1), "VALID",
                                     dimension_numbers=dn,
                                     preferred_element_type=jnp.float32)
    y = jnp.maximum(y + p["conv1_b"].reshape(1, -1, 1, 1), 0.0).astype(jnp.bfloat16)
    y = jax.lax.conv_general_dilated(y, bf(p["conv2_w"]), (1, 1), "VALID",
                                     dimension_numbers=dn,
                                     preferred_element_type=jnp.float32)
    y = (y + p["conv2_b"].reshape(1, -1, 1, 1)).astype(jnp.bfloat16)
    n = x.shape[0]
    y = jnp.max(y.reshape(n, 32, 14, 2, 14, 2), axis=(3, 5))
    f = y.reshape(n, 32 * 14 * 14)
    h = jnp.dot(f, bf(p["fc1_w"]).T, preferred_element_type=jnp.float32) + p["fc1_b"]
    h = jnp.maximum(h, 0.0).astype(jnp.bfloat16)
    logits = jnp.dot(h, bf(p["fc2_w"]).T,
                     preferred_element_type=jnp.float32) + p["fc2_b"]
    return jax.nn.log_softmax(logits, axis=-1)


if __name__ == "__main__":
    key = jax.random.PRNGKey(0)
    pkey, xkey = jax.random.split(key)
    torch_params = init_params(pkey)
    kparams = prepare_params(torch_params)    # one-time re-layout, outside jit

    # fc1 expects 6272 = 32*14*14 features -> CIFAR-10 style 32x32 input, batch=2.
    x = jax.random.normal(xkey, (2, 3, 32, 32), dtype=jnp.float32)

    out = jax.jit(net1_forward)(kparams, x)
    out = jax.block_until_ready(out)
    assert out.shape == (2, 10)

    # log_softmax rows should sum (in prob space) to ~1.
    assert bool(jnp.all(jnp.abs(jnp.sum(jnp.exp(out), axis=-1) - 1.0) < 1e-3))

    # Cross-check against a pure-XLA reference at matched bf16/f32 precision.
    ref = jax.block_until_ready(jax.jit(net1_reference)(torch_params, x))
    assert bool(jnp.max(jnp.abs(out - ref)) < 3e-2), (
        f"max |diff| = {float(jnp.max(jnp.abs(out - ref)))}")

    print("KERNEL_OK")
</pallas_src>

<mosaic_0001>
module attributes {stable_mosaic.version = 11 : i64} {
  func.func @_conv_kernel(%arg0: i32, %arg1: memref<8x1152xbf16, #tpu.memory_space<vmem>>, %arg2: memref<9x16x8xbf16, #tpu.memory_space<vmem>>, %arg3: memref<16x1xf32, #tpu.memory_space<vmem>>, %arg4: memref<16x1152xbf16, #tpu.memory_space<vmem>>) attributes {dimension_semantics = [#tpu.dimension_semantics<parallel>], iteration_bounds = array<i64: 2>, scalar_prefetch = 0 : i64, scratch_operands = 0 : i64, tpu.core_type = #tpu.core_type<tc>, window_params = [{transform_indices = @transform_0, window_bounds = array<i64: 8, 1152>}, {pipeline_mode = #tpu.pipeline_mode<synchronous>, transform_indices = @transform_1, window_bounds = array<i64: 9, 16, 8>}, {pipeline_mode = #tpu.pipeline_mode<synchronous>, transform_indices = @transform_2, window_bounds = array<i64: 16, 1>}, {transform_indices = @transform_3, window_bounds = array<i64: 16, 1152>}]} {
    %cst = arith.constant 0.000000e+00 : f32
    %0 = vector.broadcast %cst : f32 to vector<16x1024xf32>
    %c0 = arith.constant 0 : index
    %c0_0 = arith.constant 0 : index
    %c0_1 = arith.constant 0 : index
    %1 = vector.load %arg2[%c0, %c0_0, %c0_1] : memref<9x16x8xbf16, #tpu.memory_space<vmem>>, vector<1x16x8xbf16>
    %2 = vector.shape_cast %1 : vector<1x16x8xbf16> to vector<16x8xbf16>
    %c0_2 = arith.constant 0 : index
    %c0_3 = arith.constant 0 : index
    %3 = vector.load %arg1[%c0_2, %c0_3] : memref<8x1152xbf16, #tpu.memory_space<vmem>>, vector<8x1024xbf16>
    %cst_4 = arith.constant dense<0.000000e+00> : vector<16x1024xf32>
    %4 = tpu.matmul %2, %3, %cst_4 {dimension_numbers = #tpu.dot_dimension_numbers<[1], [0], [0], [1], [0, 0, 1, 1], [], []>} : vector<16x8xbf16>, vector<8x1024xbf16>, vector<16x1024xf32> -> vector<16x1024xf32>
    %5 = arith.addf %0, %4 : vector<16x1024xf32>
    %c1 = arith.constant 1 : index
    %c0_5 = arith.constant 0 : index
    %c0_6 = arith.constant 0 : index
    %6 = vector.load %arg2[%c1, %c0_5, %c0_6] : memref<9x16x8xbf16, #tpu.memory_space<vmem>>, vector<1x16x8xbf16>
    %7 = vector.shape_cast %6 : vector<1x16x8xbf16> to vector<16x8xbf16>
    %c0_7 = arith.constant 0 : index
    %c1_8 = arith.constant 1 : index
    %8 = vector.load %arg1[%c0_7, %c1_8] : memref<8x1152xbf16, #tpu.memory_space<vmem>>, vector<8x1024xbf16>
    %cst_9 = arith.constant dense<0.000000e+00> : vector<16x1024xf32>
    %9 = tpu.matmul %7, %8, %cst_9 {dimension_numbers = #tpu.dot_dimension_numbers<[1], [0], [0], [1], [0, 0, 1, 1], [], []>} : vector<16x8xbf16>, vector<8x1024xbf16>, vector<16x1024xf32> -> vector<16x1024xf32>
    %10 = arith.addf %5, %9 : vector<16x1024xf32>
    %c2 = arith.constant 2 : index
    %c0_10 = arith.constant 0 : index
    %c0_11 = arith.constant 0 : index
    %11 = vector.load %arg2[%c2, %c0_10, %c0_11] : memref<9x16x8xbf16, #tpu.memory_space<vmem>>, vector<1x16x8xbf16>
    %12 = vector.shape_cast %11 : vector<1x16x8xbf16> to vector<16x8xbf16>
    %c0_12 = arith.constant 0 : index
    %c2_13 = arith.constant 2 : index
    %13 = vector.load %arg1[%c0_12, %c2_13] : memref<8x1152xbf16, #tpu.memory_space<vmem>>, vector<8x1024xbf16>
    %cst_14 = arith.constant dense<0.000000e+00> : vector<16x1024xf32>
    %14 = tpu.matmul %12, %13, %cst_14 {dimension_numbers = #tpu.dot_dimension_numbers<[1], [0], [0], [1], [0, 0, 1, 1], [], []>} : vector<16x8xbf16>, vector<8x1024xbf16>, vector<16x1024xf32> -> vector<16x1024xf32>
    %15 = arith.addf %10, %14 : vector<16x1024xf32>
    %c3 = arith.constant 3 : index
    %c0_15 = arith.constant 0 : index
    %c0_16 = arith.constant 0 : index
    %16 = vector.load %arg2[%c3, %c0_15, %c0_16] : memref<9x16x8xbf16, #tpu.memory_space<vmem>>, vector<1x16x8xbf16>
    %17 = vector.shape_cast %16 : vector<1x16x8xbf16> to vector<16x8xbf16>
    %c0_17 = arith.constant 0 : index
    %c32 = arith.constant 32 : index
    %18 = vector.load %arg1[%c0_17, %c32] : memref<8x1152xbf16, #tpu.memory_space<vmem>>, vector<8x1024xbf16>
    %cst_18 = arith.constant dense<0.000000e+00> : vector<16x1024xf32>
    %19 = tpu.matmul %17, %18, %cst_18 {dimension_numbers = #tpu.dot_dimension_numbers<[1], [0], [0], [1], [0, 0, 1, 1], [], []>} : vector<16x8xbf16>, vector<8x1024xbf16>, vector<16x1024xf32> -> vector<16x1024xf32>
    %20 = arith.addf %15, %19 : vector<16x1024xf32>
    %c4 = arith.constant 4 : index
    %c0_19 = arith.constant 0 : index
    %c0_20 = arith.constant 0 : index
    %21 = vector.load %arg2[%c4, %c0_19, %c0_20] : memref<9x16x8xbf16, #tpu.memory_space<vmem>>, vector<1x16x8xbf16>
    %22 = vector.shape_cast %21 : vector<1x16x8xbf16> to vector<16x8xbf16>
    %c0_21 = arith.constant 0 : index
    %c33 = arith.constant 33 : index
    %23 = vector.load %arg1[%c0_21, %c33] : memref<8x1152xbf16, #tpu.memory_space<vmem>>, vector<8x1024xbf16>
    %cst_22 = arith.constant dense<0.000000e+00> : vector<16x1024xf32>
    %24 = tpu.matmul %22, %23, %cst_22 {dimension_numbers = #tpu.dot_dimension_numbers<[1], [0], [0], [1], [0, 0, 1, 1], [], []>} : vector<16x8xbf16>, vector<8x1024xbf16>, vector<16x1024xf32> -> vector<16x1024xf32>
    %25 = arith.addf %20, %24 : vector<16x1024xf32>
    %c5 = arith.constant 5 : index
    %c0_23 = arith.constant 0 : index
    %c0_24 = arith.constant 0 : index
    %26 = vector.load %arg2[%c5, %c0_23, %c0_24] : memref<9x16x8xbf16, #tpu.memory_space<vmem>>, vector<1x16x8xbf16>
    %27 = vector.shape_cast %26 : vector<1x16x8xbf16> to vector<16x8xbf16>
    %c0_25 = arith.constant 0 : index
    %c34 = arith.constant 34 : index
    %28 = vector.load %arg1[%c0_25, %c34] : memref<8x1152xbf16, #tpu.memory_space<vmem>>, vector<8x1024xbf16>
    %cst_26 = arith.constant dense<0.000000e+00> : vector<16x1024xf32>
    %29 = tpu.matmul %27, %28, %cst_26 {dimension_numbers = #tpu.dot_dimension_numbers<[1], [0], [0], [1], [0, 0, 1, 1], [], []>} : vector<16x8xbf16>, vector<8x1024xbf16>, vector<16x1024xf32> -> vector<16x1024xf32>
    %30 = arith.addf %25, %29 : vector<16x1024xf32>
    %c6 = arith.constant 6 : index
    %c0_27 = arith.constant 0 : index
    %c0_28 = arith.constant 0 : index
    %31 = vector.load %arg2[%c6, %c0_27, %c0_28] : memref<9x16x8xbf16, #tpu.memory_space<vmem>>, vector<1x16x8xbf16>
    %32 = vector.shape_cast %31 : vector<1x16x8xbf16> to vector<16x8xbf16>
    %c0_29 = arith.constant 0 : index
    %c64 = arith.constant 64 : index
    %33 = vector.load %arg1[%c0_29, %c64] : memref<8x1152xbf16, #tpu.memory_space<vmem>>, vector<8x1024xbf16>
    %cst_30 = arith.constant dense<0.000000e+00> : vector<16x1024xf32>
    %34 = tpu.matmul %32, %33, %cst_30 {dimension_numbers = #tpu.dot_dimension_numbers<[1], [0], [0], [1], [0, 0, 1, 1], [], []>} : vector<16x8xbf16>, vector<8x1024xbf16>, vector<16x1024xf32> -> vector<16x1024xf32>
    %35 = arith.addf %30, %34 : vector<16x1024xf32>
    %c7 = arith.constant 7 : index
    %c0_31 = arith.constant 0 : index
    %c0_32 = arith.constant 0 : index
    %36 = vector.load %arg2[%c7, %c0_31, %c0_32] : memref<9x16x8xbf16, #tpu.memory_space<vmem>>, vector<1x16x8xbf16>
    %37 = vector.shape_cast %36 : vector<1x16x8xbf16> to vector<16x8xbf16>
    %c0_33 = arith.constant 0 : index
    %c65 = arith.constant 65 : index
    %38 = vector.load %arg1[%c0_33, %c65] : memref<8x1152xbf16, #tpu.memory_space<vmem>>, vector<8x1024xbf16>
    %cst_34 = arith.constant dense<0.000000e+00> : vector<16x1024xf32>
    %39 = tpu.matmul %37, %38, %cst_34 {dimension_numbers = #tpu.dot_dimension_numbers<[1], [0], [0], [1], [0, 0, 1, 1], [], []>} : vector<16x8xbf16>, vector<8x1024xbf16>, vector<16x1024xf32> -> vector<16x1024xf32>
    %40 = arith.addf %35, %39 : vector<16x1024xf32>
    %c8 = arith.constant 8 : index
    %c0_35 = arith.constant 0 : index
    %c0_36 = arith.constant 0 : index
    %41 = vector.load %arg2[%c8, %c0_35, %c0_36] : memref<9x16x8xbf16, #tpu.memory_space<vmem>>, vector<1x16x8xbf16>
    %42 = vector.shape_cast %41 : vector<1x16x8xbf16> to vector<16x8xbf16>
    %c0_37 = arith.constant 0 : index
    %c66 = arith.constant 66 : index
    %43 = vector.load %arg1[%c0_37, %c66] : memref<8x1152xbf16, #tpu.memory_space<vmem>>, vector<8x1024xbf16>
    %cst_38 = arith.constant dense<0.000000e+00> : vector<16x1024xf32>
    %44 = tpu.matmul %42, %43, %cst_38 {dimension_numbers = #tpu.dot_dimension_numbers<[1], [0], [0], [1], [0, 0, 1, 1], [], []>} : vector<16x8xbf16>, vector<8x1024xbf16>, vector<16x1024xf32> -> vector<16x1024xf32>
    %45 = arith.addf %40, %44 : vector<16x1024xf32>
    %c0_39 = arith.constant 0 : index
    %c0_40 = arith.constant 0 : index
    %46 = vector.load %arg3[%c0_39, %c0_40] : memref<16x1xf32, #tpu.memory_space<vmem>>, vector<16x1xf32>
    %47 = vector.broadcast %46 : vector<16x1xf32> to vector<16x1024xf32>
    %48 = arith.addf %45, %47 : vector<16x1024xf32>
    %cst_41 = arith.constant 0.000000e+00 : f32
    %49 = vector.broadcast %cst_41 : f32 to vector<16x1024xf32>
    %50 = arith.maximumf %48, %49 : vector<16x1024xf32>
    %51 = arith.truncf %50 : vector<16x1024xf32> to vector<16x1024xbf16>
    %c0_42 = arith.constant 0 : index
    %c0_43 = arith.constant 0 : index
    %52 = vector.load %arg4[%c0_42, %c0_43] : memref<16x1152xbf16, #tpu.memory_space<vmem>>, vector<16x1024xbf16>
    tpu.vector_store %arg4[%c0_42, %c0_43], %51 {strides = array<i32>} : memref<16x1152xbf16, #tpu.memory_space<vmem>>, vector<16x1024xbf16>,
    %cst_44 = arith.constant 0.000000e+00 : bf16
    %53 = vector.broadcast %cst_44 : bf16 to vector<16x128xbf16>
    %c0_45 = arith.constant 0 : index
    %c1024 = arith.constant 1024 : index
    %54 = vector.load %arg4[%c0_45, %c1024] : memref<16x1152xbf16, #tpu.memory_space<vmem>>, vector<16x128xbf16>
    tpu.vector_store %arg4[%c0_45, %c1024], %53 {strides = array<i32>} : memref<16x1152xbf16, #tpu.memory_space<vmem>>, vector<16x128xbf16>,
    return
  }
  func.func @transform_0(%arg0: i32) -> (i32, i32) {
    %c0_i32 = arith.constant 0 : i32
    %c0_i32_0 = arith.constant 0 : i32
    return %c0_i32, %arg0 : i32, i32
  }
  func.func @transform_1(%arg0: i32) -> (i32, i32, i32) {
    %c0_i32 = arith.constant 0 : i32
    %c0_i32_0 = arith.constant 0 : i32
    %c0_i32_1 = arith.constant 0 : i32
    %c0_i32_2 = arith.constant 0 : i32
    return %c0_i32, %c0_i32_0, %c0_i32_1 : i32, i32, i32
  }
  func.func @transform_2(%arg0: i32) -> (i32, i32) {
    %c0_i32 = arith.constant 0 : i32
    %c0_i32_0 = arith.constant 0 : i32
    %c0_i32_1 = arith.constant 0 : i32
    return %c0_i32, %c0_i32_0 : i32, i32
  }
  func.func @transform_3(%arg0: i32) -> (i32, i32) {
    %c0_i32 = arith.constant 0 : i32
    %c0_i32_0 = arith.constant 0 : i32
    return %c0_i32, %arg0 : i32, i32
  }
}

module attributes {stable_mosaic.version = 11 : i64} {
  func.func @_conv_kernel(%arg0: i32, %arg1: memref<16x1152xbf16, #tpu.memory_space<vmem>>, %arg2: memref<9x32x16xbf16, #tpu.memory_space<vmem>>, %arg3: memref<32x1xf32, #tpu.memory_space<vmem>>, %arg4: memref<32x1152xbf16, #tpu.memory_space<vmem>>) attributes {dimension_semantics = [#tpu.dimension_semantics<parallel>], iteration_bounds = array<i64: 2>, scalar_prefetch = 0 : i64, scratch_operands = 0 : i64, tpu.core_type = #tpu.core_type<tc>, window_params = [{transform_indices = @transform_0, window_bounds = array<i64: 16, 1152>}, {pipeline_mode = #tpu.pipeline_mode<synchronous>, transform_indices = @transform_1, window_bounds = array<i64: 9, 32, 16>}, {pipeline_mode = #tpu.pipeline_mode<synchronous>, transform_indices = @transform_2, window_bounds = array<i64: 32, 1>}, {transform_indices = @transform_3, window_bounds = array<i64: 32, 1152>}]} {
    %cst = arith.constant 0.000000e+00 : f32
    %0 = vector.broadcast %cst : f32 to vector<32x1024xf32>
    %c0 = arith.constant 0 : index
    %c0_0 = arith.constant 0 : index
    %c0_1 = arith.constant 0 : index
    %1 = vector.load %arg2[%c0, %c0_0, %c0_1] : memref<9x32x16xbf16, #tpu.memory_space<vmem>>, vector<1x32x16xbf16>
    %2 = vector.shape_cast %1 : vector<1x32x16xbf16> to vector<32x16xbf16>
    %c0_2 = arith.constant 0 : index
    %c0_3 = arith.constant 0 : index
    %3 = vector.load %arg1[%c0_2, %c0_3] : memref<16x1152xbf16, #tpu.memory_space<vmem>>, vector<16x1024xbf16>
    %cst_4 = arith.constant dense<0.000000e+00> : vector<32x1024xf32>
    %4 = tpu.matmul %2, %3, %cst_4 {dimension_numbers = #tpu.dot_dimension_numbers<[1], [0], [0], [1], [0, 0, 1, 1], [], []>} : vector<32x16xbf16>, vector<16x1024xbf16>, vector<32x1024xf32> -> vector<32x1024xf32>
    %5 = arith.addf %0, %4 : vector<32x1024xf32>
    %c1 = arith.constant 1 : index
    %c0_5 = arith.constant 0 : index
    %c0_6 = arith.constant 0 : index
    %6 = vector.load %arg2[%c1, %c0_5, %c0_6] : memref<9x32x16xbf16, #tpu.memory_space<vmem>>, vector<1x32x16xbf16>
    %7 = vector.shape_cast %6 : vector<1x32x16xbf16> to vector<32x16xbf16>
    %c0_7 = arith.constant 0 : index
    %c1_8 = arith.constant 1 : index
    %8 = vector.load %arg1[%c0_7, %c1_8] : memref<16x1152xbf16, #tpu.memory_space<vmem>>, vector<16x1024xbf16>
    %cst_9 = arith.constant dense<0.000000e+00> : vector<32x1024xf32>
    %9 = tpu.matmul %7, %8, %cst_9 {dimension_numbers = #tpu.dot_dimension_numbers<[1], [0], [0], [1], [0, 0, 1, 1], [], []>} : vector<32x16xbf16>, vector<16x1024xbf16>, vector<32x1024xf32> -> vector<32x1024xf32>
    %10 = arith.addf %5, %9 : vector<32x1024xf32>
    %c2 = arith.constant 2 : index
    %c0_10 = arith.constant 0 : index
    %c0_11 = arith.constant 0 : index
    %11 = vector.load %arg2[%c2, %c0_10, %c0_11] : memref<9x32x16xbf16, #tpu.memory_space<vmem>>, vector<1x32x16xbf16>
    %12 = vector.shape_cast %11 : vector<1x32x16xbf16> to vector<32x16xbf16>
    %c0_12 = arith.constant 0 : index
    %c2_13 = arith.constant 2 : index
    %13 = vector.load %arg1[%c0_12, %c2_13] : memref<16x1152xbf16, #tpu.memory_space<vmem>>, vector<16x1024xbf16>
    %cst_14 = arith.constant dense<0.000000e+00> : vector<32x1024xf32>
    %14 = tpu.matmul %12, %13, %cst_14 {dimension_numbers = #tpu.dot_dimension_numbers<[1], [0], [0], [1], [0, 0, 1, 1], [], []>} : vector<32x16xbf16>, vector<16x1024xbf16>, vector<32x1024xf32> -> vector<32x1024xf32>
    %15 = arith.addf %10, %14 : vector<32x1024xf32>
    %c3 = arith.constant 3 : index
    %c0_15 = arith.constant 0 : index
    %c0_16 = arith.constant 0 : index
    %16 = vector.load %arg2[%c3, %c0_15, %c0_16] : memref<9x32x16xbf16, #tpu.memory_space<vmem>>, vector<1x32x16xbf16>
    %17 = vector.shape_cast %16 : vector<1x32x16xbf16> to vector<32x16xbf16>
    %c0_17 = arith.constant 0 : index
    %c32 = arith.constant 32 : index
    %18 = vector.load %arg1[%c0_17, %c32] : memref<16x1152xbf16, #tpu.memory_space<vmem>>, vector<16x1024xbf16>
    %cst_18 = arith.constant dense<0.000000e+00> : vector<32x1024xf32>
    %19 = tpu.matmul %17, %18, %cst_18 {dimension_numbers = #tpu.dot_dimension_numbers<[1], [0], [0], [1], [0, 0, 1, 1], [], []>} : vector<32x16xbf16>, vector<16x1024xbf16>, vector<32x1024xf32> -> vector<32x1024xf32>
    %20 = arith.addf %15, %19 : vector<32x1024xf32>
    %c4 = arith.constant 4 : index
    %c0_19 = arith.constant 0 : index
    %c0_20 = arith.constant 0 : index
    %21 = vector.load %arg2[%c4, %c0_19, %c0_20] : memref<9x32x16xbf16, #tpu.memory_space<vmem>>, vector<1x32x16xbf16>
    %22 = vector.shape_cast %21 : vector<1x32x16xbf16> to vector<32x16xbf16>
    %c0_21 = arith.constant 0 : index
    %c33 = arith.constant 33 : index
    %23 = vector.load %arg1[%c0_21, %c33] : memref<16x1152xbf16, #tpu.memory_space<vmem>>, vector<16x1024xbf16>
    %cst_22 = arith.constant dense<0.000000e+00> : vector<32x1024xf32>
    %24 = tpu.matmul %22, %23, %cst_22 {dimension_numbers = #tpu.dot_dimension_numbers<[1], [0], [0], [1], [0, 0, 1, 1], [], []>} : vector<32x16xbf16>, vector<16x1024xbf16>, vector<32x1024xf32> -> vector<32x1024xf32>
    %25 = arith.addf %20, %24 : vector<32x1024xf32>
    %c5 = arith.constant 5 : index
    %c0_23 = arith.constant 0 : index
    %c0_24 = arith.constant 0 : index
    %26 = vector.load %arg2[%c5, %c0_23, %c0_24] : memref<9x32x16xbf16, #tpu.memory_space<vmem>>, vector<1x32x16xbf16>
    %27 = vector.shape_cast %26 : vector<1x32x16xbf16> to vector<32x16xbf16>
    %c0_25 = arith.constant 0 : index
    %c34 = arith.constant 34 : index
    %28 = vector.load %arg1[%c0_25, %c34] : memref<16x1152xbf16, #tpu.memory_space<vmem>>, vector<16x1024xbf16>
    %cst_26 = arith.constant dense<0.000000e+00> : vector<32x1024xf32>
    %29 = tpu.matmul %27, %28, %cst_26 {dimension_numbers = #tpu.dot_dimension_numbers<[1], [0], [0], [1], [0, 0, 1, 1], [], []>} : vector<32x16xbf16>, vector<16x1024xbf16>, vector<32x1024xf32> -> vector<32x1024xf32>
    %30 = arith.addf %25, %29 : vector<32x1024xf32>
    %c6 = arith.constant 6 : index
    %c0_27 = arith.constant 0 : index
    %c0_28 = arith.constant 0 : index
    %31 = vector.load %arg2[%c6, %c0_27, %c0_28] : memref<9x32x16xbf16, #tpu.memory_space<vmem>>, vector<1x32x16xbf16>
    %32 = vector.shape_cast %31 : vector<1x32x16xbf16> to vector<32x16xbf16>
    %c0_29 = arith.constant 0 : index
    %c64 = arith.constant 64 : index
    %33 = vector.load %arg1[%c0_29, %c64] : memref<16x1152xbf16, #tpu.memory_space<vmem>>, vector<16x1024xbf16>
    %cst_30 = arith.constant dense<0.000000e+00> : vector<32x1024xf32>
    %34 = tpu.matmul %32, %33, %cst_30 {dimension_numbers = #tpu.dot_dimension_numbers<[1], [0], [0], [1], [0, 0, 1, 1], [], []>} : vector<32x16xbf16>, vector<16x1024xbf16>, vector<32x1024xf32> -> vector<32x1024xf32>
    %35 = arith.addf %30, %34 : vector<32x1024xf32>
    %c7 = arith.constant 7 : index
    %c0_31 = arith.constant 0 : index
    %c0_32 = arith.constant 0 : index
    %36 = vector.load %arg2[%c7, %c0_31, %c0_32] : memref<9x32x16xbf16, #tpu.memory_space<vmem>>, vector<1x32x16xbf16>
    %37 = vector.shape_cast %36 : vector<1x32x16xbf16> to vector<32x16xbf16>
    %c0_33 = arith.constant 0 : index
    %c65 = arith.constant 65 : index
    %38 = vector.load %arg1[%c0_33, %c65] : memref<16x1152xbf16, #tpu.memory_space<vmem>>, vector<16x1024xbf16>
    %cst_34 = arith.constant dense<0.000000e+00> : vector<32x1024xf32>
    %39 = tpu.matmul %37, %38, %cst_34 {dimension_numbers = #tpu.dot_dimension_numbers<[1], [0], [0], [1], [0, 0, 1, 1], [], []>} : vector<32x16xbf16>, vector<16x1024xbf16>, vector<32x1024xf32> -> vector<32x1024xf32>
    %40 = arith.addf %35, %39 : vector<32x1024xf32>
    %c8 = arith.constant 8 : index
    %c0_35 = arith.constant 0 : index
    %c0_36 = arith.constant 0 : index
    %41 = vector.load %arg2[%c8, %c0_35, %c0_36] : memref<9x32x16xbf16, #tpu.memory_space<vmem>>, vector<1x32x16xbf16>
    %42 = vector.shape_cast %41 : vector<1x32x16xbf16> to vector<32x16xbf16>
    %c0_37 = arith.constant 0 : index
    %c66 = arith.constant 66 : index
    %43 = vector.load %arg1[%c0_37, %c66] : memref<16x1152xbf16, #tpu.memory_space<vmem>>, vector<16x1024xbf16>
    %cst_38 = arith.constant dense<0.000000e+00> : vector<32x1024xf32>
    %44 = tpu.matmul %42, %43, %cst_38 {dimension_numbers = #tpu.dot_dimension_numbers<[1], [0], [0], [1], [0, 0, 1, 1], [], []>} : vector<32x16xbf16>, vector<16x1024xbf16>, vector<32x1024xf32> -> vector<32x1024xf32>
    %45 = arith.addf %40, %44 : vector<32x1024xf32>
    %c0_39 = arith.constant 0 : index
    %c0_40 = arith.constant 0 : index
    %46 = vector.load %arg3[%c0_39, %c0_40] : memref<32x1xf32, #tpu.memory_space<vmem>>, vector<32x1xf32>
    %47 = vector.broadcast %46 : vector<32x1xf32> to vector<32x1024xf32>
    %48 = arith.addf %45, %47 : vector<32x1024xf32>
    %49 = arith.truncf %48 : vector<32x1024xf32> to vector<32x1024xbf16>
    %c0_41 = arith.constant 0 : index
    %c0_42 = arith.constant 0 : index
    %50 = vector.load %arg4[%c0_41, %c0_42] : memref<32x1152xbf16, #tpu.memory_space<vmem>>, vector<32x1024xbf16>
    tpu.vector_store %arg4[%c0_41, %c0_42], %49 {strides = array<i32>} : memref<32x1152xbf16, #tpu.memory_space<vmem>>, vector<32x1024xbf16>,
    %cst_43 = arith.constant 0.000000e+00 : bf16
    %51 = vector.broadcast %cst_43 : bf16 to vector<32x128xbf16>
    %c0_44 = arith.constant 0 : index
    %c1024 = arith.constant 1024 : index
    %52 = vector.load %arg4[%c0_44, %c1024] : memref<32x1152xbf16, #tpu.memory_space<vmem>>, vector<32x128xbf16>
    tpu.vector_store %arg4[%c0_44, %c1024], %51 {strides = array<i32>} : memref<32x1152xbf16, #tpu.memory_space<vmem>>, vector<32x128xbf16>,
    return
  }
  func.func @transform_0(%arg0: i32) -> (i32, i32) {
    %c0_i32 = arith.constant 0 : i32
    %c0_i32_0 = arith.constant 0 : i32
    return %c0_i32, %arg0 : i32, i32
  }
  func.func @transform_1(%arg0: i32) -> (i32, i32, i32) {
    %c0_i32 = arith.constant 0 : i32
    %c0_i32_0 = arith.constant 0 : i32
    %c0_i32_1 = arith.constant 0 : i32
    %c0_i32_2 = arith.constant 0 : i32
    return %c0_i32, %c0_i32_0, %c0_i32_1 : i32, i32, i32
  }
  func.func @transform_2(%arg0: i32) -> (i32, i32) {
    %c0_i32 = arith.constant 0 : i32
    %c0_i32_0 = arith.constant 0 : i32
    %c0_i32_1 = arith.constant 0 : i32
    return %c0_i32, %c0_i32_0 : i32, i32
  }
  func.func @transform_3(%arg0: i32) -> (i32, i32) {
    %c0_i32 = arith.constant 0 : i32
    %c0_i32_0 = arith.constant 0 : i32
    return %c0_i32, %arg0 : i32, i32
  }
}

module attributes {stable_mosaic.version = 11 : i64} {
  func.func @_fc_head_kernel(%arg0: i32, %arg1: memref<8x6272xbf16, #tpu.memory_space<vmem>>, %arg2: memref<6272x128xbf16, #tpu.memory_space<vmem>>, %arg3: memref<1x128xf32, #tpu.memory_space<vmem>>, %arg4: memref<128x128xbf16, #tpu.memory_space<vmem>>, %arg5: memref<1x128xf32, #tpu.memory_space<vmem>>, %arg6: memref<8x128xf32, #tpu.memory_space<vmem>>) attributes {dimension_semantics = [#tpu.dimension_semantics<parallel>], iteration_bounds = array<i64: 1>, scalar_prefetch = 0 : i64, scratch_operands = 0 : i64, tpu.core_type = #tpu.core_type<tc>, window_params = [{transform_indices = @transform_0, window_bounds = array<i64: 8, 6272>}, {pipeline_mode = #tpu.pipeline_mode<synchronous>, transform_indices = @transform_1, window_bounds = array<i64: 6272, 128>}, {pipeline_mode = #tpu.pipeline_mode<synchronous>, transform_indices = @transform_2, window_bounds = array<i64: 1, 128>}, {pipeline_mode = #tpu.pipeline_mode<synchronous>, transform_indices = @transform_3, window_bounds = array<i64: 128, 128>}, {pipeline_mode = #tpu.pipeline_mode<synchronous>, transform_indices = @transform_4, window_bounds = array<i64: 1, 128>}, {transform_indices = @transform_5, window_bounds = array<i64: 8, 128>}]} {
    %c0 = arith.constant 0 : index
    %c0_0 = arith.constant 0 : index
    %0 = vector.load %arg1[%c0, %c0_0] : memref<8x6272xbf16, #tpu.memory_space<vmem>>, vector<8x6272xbf16>
    %c0_1 = arith.constant 0 : index
    %c0_2 = arith.constant 0 : index
    %1 = vector.load %arg2[%c0_1, %c0_2] : memref<6272x128xbf16, #tpu.memory_space<vmem>>, vector<6272x128xbf16>
    %cst = arith.constant dense<0.000000e+00> : vector<8x128xf32>
    %2 = tpu.matmul %0, %1, %cst {dimension_numbers = #tpu.dot_dimension_numbers<[1], [0], [0], [1], [0, 0, 1, 1], [], []>} : vector<8x6272xbf16>, vector<6272x128xbf16>, vector<8x128xf32> -> vector<8x128xf32>
    %c0_3 = arith.constant 0 : index
    %c0_4 = arith.constant 0 : index
    %3 = vector.load %arg3[%c0_3, %c0_4] : memref<1x128xf32, #tpu.memory_space<vmem>>, vector<1x128xf32>
    %4 = vector.broadcast %3 : vector<1x128xf32> to vector<8x128xf32>
    %5 = arith.addf %2, %4 : vector<8x128xf32>
    %cst_5 = arith.constant 0.000000e+00 : f32
    %6 = vector.broadcast %cst_5 : f32 to vector<8x128xf32>
    %7 = arith.maximumf %5, %6 : vector<8x128xf32>
    %8 = arith.truncf %7 : vector<8x128xf32> to vector<8x128xbf16>
    %c0_6 = arith.constant 0 : index
    %c0_7 = arith.constant 0 : index
    %9 = vector.load %arg4[%c0_6, %c0_7] : memref<128x128xbf16, #tpu.memory_space<vmem>>, vector<128x128xbf16>
    %cst_8 = arith.constant dense<0.000000e+00> : vector<8x128xf32>
    %10 = tpu.matmul %8, %9, %cst_8 {dimension_numbers = #tpu.dot_dimension_numbers<[1], [0], [0], [1], [0, 0, 1, 1], [], []>} : vector<8x128xbf16>, vector<128x128xbf16>, vector<8x128xf32> -> vector<8x128xf32>
    %c0_9 = arith.constant 0 : index
    %c0_10 = arith.constant 0 : index
    %11 = vector.load %arg5[%c0_9, %c0_10] : memref<1x128xf32, #tpu.memory_space<vmem>>, vector<1x128xf32>
    %12 = vector.broadcast %11 : vector<1x128xf32> to vector<8x128xf32>
    %13 = arith.addf %10, %12 : vector<8x128xf32>
    %cst_11 = arith.constant dense<0xFF800000> : vector<8xf32>
    %14 = vector.multi_reduction <maximumf>, %13, %cst_11 [1] : vector<8x128xf32> to vector<8xf32>
    %15 = vector.shape_cast %14 : vector<8xf32> to vector<8x1xf32>
    %16 = vector.broadcast %15 : vector<8x1xf32> to vector<8x128xf32>
    %17 = arith.subf %13, %16 : vector<8x128xf32>
    %18 = math.exp %17 : vector<8x128xf32>
    %cst_12 = arith.constant dense<0.000000e+00> : vector<8xf32>
    %19 = vector.multi_reduction <add>, %18, %cst_12 [1] : vector<8x128xf32> to vector<8xf32>
    %20 = vector.shape_cast %19 : vector<8xf32> to vector<8x1xf32>
    %21 = math.log %20 : vector<8x1xf32>
    %22 = vector.broadcast %21 : vector<8x1xf32> to vector<8x128xf32>
    %23 = arith.subf %17, %22 : vector<8x128xf32>
    %c0_13 = arith.constant 0 : index
    %c0_14 = arith.constant 0 : index
    %24 = vector.load %arg6[%c0_13, %c0_14] : memref<8x128xf32, #tpu.memory_space<vmem>>, vector<8x128xf32>
    tpu.vector_store %arg6[%c0_13, %c0_14], %23 {strides = array<i32>} : memref<8x128xf32, #tpu.memory_space<vmem>>, vector<8x128xf32>,
    return
  }
  func.func @transform_0(%arg0: i32) -> (i32, i32) {
    %c0_i32 = arith.constant 0 : i32
    %c0_i32_0 = arith.constant 0 : i32
    return %arg0, %c0_i32 : i32, i32
  }
  func.func @transform_1(%arg0: i32) -> (i32, i32) {
    %c0_i32 = arith.constant 0 : i32
    %c0_i32_0 = arith.constant 0 : i32
    %c0_i32_1 = arith.constant 0 : i32
    return %c0_i32, %c0_i32_0 : i32, i32
  }
  func.func @transform_2(%arg0: i32) -> (i32, i32) {
    %c0_i32 = arith.constant 0 : i32
    %c0_i32_0 = arith.constant 0 : i32
    %c0_i32_1 = arith.constant 0 : i32
    return %c0_i32, %c0_i32_0 : i32, i32
  }
  func.func @transform_3(%arg0: i32) -> (i32, i32) {
    %c0_i32 = arith.constant 0 : i32
    %c0_i32_0 = arith.constant 0 : i32
    %c0_i32_1 = arith.constant 0 : i32
    return %c0_i32, %c0_i32_0 : i32, i32
  }
  func.func @transform_4(%arg0: i32) -> (i32, i32) {
    %c0_i32 = arith.constant 0 : i32
    %c0_i32_0 = arith.constant 0 : i32
    %c0_i32_1 = arith.constant 0 : i32
    return %c0_i32, %c0_i32_0 : i32, i32
  }
  func.func @transform_5(%arg0: i32) -> (i32, i32) {
    %c0_i32 = arith.constant 0 : i32
    %c0_i32_0 = arith.constant 0 : i32
    return %arg0, %c0_i32 : i32, i32
  }
}

</mosaic_0001>

<bundles_post_ra>
// kernel: net1_forward.3
= control target key start
LH: loop header
LB: loop body
LE: loop exit
PB: predicated region body
PF: predicated region fallthrough
CT: control target
= control target key end

     0   :  { %s3002_s12 = smov 0   ;;  %s3004_s13 = smov 0   ;;  %s3426_s0 = inlined_call_operand.vmem [shape: bf16[8,2304], index: 0, kind: input, shape index: {}]   ;;  %s3427_s1 = inlined_call_operand.vmem [shape: bf16[9,16,8], index: 1, kind: input, shape index: {}]   ;;  %s3428_s2 = inlined_call_operand.vmem [shape: f32[16,1], index: 2, kind: input, shape index: {}]   ;;  %s3429_s3 = inlined_call_operand.vmem [shape: bf16[16,2304], index: 3, kind: output, shape index: {}]  }
   0x1   :  { %s3006_s14 = smov 0  }
   0x2 LB: > { %s3015_s15 = sadd.s32 4294967295, %s2971_s14   ;;  %s3017_s16 = sadd.s32 1, %s2971_s14   ;;  %s2971_s14 = sphi %s3006_s14, %s3433_s14   ;;  %s2967_s13 = sphi %s3004_s13, %s3432_s13   ;;  %s2963_s12 = sphi %s3002_s12, %s3431_s12  }
   0x3   : > { %s85_s17 = ssub.s32 %s2971_s14, %s3017_s16  ;;  %s88_s18 = sadd.s32 1, %s2967_s13 }
   0x4   : > { %p86_p0 = scmp.eq.s32.totalorder %s85_s17, 0  ;;  %p98_p1 = scmp.ne.s32.totalorder %s2967_s13, %s2963_s12 }
   0x5   : > { %p99_p2 = scmp.eq.s32.totalorder %s3015_s15, 1  ;;  %p2627_p3 = scmp.ge.s32.totalorder %s2971_s14, 1 }
   0x6   : > { %s3025_s19 = scalar_select %p86_p0, %s2967_s13, %s88_s18  }
   0x7   : > { %p3027_p4 = por %p99_p2, %p98_p1  ;;  %p138_p5 = scmp.lt.s32.totalorder %s2971_s14, 3 }
   0x9   : > { %p139_p6 = pnand %p2627_p3, %p138_p5 }
   0xa   : > { %s161_s21 = smul.u32 (!%p139_p6), 9, %s3015_s15  ;;  %v2973_v0 = vmov (!%p139_p6), 0   ;;  %s2974_s26 = smov (!%p139_p6), 127   ;;  %vm229_vm0 = vcmask (!%p139_p6), 1039360   ;;  %vm242_vm1 = vcmask (!%p139_p6), 1043456   ;;  %v2940_v21 = vld [vmem:[%s3427_s1 + $0x8] sm:$0xff] (!%p139_p6)  }
   0xb   : > { %142 = sbr.rel (%p139_p6) target bundleno = 519 (0x207), region = 32  ;;  %299 = vmatprep.mubr.bf16.mxu0 (!%p139_p6), %v2973_v0  ;;  %342 = vmatprep.mubr.bf16.mxu1 (!%p139_p6), %v2973_v0  ;;  %s2975_s27 = smov (!%p139_p6), 126   ;;  %vm238_vm2 = vcmask (!%p139_p6), 64512   ;;  %v2941_v41 = vld [vmem:[%s3427_s1] sm:$0xff] (!%p139_p6)   ;;  %vm689_vm3 = vcmask (!%p139_p6), 1031168   ;;  %v2414_v47 = vld [vmem:[%s3428_s2 + $0x8] sm:$0xff] (!%p139_p6) }
   0xc   : > { %p162_p7 = scmp.lt.s32.totalorder (!%p139_p6), %s161_s21, 17  ;;  %2929 = vset.pattern.permute.xlu0 (!%p139_p6), %v2973_v0  ;;  %2930 = vset.pattern.permute.xlu1 (!%p139_p6), %v2973_v0  ;;  %s2976_s28 = smov (!%p139_p6), 96   ;;  %v2413_v46 = vld [vmem:[%s3428_s2] sm:$0xff] (!%p139_p6)  ;;  %vm939_vm4 = vcmask (!%p139_p6), 785408   ;;  %v2942_v62 = vld [vmem:[%s3427_s1 + $0x10] sm:$0xff] (!%p139_p6)   ;;  %vm1189_vm5 = vcmask (!%p139_p6), 777216  }
   0xd   : > { %s2977_s29 = smov (!%p139_p6), 95   ;;  %s2978_s30 = smov (!%p139_p6), 94   ;;  %vm1439_vm6 = vcmask (!%p139_p6), 769024   ;;  %vm1689_vm7 = vcmask (!%p139_p6), 523264   ;;  %vm1939_vm8 = vcmask (!%p139_p6), 515072   ;;  %vm2189_vm9 = vcmask (!%p139_p6), 506880  }
   0xe   : > { %s2979_s4 = smov (!%p139_p6), 64   ;;  %s2980_s5 = smov (!%p139_p6), 63  }
   0xf   : > { %s2981_s8 = smov (!%p139_p6), 62  }
  0x12   : > { %s3435_s21 = smov (!%p162_p7, %s161_s21), 17 }
  0x13   : > { %s2628_s22 = sshll.u32 %s3435_s21, 2 }
  0x14   : > { %s165_s25 = scalar_lea.vmem %s3426_s0, %s2628_s22 }
  0x15   : > { %v179_v1 = vld [vmem:[%s165_s25 + $0x8] sm:$0xff]  ;;  %v178_v2 = vld [vmem:[%s165_s25] sm:$0xff]  ;;  %v180_v7 = vld [vmem:[%s165_s25 + $0x10] sm:$0xff] }
  0x16   : > { %v3039_v3 = vcombine.low %v179_v1, %v179_v1  ;;  %v3041_v4 = vcombine.low %v178_v2, %v178_v2  ;;  %v3045_v5 = vcombine.high %v179_v1, %v179_v1  ;;  %v3047_v6 = vcombine.high %v178_v2, %v178_v2  ;;  %v181_v10 = vld [vmem:[%s165_s25 + $0x18] sm:$0xff]  ;;  %v3063_v13 = vld [vmem:[%s165_s25 + $0x20] ss:$0 sps:$4 sm:$0xff]  }
  0x17   : > { %v3051_v8 = vcombine.high %v180_v7, %v180_v7  ;;  %v3053_v9 = vcombine.low %v180_v7, %v180_v7  ;;  %v3057_v11 = vcombine.high %v181_v10, %v181_v10  ;;  %v3059_v12 = vcombine.low %v181_v10, %v181_v10 }
  0x18   : > { %215 = vrot.lane.b32.xlu1 %v3039_v3, %s2974_s26  ;;  %211 = vrot.lane.b32.xlu0 %v3041_v4, %s2974_s26  ;;  %v468_v36 = vsel %vm242_vm1, %v3041_v4, 0  ;;  %v474_v40 = vsel %vm242_vm1, %v3039_v3, 0 }
  0x19   : > { %v480_v44 = vsel %vm242_vm1, %v3053_v9, 0  ;;  %v486_v50 = vsel %vm242_vm1, %v3059_v12, 0 }
  0x1c   : > { %217 = vrot.lane.b32.xlu1 %v3045_v5, %s2974_s26  ;;  %213 = vrot.lane.b32.xlu0 %v3047_v6, %s2974_s26 }
  0x20   : > { %221 = vrot.lane.b32.xlu1 %v3051_v8, %s2974_s26  ;;  %219 = vrot.lane.b32.xlu0 %v3053_v9, %s2974_s26 }
  0x24   : > { %225 = vrot.lane.b32.xlu1 %v3057_v11, %s2974_s26  ;;  %223 = vrot.lane.b32.xlu0 %v3059_v12, %s2974_s26 }
  0x28   : > { %671 = vrot.lane.b32.xlu1 %v3041_v4, %s2975_s27  ;;  %227 = vrot.lane.b32.xlu0 %v3063_v13, %s2974_s26 }
  0x2c   : > { %675 = vrot.lane.b32.xlu1 %v3039_v3, %s2975_s27  ;;  %673 = vrot.lane.b32.xlu0 %v3047_v6, %s2975_s27 }
  0x30   : > { %679 = vrot.lane.b32.xlu1 %v3053_v9, %s2975_s27  ;;  %677 = vrot.lane.b32.xlu0 %v3045_v5, %s2975_s27 }
  0x34   : > { %683 = vrot.lane.b32.xlu1 %v3059_v12, %s2975_s27  ;;  %681 = vrot.lane.b32.xlu0 %v3051_v8, %s2975_s27 }
  0x38   : > { %687 = vrot.lane.b32.xlu1 %v3063_v13, %s2975_s27  ;;  %685 = vrot.lane.b32.xlu0 %v3057_v11, %s2975_s27 }
  0x3c   : > { %923 = vrot.lane.b32.xlu1 %v3047_v6, %s2976_s28  ;;  %921 = vrot.lane.b32.xlu0 %v3041_v4, %s2976_s28 }
  0x40   : > { %927 = vrot.lane.b32.xlu1 %v3045_v5, %s2976_s28  ;;  %925 = vrot.lane.b32.xlu0 %v3039_v3, %s2976_s28 }
  0x44   : > { %931 = vrot.lane.b32.xlu1 %v3051_v8, %s2976_s28  ;;  %929 = vrot.lane.b32.xlu0 %v3053_v9, %s2976_s28 }
  0x48   : > { %935 = vrot.lane.b32.xlu1 %v3057_v11, %s2976_s28  ;;  %933 = vrot.lane.b32.xlu0 %v3059_v12, %s2976_s28 }
  0x4c   : > { %1171 = vrot.lane.b32.xlu1 %v3041_v4, %s2977_s29  ;;  %937 = vrot.lane.b32.xlu0 %v3063_v13, %s2976_s28 }
  0x50   : > { %1175 = vrot.lane.b32.xlu1 %v3039_v3, %s2977_s29  ;;  %1173 = vrot.lane.b32.xlu0 %v3047_v6, %s2977_s29 }
  0x54   : > { %1179 = vrot.lane.b32.xlu1 %v3053_v9, %s2977_s29  ;;  %1177 = vrot.lane.b32.xlu0 %v3045_v5, %s2977_s29 }
  0x58   : > { %1183 = vrot.lane.b32.xlu1 %v3059_v12, %s2977_s29  ;;  %1181 = vrot.lane.b32.xlu0 %v3051_v8, %s2977_s29 }
  0x5c   : > { %1187 = vrot.lane.b32.xlu1 %v3063_v13, %s2977_s29  ;;  %1185 = vrot.lane.b32.xlu0 %v3057_v11, %s2977_s29 }
  0x60   : > { %1423 = vrot.lane.b32.xlu1 %v3047_v6, %s2978_s30  ;;  %1421 = vrot.lane.b32.xlu0 %v3041_v4, %s2978_s30 }
  0x64   : > { %1427 = vrot.lane.b32.xlu1 %v3045_v5, %s2978_s30  ;;  %1425 = vrot.lane.b32.xlu0 %v3039_v3, %s2978_s30 }
  0x68   : > { %1431 = vrot.lane.b32.xlu1 %v3051_v8, %s2978_s30  ;;  %1429 = vrot.lane.b32.xlu0 %v3053_v9, %s2978_s30 }
  0x6c   : > { %1435 = vrot.lane.b32.xlu1 %v3057_v11, %s2978_s30  ;;  %1433 = vrot.lane.b32.xlu0 %v3059_v12, %s2978_s30 }
  0x70   : > { %1671 = vrot.lane.b32.xlu1 %v3041_v4, %s2979_s4  ;;  %1437 = vrot.lane.b32.xlu0 %v3063_v13, %s2978_s30 }
  0x74   : > { %1675 = vrot.lane.b32.xlu1 %v3039_v3, %s2979_s4  ;;  %1673 = vrot.lane.b32.xlu0 %v3047_v6, %s2979_s4 }
  0x78   : > { %1679 = vrot.lane.b32.xlu1 %v3053_v9, %s2979_s4  ;;  %1677 = vrot.lane.b32.xlu0 %v3045_v5, %s2979_s4 }
  0x7c   : > { %1683 = vrot.lane.b32.xlu1 %v3059_v12, %s2979_s4  ;;  %1681 = vrot.lane.b32.xlu0 %v3051_v8, %s2979_s4 }
  0x80   : > { %1687 = vrot.lane.b32.xlu1 %v3063_v13, %s2979_s4  ;;  %1685 = vrot.lane.b32.xlu0 %v3057_v11, %s2979_s4 }
  0x84   : > { %1923 = vrot.lane.b32.xlu1 %v3047_v6, %s2980_s5  ;;  %1921 = vrot.lane.b32.xlu0 %v3041_v4, %s2980_s5 }
  0x88   : > { %1927 = vrot.lane.b32.xlu1 %v3045_v5, %s2980_s5  ;;  %1925 = vrot.lane.b32.xlu0 %v3039_v3, %s2980_s5 }
  0x8a   : > { %v216_v14 = vpop.permute.xlu1 %215  ;;  %v212_v15 = vpop.permute.xlu0 %211 }
  0x8c   : > { %1931 = vrot.lane.b32.xlu1 %v3051_v8, %s2980_s5  ;;  %1929 = vrot.lane.b32.xlu0 %v3053_v9, %s2980_s5 }
  0x8e   : > { %v218_v16 = vpop.permute.xlu1 %217  ;;  %v214_v17 = vpop.permute.xlu0 %213 }
  0x8f   : > { %v231_v18 = vsel %vm229_vm0, %v214_v17, %v216_v14  ;;  %v230_v19 = vsel %vm229_vm0, %v212_v15, %v214_v17  ;;  %v232_v24 = vsel %vm229_vm0, %v216_v14, %v218_v16 }
  0x90   : > { %1935 = vrot.lane.b32.xlu1 %v3057_v11, %s2980_s5  ;;  %1933 = vrot.lane.b32.xlu0 %v3059_v12, %s2980_s5  ;;  %v244_v20 = vsel %vm242_vm1, %v230_v19, 0  ;;  %v250_v26 = vsel %vm242_vm1, %v232_v24, 0 }
  0x91   : > { %2641 = vmatprep.subr.msk.bf16.mxu0 %vm242_vm1, %v231_v18 }
  0x92   : > { %268 = vmatpush1.bf16.msra.mxu0 %v244_v20  ;;  %v222_v22 = vpop.permute.xlu1 %221  ;;  %v220_v23 = vpop.permute.xlu0 %219  ;;  %v2943_v20 = vld [vmem:[%s3427_s1 + $0x18] sm:$0xff]  }
  0x93   : > { %v233_v25 = vsel %vm229_vm0, %v218_v16, %v220_v23  ;;  %v234_v27 = vsel %vm229_vm0, %v220_v23, %v222_v22 }
  0x94   : > { %2171 = vrot.lane.b32.xlu1 %v3041_v4, %s2981_s8  ;;  %1937 = vrot.lane.b32.xlu0 %v3063_v13, %s2980_s5  ;;  %v256_v31 = vsel %vm242_vm1, %v234_v27, 0 }
  0x95   : > { %2642 = vmatmul.mubr.msk.bf16.vlgmr.msra.gmra.mrb[0].mxu0 %vm238_vm2, %v2940_v21  ;;  %2643 = vmatprep.subr.msk.bf16.mxu1 %vm242_vm1, %v233_v25 }
  0x96   : > { %311 = vmatpush1.bf16.msra.mxu1 %v250_v26  ;;  %v226_v28 = vpop.permute.xlu1 %225  ;;  %v224_v29 = vpop.permute.xlu0 %223  ;;  %385 = vmatprep.mubr.bf16.mxu0 %v2973_v0 }
  0x97   : > { %v235_v30 = vsel %vm229_vm0, %v222_v22, %v224_v29  ;;  %v236_v32 = vsel %vm229_vm0, %v224_v29, %v226_v28 }
  0x98   : > { %2175 = vrot.lane.b32.xlu1 %v3039_v3, %s2981_s8  ;;  %2173 = vrot.lane.b32.xlu0 %v3047_v6, %s2981_s8  ;;  %v262_v37 = vsel %vm242_vm1, %v236_v32, 0 }
  0x99   : > { %2644 = vmatmul.mubr.msk.bf16.vlgmr.msra.gmra.mrb[0].mxu1 %vm238_vm2, %v2940_v21  ;;  %2645 = vmatprep.subr.msk.bf16.mxu0 %vm242_vm1, %v235_v30 }
  0x9a   : > { %354 = vmatpush1.bf16.msra.mxu0 %v256_v31  ;;  %v672_v33 = vpop.permute.xlu1 %671  ;;  %v228_v34 = vpop.permute.xlu0 %227  ;;  %428 = vmatprep.mubr.bf16.mxu1 %v2973_v0 }
  0x9b   : > { %v237_v35 = vsel %vm229_vm0, %v226_v28, %v228_v34  ;;  %2658 = vmatprep.subr.msk.bf16.mxu0 %vm242_vm1, %v3047_v6 }
  0x9c   : > { %2179 = vrot.lane.b32.xlu1 %v3053_v9, %s2981_s8  ;;  %2177 = vrot.lane.b32.xlu0 %v3045_v5, %s2981_s8 }
  0x9d   : > { %2646 = vmatmul.mubr.msk.bf16.vlgmr.msra.gmra.mrb[4].mxu0 %vm238_vm2, %v2940_v21  ;;  %2647 = vmatprep.subr.msk.bf16.mxu1 %vm242_vm1, %v237_v35 }
  0x9e   : > { %397 = vmatpush1.bf16.msra.mxu1 %v262_v37  ;;  %v676_v38 = vpop.permute.xlu1 %675  ;;  %v674_v39 = vpop.permute.xlu0 %673  ;;  %492 = vmatpush1.bf16.msra.mxu0 %v468_v36 }
  0x9f   : > { %523 = vmatprep.mubr.bf16.mxu0 %v2973_v0  ;;  %2660 = vmatprep.subr.msk.bf16.mxu1 %vm242_vm1, %v3045_v5  ;;  %v691_v45 = vsel %vm689_vm3, %v674_v39, %v676_v38  ;;  %v690_v52 = vsel %vm689_vm3, %v672_v33, %v674_v39 }
  0xa0   : > { %2183 = vrot.lane.b32.xlu1 %v3059_v12, %s2981_s8  ;;  %2181 = vrot.lane.b32.xlu0 %v3051_v8, %s2981_s8  ;;  %v702_v56 = vsel %vm242_vm1, %v690_v52, 0 }
  0xa1   : > { %2648 = vmatmul.mubr.msk.bf16.vlgmr.msra.gmra.mrb[4].mxu1 %vm238_vm2, %v2940_v21  ;;  %2662 = vmatprep.subr.msk.bf16.mxu0 %vm242_vm1, %v3051_v8 }
  0xa2   : > { %v680_v42 = vpop.permute.xlu1 %679  ;;  %v678_v43 = vpop.permute.xlu0 %677  ;;  %535 = vmatpush1.bf16.msra.mxu1 %v474_v40  ;;  %566 = vmatprep.mubr.bf16.mxu1 %v2973_v0 }
  0xa3   : > { %2664 = vmatprep.subr.msk.bf16.mxu1 %vm242_vm1, %v3057_v11  ;;  %v693_v51 = vsel %vm689_vm3, %v678_v43, %v680_v42  ;;  %v692_v57 = vsel %vm689_vm3, %v676_v38, %v678_v43 }
  0xa4   : > { %2187 = vrot.lane.b32.xlu1 %v3063_v13, %s2981_s8  ;;  %2185 = vrot.lane.b32.xlu0 %v3057_v11, %s2981_s8  ;;  %v708_v61 = vsel %vm242_vm1, %v692_v57, 0  ;;  %s158_s8 = sand.u32 1, %s2963_s12   ;;  %s2766_s12 = smul.u32 (%p3027_p4), 36, %s3015_s15 }
  0xa5   : > { %2659 = vmatmul.mubr.msk.bf16.vlgmr.msra.gmra.mrb[0].mxu0 %vm238_vm2, %v2941_v41  ;;  %s2895_s9 = smul.u32 72, %s158_s8 }
  0xa6   : > { %578 = vmatpush1.bf16.msra.mxu0 %v480_v44  ;;  %v684_v48 = vpop.permute.xlu1 %683  ;;  %v682_v49 = vpop.permute.xlu0 %681  ;;  %609 = vmatprep.mubr.bf16.mxu0 %v2973_v0  ;;  %s2524_s14 = scalar_lea.vmem (%p3027_p4), %s3429_s3, %s2766_s12 }
  0xa7   : > { %2669 = vmatprep.subr.msk.bf16.mxu0 %vm242_vm1, %v691_v45  ;;  %v695_v55 = vsel %vm689_vm3, %v682_v49, %v684_v48  ;;  %v694_v63 = vsel %vm689_vm3, %v680_v42, %v682_v49  ;;  %s3386_s10 = scalar_lea.vmem [#allocation2], %s2895_s9 }
  0xa8   : > { %2417 = vperm.xlu0 %2929, %v2413_v46   ;;  %2422 = vperm.xlu1 %2930, %v2414_v47   ;;  %v714_v4 = vsel %vm242_vm1, %v694_v63, 0  ;;  %2513 = vst [vmem:[%s3386_s10 + $0x20] sm:$0xf] %v2973_v0  ;;  %2514 = vst [vmem:[%s3386_s10 + $0x44] sm:$0xf] %v2973_v0 }
  0xa9   : > { %2661 = vmatmul.mubr.msk.bf16.vlgmr.msra.gmra.mrb[0].mxu1 %vm238_vm2, %v2941_v41 }
  0xaa   : > { %621 = vmatpush1.bf16.msra.mxu1 %v486_v50  ;;  %v688_v53 = vpop.permute.xlu1 %687  ;;  %v686_v54 = vpop.permute.xlu0 %685  ;;  %652 = vmatprep.mubr.bf16.mxu1 %v2973_v0 }
  0xab   : > { %2671 = vmatprep.subr.msk.bf16.mxu1 %vm242_vm1, %v693_v51  ;;  %v697_v60 = vsel %vm689_vm3, %v686_v54, %v688_v53  ;;  %v696_v5 = vsel %vm689_vm3, %v684_v48, %v686_v54 }
  0xac   : > { %v720_v9 = vsel %vm242_vm1, %v696_v5, 0 }
  0xad   : > { %2663 = vmatmul.mubr.msk.bf16.vlgmr.msra.gmra.mrb[4].mxu0 %vm238_vm2, %v2941_v41 }
  0xae   : > { %726 = vmatpush1.bf16.msra.mxu0 %v702_v56  ;;  %v924_v58 = vpop.permute.xlu1 %923  ;;  %v922_v59 = vpop.permute.xlu0 %921  ;;  %757 = vmatprep.mubr.bf16.mxu0 %v2973_v0 }
  0xaf   : > { %2673 = vmatprep.subr.msk.bf16.mxu0 %vm242_vm1, %v695_v55  ;;  %v940_v10 = vsel %vm939_vm4, %v922_v59, %v924_v58 }
  0xb0   : > { %v952_v14 = vsel %vm242_vm1, %v940_v10, 0 }
  0xb1   : > { %2665 = vmatmul.mubr.msk.bf16.vlgmr.msra.gmra.mrb[4].mxu1 %vm238_vm2, %v2941_v41  ;;  %v2944_v41 = vld [vmem:[%s3427_s1 + $0x20] sm:$0xff]  }
  0xb2   : > { %769 = vmatpush1.bf16.msra.mxu1 %v708_v61  ;;  %v928_v1 = vpop.permute.xlu1 %927  ;;  %v926_v2 = vpop.permute.xlu0 %925  ;;  %800 = vmatprep.mubr.bf16.mxu1 %v2973_v0  ;;  %v2945_v61 = vld [vmem:[%s3427_s1 + $0x28] sm:$0xff]  }
  0xb3   : > { %2675 = vmatprep.subr.msk.bf16.mxu1 %vm242_vm1, %v697_v60  ;;  %v941_v3 = vsel %vm939_vm4, %v924_v58, %v926_v2  ;;  %v942_v15 = vsel %vm939_vm4, %v926_v2, %v928_v1 }
  0xb4   : > { %v958_v19 = vsel %vm242_vm1, %v942_v15, 0 }
  0xb5   : > { %2670 = vmatmul.mubr.msk.bf16.vlgmr.msra.gmra.mrb[0].mxu0 %vm238_vm2, %v2942_v62 }
  0xb6   : > { %812 = vmatpush1.bf16.msra.mxu0 %v714_v4  ;;  %v932_v6 = vpop.permute.xlu1 %931  ;;  %v930_v7 = vpop.permute.xlu0 %929  ;;  %843 = vmatprep.mubr.bf16.mxu0 %v2973_v0 }
  0xb7   : > { %2680 = vmatprep.subr.msk.bf16.mxu0 %vm242_vm1, %v941_v3  ;;  %v943_v8 = vsel %vm939_vm4, %v928_v1, %v930_v7  ;;  %v944_v21 = vsel %vm939_vm4, %v930_v7, %v932_v6 }
  0xb8   : > { %v964_v25 = vsel %vm242_vm1, %v944_v21, 0 }
  0xb9   : > { %2672 = vmatmul.mubr.msk.bf16.vlgmr.msra.gmra.mrb[0].mxu1 %vm238_vm2, %v2942_v62 }
  0xba   : > { %855 = vmatpush1.bf16.msra.mxu1 %v720_v9  ;;  %v936_v11 = vpop.permute.xlu1 %935  ;;  %v934_v12 = vpop.permute.xlu0 %933  ;;  %886 = vmatprep.mubr.bf16.mxu1 %v2973_v0 }
  0xbb   : > { %2682 = vmatprep.subr.msk.bf16.mxu1 %vm242_vm1, %v943_v8  ;;  %v945_v13 = vsel %vm939_vm4, %v932_v6, %v934_v12  ;;  %v946_v26 = vsel %vm939_vm4, %v934_v12, %v936_v11 }
  0xbc   : > { %v970_v30 = vsel %vm242_vm1, %v946_v26, 0 }
  0xbd   : > { %2674 = vmatmul.mubr.msk.bf16.vlgmr.msra.gmra.mrb[4].mxu0 %vm238_vm2, %v2942_v62 }
  0xbe   : > { %976 = vmatpush1.bf16.msra.mxu0 %v952_v14  ;;  %v1172_v16 = vpop.permute.xlu1 %1171  ;;  %v938_v17 = vpop.permute.xlu0 %937  ;;  %1007 = vmatprep.mubr.bf16.mxu0 %v2973_v0 }
  0xbf   : > { %2684 = vmatprep.subr.msk.bf16.mxu0 %vm242_vm1, %v945_v13  ;;  %v947_v18 = vsel %vm939_vm4, %v936_v11, %v938_v17 }
  0xc1   : > { %2676 = vmatmul.mubr.msk.bf16.vlgmr.msra.gmra.mrb[4].mxu1 %vm238_vm2, %v2942_v62 }
  0xc2   : > { %1019 = vmatpush1.bf16.msra.mxu1 %v958_v19  ;;  %v1176_v22 = vpop.permute.xlu1 %1175  ;;  %v1174_v23 = vpop.permute.xlu0 %1173  ;;  %1050 = vmatprep.mubr.bf16.mxu1 %v2973_v0  ;;  %v2946_v19 = vld [vmem:[%s3427_s1 + $0x30] sm:$0xff]  }
  0xc3   : > { %2686 = vmatprep.subr.msk.bf16.mxu1 %vm242_vm1, %v947_v18  ;;  %v1191_v24 = vsel %vm1189_vm5, %v1174_v23, %v1176_v22  ;;  %v1190_v31 = vsel %vm1189_vm5, %v1172_v16, %v1174_v23 }
  0xc4   : > { %v1202_v35 = vsel %vm242_vm1, %v1190_v31, 0 }
  0xc5   : > { %2681 = vmatmul.mubr.msk.bf16.vlgmr.msra.gmra.mrb[0].mxu0 %vm238_vm2, %v2943_v20 }
  0xc6   : > { %1062 = vmatpush1.bf16.msra.mxu0 %v964_v25  ;;  %v1180_v27 = vpop.permute.xlu1 %1179  ;;  %v1178_v28 = vpop.permute.xlu0 %1177  ;;  %1093 = vmatprep.mubr.bf16.mxu0 %v2973_v0 }
  0xc7   : > { %2691 = vmatprep.subr.msk.bf16.mxu0 %vm242_vm1, %v1191_v24  ;;  %v1193_v29 = vsel %vm1189_vm5, %v1178_v28, %v1180_v27  ;;  %v1192_v36 = vsel %vm1189_vm5, %v1176_v22, %v1178_v28 }
  0xc8   : > { %v1208_v40 = vsel %vm242_vm1, %v1192_v36, 0 }
  0xc9   : > { %2683 = vmatmul.mubr.msk.bf16.vlgmr.msra.gmra.mrb[0].mxu1 %vm238_vm2, %v2943_v20 }
  0xca   : > { %1105 = vmatpush1.bf16.msra.mxu1 %v970_v30  ;;  %v1184_v32 = vpop.permute.xlu1 %1183  ;;  %v1182_v33 = vpop.permute.xlu0 %1181  ;;  %1136 = vmatprep.mubr.bf16.mxu1 %v2973_v0 }
  0xcb   : > { %2693 = vmatprep.subr.msk.bf16.mxu1 %vm242_vm1, %v1193_v29  ;;  %v1195_v34 = vsel %vm1189_vm5, %v1182_v33, %v1184_v32  ;;  %v1194_v42 = vsel %vm1189_vm5, %v1180_v27, %v1182_v33 }
  0xcc   : > { %v1214_v45 = vsel %vm242_vm1, %v1194_v42, 0 }
  0xcd   : > { %2685 = vmatmul.mubr.msk.bf16.vlgmr.msra.gmra.mrb[4].mxu0 %vm238_vm2, %v2943_v20 }
  0xce   : > { %1226 = vmatpush1.bf16.msra.mxu0 %v1202_v35  ;;  %v1188_v37 = vpop.permute.xlu1 %1187  ;;  %v1186_v38 = vpop.permute.xlu0 %1185  ;;  %1257 = vmatprep.mubr.bf16.mxu0 %v2973_v0 }
  0xcf   : > { %2695 = vmatprep.subr.msk.bf16.mxu0 %vm242_vm1, %v1195_v34  ;;  %v1197_v39 = vsel %vm1189_vm5, %v1186_v38, %v1188_v37  ;;  %v1196_v46 = vsel %vm1189_vm5, %v1184_v32, %v1186_v38 }
  0xd0   : > { %v1220_v50 = vsel %vm242_vm1, %v1196_v46, 0 }
  0xd1   : > { %2687 = vmatmul.mubr.msk.bf16.vlgmr.msra.gmra.mrb[4].mxu1 %vm238_vm2, %v2943_v20 }
  0xd2   : > { %1269 = vmatpush1.bf16.msra.mxu1 %v1208_v40  ;;  %v1424_v43 = vpop.permute.xlu1 %1423  ;;  %v1422_v44 = vpop.permute.xlu0 %1421  ;;  %1300 = vmatprep.mubr.bf16.mxu1 %v2973_v0  ;;  %v2947_v40 = vld [vmem:[%s3427_s1 + $0x38] sm:$0xff]  }
  0xd3   : > { %2697 = vmatprep.subr.msk.bf16.mxu1 %vm242_vm1, %v1197_v39  ;;  %v1440_v51 = vsel %vm1439_vm6, %v1422_v44, %v1424_v43 }
  0xd4   : > { %v1452_v55 = vsel %vm242_vm1, %v1440_v51, 0 }
  0xd5   : > { %2692 = vmatmul.mubr.msk.bf16.vlgmr.msra.gmra.mrb[0].mxu0 %vm238_vm2, %v2944_v41 }
  0xd6   : > { %1312 = vmatpush1.bf16.msra.mxu0 %v1214_v45  ;;  %v1428_v47 = vpop.permute.xlu1 %1427  ;;  %v1426_v48 = vpop.permute.xlu0 %1425  ;;  %1343 = vmatprep.mubr.bf16.mxu0 %v2973_v0 }
  0xd7   : > { %v1441_v49 = vsel %vm1439_vm6, %v1424_v43, %v1426_v48  ;;  %v1442_v56 = vsel %vm1439_vm6, %v1426_v48, %v1428_v47 }
  0xd8   : > { %2702 = vmatprep.subr.msk.bf16.mxu0 %vm242_vm1, %v1441_v49  ;;  %v1458_v60 = vsel %vm242_vm1, %v1442_v56, 0 }
  0xd9   : > { %2694 = vmatmul.mubr.msk.bf16.vlgmr.msra.gmra.mrb[0].mxu1 %vm238_vm2, %v2944_v41 }
  0xda   : > { %1355 = vmatpush1.bf16.msra.mxu1 %v1220_v50  ;;  %v1432_v52 = vpop.permute.xlu1 %1431  ;;  %v1430_v53 = vpop.permute.xlu0 %1429  ;;  %1386 = vmatprep.mubr.bf16.mxu1 %v2973_v0 }
  0xdb   : > { %v1443_v54 = vsel %vm1439_vm6, %v1428_v47, %v1430_v53  ;;  %v1444_v62 = vsel %vm1439_vm6, %v1430_v53, %v1432_v52 }
  0xdc   : > { %2704 = vmatprep.subr.msk.bf16.mxu1 %vm242_vm1, %v1443_v54  ;;  %v1464_v3 = vsel %vm242_vm1, %v1444_v62, 0 }
  0xdd   : > { %2696 = vmatmul.mubr.msk.bf16.vlgmr.msra.gmra.mrb[4].mxu0 %vm238_vm2, %v2944_v41 }
  0xde   : > { %1476 = vmatpush1.bf16.msra.mxu0 %v1452_v55  ;;  %v1436_v57 = vpop.permute.xlu1 %1435  ;;  %v1434_v58 = vpop.permute.xlu0 %1433  ;;  %1507 = vmatprep.mubr.bf16.mxu0 %v2973_v0 }
  0xdf   : > { %v1445_v59 = vsel %vm1439_vm6, %v1432_v52, %v1434_v58  ;;  %v1446_v4 = vsel %vm1439_vm6, %v1434_v58, %v1436_v57 }
  0xe0   : > { %2706 = vmatprep.subr.msk.bf16.mxu0 %vm242_vm1, %v1445_v59  ;;  %v1470_v8 = vsel %vm242_vm1, %v1446_v4, 0 }
  0xe1   : > { %2698 = vmatmul.mubr.msk.bf16.vlgmr.msra.gmra.mrb[4].mxu1 %vm238_vm2, %v2944_v41 }
  0xe2   : > { %1519 = vmatpush1.bf16.msra.mxu1 %v1458_v60  ;;  %v1672_v63 = vpop.permute.xlu1 %1671  ;;  %v1438_v1 = vpop.permute.xlu0 %1437  ;;  %1550 = vmatprep.mubr.bf16.mxu1 %v2973_v0  ;;  %v2948_v60 = vld [vmem:[%s3427_s1 + $0x40] sm:$0xff]  }
  0xe3   : > { %v1447_v2 = vsel %vm1439_vm6, %v1436_v57, %v1438_v1 }
  0xe4   : > { %2708 = vmatprep.subr.msk.bf16.mxu1 %vm242_vm1, %v1447_v2 }
  0xe5   : > { %2703 = vmatmul.mubr.msk.bf16.vlgmr.msra.gmra.mrb[0].mxu0 %vm238_vm2, %v2945_v61 }
  0xe6   : > { %1562 = vmatpush1.bf16.msra.mxu0 %v1464_v3  ;;  %v1676_v5 = vpop.permute.xlu1 %1675  ;;  %v1674_v6 = vpop.permute.xlu0 %1673  ;;  %1593 = vmatprep.mubr.bf16.mxu0 %v2973_v0 }
  0xe7   : > { %v1691_v7 = vsel %vm1689_vm7, %v1674_v6, %v1676_v5  ;;  %v1690_v9 = vsel %vm1689_vm7, %v1672_v63, %v1674_v6 }
  0xe8   : > { %2713 = vmatprep.subr.msk.bf16.mxu0 %vm242_vm1, %v1691_v7  ;;  %v1702_v13 = vsel %vm242_vm1, %v1690_v9, 0 }
  0xe9   : > { %2705 = vmatmul.mubr.msk.bf16.vlgmr.msra.gmra.mrb[0].mxu1 %vm238_vm2, %v2945_v61 }
  0xea   : > { %1605 = vmatpush1.bf16.msra.mxu1 %v1470_v8  ;;  %v1680_v10 = vpop.permute.xlu1 %1679  ;;  %v1678_v11 = vpop.permute.xlu0 %1677  ;;  %1636 = vmatprep.mubr.bf16.mxu1 %v2973_v0 }
  0xeb   : > { %v1693_v12 = vsel %vm1689_vm7, %v1678_v11, %v1680_v10  ;;  %v1692_v14 = vsel %vm1689_vm7, %v1676_v5, %v1678_v11 }
  0xec   : > { %2715 = vmatprep.subr.msk.bf16.mxu1 %vm242_vm1, %v1693_v12  ;;  %v1708_v18 = vsel %vm242_vm1, %v1692_v14, 0 }
  0xed   : > { %2707 = vmatmul.mubr.msk.bf16.vlgmr.msra.gmra.mrb[4].mxu0 %vm238_vm2, %v2945_v61 }
  0xee   : > { %1726 = vmatpush1.bf16.msra.mxu0 %v1702_v13  ;;  %v1684_v15 = vpop.permute.xlu1 %1683  ;;  %v1682_v16 = vpop.permute.xlu0 %1681  ;;  %1757 = vmatprep.mubr.bf16.mxu0 %v2973_v0 }
  0xef   : > { %v1695_v17 = vsel %vm1689_vm7, %v1682_v16, %v1684_v15  ;;  %v1694_v20 = vsel %vm1689_vm7, %v1680_v10, %v1682_v16 }
  0xf0   : > { %2717 = vmatprep.subr.msk.bf16.mxu0 %vm242_vm1, %v1695_v17  ;;  %v1714_v24 = vsel %vm242_vm1, %v1694_v20, 0 }
  0xf1   : > { %2709 = vmatmul.mubr.msk.bf16.vlgmr.msra.gmra.mrb[4].mxu1 %vm238_vm2, %v2945_v61 }
  0xf2   : > { %1769 = vmatpush1.bf16.msra.mxu1 %v1708_v18  ;;  %v1688_v21 = vpop.permute.xlu1 %1687  ;;  %v1686_v22 = vpop.permute.xlu0 %1685  ;;  %1800 = vmatprep.mubr.bf16.mxu1 %v2973_v0 }
  0xf3   : > { %v1697_v23 = vsel %vm1689_vm7, %v1686_v22, %v1688_v21  ;;  %v1696_v25 = vsel %vm1689_vm7, %v1684_v15, %v1686_v22 }
  0xf4   : > { %2719 = vmatprep.subr.msk.bf16.mxu1 %vm242_vm1, %v1697_v23  ;;  %v1720_v29 = vsel %vm242_vm1, %v1696_v25, 0 }
  0xf5   : > { %2714 = vmatmul.mubr.msk.bf16.vlgmr.msra.gmra.mrb[0].mxu0 %vm238_vm2, %v2946_v19 }
  0xf6   : > { %1812 = vmatpush1.bf16.msra.mxu0 %v1714_v24  ;;  %v1924_v26 = vpop.permute.xlu1 %1923  ;;  %v1922_v27 = vpop.permute.xlu0 %1921  ;;  %1843 = vmatprep.mubr.bf16.mxu0 %v2973_v0 }
  0xf7   : > { %v1940_v28 = vsel %vm1939_vm8, %v1922_v27, %v1924_v26 }
  0xf8   : > { %v1952_v32 = vsel %vm242_vm1, %v1940_v28, 0 }
  0xf9   : > { %2716 = vmatmul.mubr.msk.bf16.vlgmr.msra.gmra.mrb[0].mxu1 %vm238_vm2, %v2946_v19 }
  0xfa   : > { %1855 = vmatpush1.bf16.msra.mxu1 %v1720_v29  ;;  %v1928_v30 = vpop.permute.xlu1 %1927  ;;  %v1926_v31 = vpop.permute.xlu0 %1925  ;;  %1886 = vmatprep.mubr.bf16.mxu1 %v2973_v0 }
  0xfb   : > { %v1941_v33 = vsel %vm1939_vm8, %v1924_v26, %v1926_v31  ;;  %v1942_v34 = vsel %vm1939_vm8, %v1926_v31, %v1928_v30 }
  0xfc   : > { %2724 = vmatprep.subr.msk.bf16.mxu0 %vm242_vm1, %v1941_v33  ;;  %v1958_v37 = vsel %vm242_vm1, %v1942_v34, 0 }
  0xfd   : > { %2718 = vmatmul.mubr.msk.bf16.vlgmr.msra.gmra.mrb[4].mxu0 %vm238_vm2, %v2946_v19 }
  0xfe   : > { %1976 = vmatpush1.bf16.msra.mxu0 %v1952_v32  ;;  %v1932_v35 = vpop.permute.xlu1 %1931  ;;  %v1930_v36 = vpop.permute.xlu0 %1929  ;;  %2007 = vmatprep.mubr.bf16.mxu0 %v2973_v0 }
  0xff   : > { %v1943_v38 = vsel %vm1939_vm8, %v1928_v30, %v1930_v36  ;;  %v1944_v39 = vsel %vm1939_vm8, %v1930_v36, %v1932_v35 }
 0x100   : > { %2726 = vmatprep.subr.msk.bf16.mxu1 %vm242_vm1, %v1943_v38  ;;  %v1964_v43 = vsel %vm242_vm1, %v1944_v39, 0 }
 0x101   : > { %2720 = vmatmul.mubr.msk.bf16.vlgmr.msra.gmra.mrb[4].mxu1 %vm238_vm2, %v2946_v19 }
 0x102   : > { %2019 = vmatpush1.bf16.msra.mxu1 %v1958_v37  ;;  %v1936_v41 = vpop.permute.xlu1 %1935  ;;  %v1934_v42 = vpop.permute.xlu0 %1933  ;;  %2050 = vmatprep.mubr.bf16.mxu1 %v2973_v0 }
 0x103   : > { %v1945_v44 = vsel %vm1939_vm8, %v1932_v35, %v1934_v42  ;;  %v1946_v45 = vsel %vm1939_vm8, %v1934_v42, %v1936_v41 }
 0x104   : > { %2728 = vmatprep.subr.msk.bf16.mxu0 %vm242_vm1, %v1945_v44  ;;  %v1970_v48 = vsel %vm242_vm1, %v1946_v45, 0 }
 0x105   : > { %2725 = vmatmul.mubr.msk.bf16.vlgmr.msra.gmra.mrb[0].mxu0 %vm238_vm2, %v2947_v40 }
 0x106   : > { %2062 = vmatpush1.bf16.msra.mxu0 %v1964_v43  ;;  %v2172_v46 = vpop.permute.xlu1 %2171  ;;  %v1938_v47 = vpop.permute.xlu0 %1937  ;;  %2093 = vmatprep.mubr.bf16.mxu0 %v2973_v0 }
 0x107   : > { %v1947_v49 = vsel %vm1939_vm8, %v1936_v41, %v1938_v47 }
 0x108   : > { %2730 = vmatprep.subr.msk.bf16.mxu1 %vm242_vm1, %v1947_v49 }
 0x109   : > { %2727 = vmatmul.mubr.msk.bf16.vlgmr.msra.gmra.mrb[0].mxu1 %vm238_vm2, %v2947_v40 }
 0x10a   : > { %2105 = vmatpush1.bf16.msra.mxu1 %v1970_v48  ;;  %v2176_v50 = vpop.permute.xlu1 %2175  ;;  %v2174_v51 = vpop.permute.xlu0 %2173  ;;  %2136 = vmatprep.mubr.bf16.mxu1 %v2973_v0 }
 0x10b   : > { %v2190_v52 = vsel %vm2189_vm9, %v2172_v46, %v2174_v51  ;;  %v2191_v53 = vsel %vm2189_vm9, %v2174_v51, %v2176_v50 }
 0x10c   : > { %v2202_v54 = vsel %vm242_vm1, %v2190_v52, 0  ;;  %2735 = vmatprep.subr.msk.bf16.mxu0 %vm242_vm1, %v2191_v53 }
 0x10d   : > { %2729 = vmatmul.mubr.msk.bf16.vlgmr.msra.gmra.mrb[4].mxu0 %vm238_vm2, %v2947_v40 }
 0x10e   : > { %2226 = vmatpush1.bf16.msra.mxu0 %v2202_v54  ;;  %v2180_v55 = vpop.permute.xlu1 %2179  ;;  %v2178_v56 = vpop.permute.xlu0 %2177  ;;  %2257 = vmatprep.mubr.bf16.mxu0 %v2973_v0 }
 0x10f   : > { %v2192_v57 = vsel %vm2189_vm9, %v2176_v50, %v2178_v56  ;;  %v2193_v58 = vsel %vm2189_vm9, %v2178_v56, %v2180_v55 }
 0x110   : > { %v2208_v59 = vsel %vm242_vm1, %v2192_v57, 0  ;;  %2737 = vmatprep.subr.msk.bf16.mxu1 %vm242_vm1, %v2193_v58 }
 0x111   : > { %2731 = vmatmul.mubr.msk.bf16.vlgmr.msra.gmra.mrb[4].mxu1 %vm238_vm2, %v2947_v40 }
 0x112   : > { %2269 = vmatpush1.bf16.msra.mxu1 %v2208_v59  ;;  %v2184_v61 = vpop.permute.xlu1 %2183  ;;  %v2182_v62 = vpop.permute.xlu0 %2181  ;;  %2300 = vmatprep.mubr.bf16.mxu1 %v2973_v0 }
 0x113   : > { %v2194_v63 = vsel %vm2189_vm9, %v2180_v55, %v2182_v62  ;;  %v2195_v1 = vsel %vm2189_vm9, %v2182_v62, %v2184_v61 }
 0x114   : > { %v2214_v2 = vsel %vm242_vm1, %v2194_v63, 0  ;;  %2739 = vmatprep.subr.msk.bf16.mxu0 %vm242_vm1, %v2195_v1 }
 0x115   : > { %2736 = vmatmul.mubr.msk.bf16.vlgmr.msra.gmra.mrb[0].mxu0 %vm238_vm2, %v2948_v60 }
 0x116   : > { %2312 = vmatpush1.bf16.msra.mxu0 %v2214_v2  ;;  %v2188_v3 = vpop.permute.xlu1 %2187  ;;  %v2186_v4 = vpop.permute.xlu0 %2185  ;;  %2343 = vmatprep.mubr.bf16.mxu0 %v2973_v0 }
 0x117   : > { %v2196_v5 = vsel %vm2189_vm9, %v2184_v61, %v2186_v4  ;;  %v2197_v6 = vsel %vm2189_vm9, %v2186_v4, %v2188_v3 }
 0x118   : > { %v2220_v7 = vsel %vm242_vm1, %v2196_v5, 0  ;;  %2741 = vmatprep.subr.msk.bf16.mxu1 %vm242_vm1, %v2197_v6 }
 0x119   : > { %2738 = vmatmul.mubr.msk.bf16.vlgmr.msra.gmra.mrb[0].mxu1 %vm238_vm2, %v2948_v60 }
 0x11a   : > { %2355 = vmatpush1.bf16.msra.mxu1 %v2220_v7  ;;  %2386 = vmatprep.mubr.bf16.mxu1 %v2973_v0 }
 0x11d   : > { %2740 = vmatmul.mubr.msk.bf16.vlgmr.msra.gmra.mrb[4].mxu0 %vm238_vm2, %v2948_v60 }
 0x121   : > { %2742 = vmatmul.mubr.msk.bf16.vlgmr.msra.gmra.mrb[4].mxu1 %vm238_vm2, %v2948_v60 }
 0x127   : > { %v2418_v8 = vpop.permute.xlu0 %2417  ;;  %v2423_v10 = vpop.permute.xlu1 %2422 }
 0x1e8   : > { %v2259_v9 = vpop.f32.mrb[0].mxu0 }
 0x1e9   : > { %v2425_v11 = vadd.f32 %v2418_v8, %v2259_v9  ;;  %v2261_v12 = vpop.f32.mrb[1].mxu0 }
 0x1ea   : > { %v2426_v13 = vadd.f32 %v2418_v8, %v2261_v12  ;;  %v2263_v14 = vpop.f32.mrb[2].mxu0 }
 0x1eb   : > { %v2441_v15 = vmax.f32 %v2425_v11, 0.0  ;;  %v2433_v16 = vadd.f32 %v2423_v10, %v2263_v14  ;;  %v2265_v17 = vpop.f32.mrb[3].mxu0  ;;  %v2754_v11 = vld [vmem:[%s3386_s10 + $0x44] sm:$0xf] (%p3027_p4) }
 0x1ec   : > { %v2442_v18 = vmax.f32 %v2426_v13, 0.0  ;;  %v2434_v19 = vadd.f32 %v2423_v10, %v2265_v17  ;;  %v2302_v20 = vpop.f32.mrb[0].mxu1  ;;  %2755 = vst [vmem:[%s2524_s14 + $0x68] sm:$0xf] (%p3027_p4), %v2754_v11 }
 0x1ed   : > { %v2449_v21 = vmax.f32 %v2433_v16, 0.0  ;;  %v2427_v22 = vadd.f32 %v2418_v8, %v2302_v20  ;;  %v2304_v23 = vpop.f32.mrb[1].mxu1 }
 0x1ee   : > { %v2758_v24 = vpack.c.bf16 %v2442_v18, %v2441_v15  ;;  %v2450_v0 = vmax.f32 %v2434_v19, 0.0  ;;  %v2428_v25 = vadd.f32 %v2418_v8, %v2304_v23  ;;  %v2306_v26 = vpop.f32.mrb[2].mxu1 }
 0x1ef   : > { %v2443_v27 = vmax.f32 %v2427_v22, 0.0  ;;  %v2435_v28 = vadd.f32 %v2423_v10, %v2306_v26  ;;  %v2308_v29 = vpop.f32.mrb[3].mxu1 }
 0x1f0   : > { %2505 = vst [vmem:[%s3386_s10] sm:$0xff] %v2758_v24  ;;  %v2762_v30 = vpack.c.bf16 %v2450_v0, %v2449_v21  ;;  %v2444_v31 = vmax.f32 %v2428_v25, 0.0  ;;  %v2436_v32 = vadd.f32 %v2423_v10, %v2308_v29  ;;  %v2345_v33 = vpop.f32.mrb[4].mxu0 }
 0x1f1   : > { %v2451_v34 = vmax.f32 %v2435_v28, 0.0  ;;  %v2429_v35 = vadd.f32 %v2418_v8, %v2345_v33  ;;  %v2347_v36 = vpop.f32.mrb[5].mxu0 }
 0x1f2   : > { %2509 = vst [vmem:[%s3386_s10 + $0x24] sm:$0xff] %v2762_v30  ;;  %v2759_v37 = vpack.c.bf16 %v2444_v31, %v2443_v27  ;;  %v2452_v38 = vmax.f32 %v2436_v32, 0.0  ;;  %v2430_v39 = vadd.f32 %v2418_v8, %v2347_v36  ;;  %v2349_v40 = vpop.f32.mrb[6].mxu0 }
 0x1f3   : > { %v2445_v41 = vmax.f32 %v2429_v35, 0.0  ;;  %v2437_v42 = vadd.f32 %v2423_v10, %v2349_v40  ;;  %v2351_v43 = vpop.f32.mrb[7].mxu0 }
 0x1f4   : > { %2506 = vst [vmem:[%s3386_s10 + $0x8] sm:$0xff] %v2759_v37  ;;  %v2763_v44 = vpack.c.bf16 %v2452_v38, %v2451_v34  ;;  %v2446_v45 = vmax.f32 %v2430_v39, 0.0  ;;  %v2438_v46 = vadd.f32 %v2423_v10, %v2351_v43  ;;  %v2388_v47 = vpop.f32.mrb[4].mxu1 }
 0x1f5   : > { %v2453_v48 = vmax.f32 %v2437_v42, 0.0  ;;  %v2431_v49 = vadd.f32 %v2418_v8, %v2388_v47  ;;  %v2390_v50 = vpop.f32.mrb[5].mxu1 }
 0x1f6   : > { %2510 = vst [vmem:[%s3386_s10 + $0x2c] sm:$0xff] %v2763_v44  ;;  %v2760_v51 = vpack.c.bf16 %v2446_v45, %v2445_v41  ;;  %v2454_v52 = vmax.f32 %v2438_v46, 0.0  ;;  %v2432_v53 = vadd.f32 %v2418_v8, %v2390_v50  ;;  %v2392_v54 = vpop.f32.mrb[6].mxu1 }
 0x1f7   : > { %v2447_v55 = vmax.f32 %v2431_v49, 0.0  ;;  %v2439_v56 = vadd.f32 %v2423_v10, %v2392_v54  ;;  %v2394_v57 = vpop.f32.mrb[7].mxu1  ;;  %v2539_v2 = vld [vmem:[%s3386_s10] sm:$0xff] (%p3027_p4) }
 0x1f8   : > { %2507 = vst [vmem:[%s3386_s10 + $0x10] sm:$0xff] %v2760_v51  ;;  %v2764_v58 = vpack.c.bf16 %v2454_v52, %v2453_v48  ;;  %v2448_v59 = vmax.f32 %v2432_v53, 0.0  ;;  %v2440_v60 = vadd.f32 %v2423_v10, %v2394_v57  ;;  %2521 = sbr.rel (!%p3027_p4) target bundleno = 519 (0x207), region = 36  ;;  %v2752_v10 = vld [vmem:[%s3386_s10 + $0x20] sm:$0xf] (%p3027_p4)  ;;  %2540 = vst [vmem:[%s2524_s14] sm:$0xff] (%p3027_p4), %v2539_v2 }
 0x1f9   : > { %v2455_v61 = vmax.f32 %v2439_v56, 0.0  ;;  %v2547_v6 = vld [vmem:[%s3386_s10 + $0x24] sm:$0xff] (%p3027_p4)  ;;  %2753 = vst [vmem:[%s2524_s14 + $0x20] sm:$0xf] (%p3027_p4), %v2752_v10 }
 0x1fa   : > { %2511 = vst [vmem:[%s3386_s10 + $0x34] sm:$0xff] %v2764_v58  ;;  %v2761_v62 = vpack.c.bf16 %v2448_v59, %v2447_v55  ;;  %v2456_v63 = vmax.f32 %v2440_v60, 0.0  ;;  %2548 = vst [vmem:[%s2524_s14 + $0x48] sm:$0xff] (%p3027_p4), %v2547_v6 }
 0x1fb   : > { %v2541_v3 = vld [vmem:[%s3386_s10 + $0x8] sm:$0xff] (%p3027_p4) }
 0x1fc   : > { %2508 = vst [vmem:[%s3386_s10 + $0x18] sm:$0xff] %v2761_v62  ;;  %v2765_v1 = vpack.c.bf16 %v2456_v63, %v2455_v61  ;;  %2542 = vst [vmem:[%s2524_s14 + $0x8] sm:$0xff] (%p3027_p4), %v2541_v3 }
 0x1fd   : > { %v2549_v7 = vld [vmem:[%s3386_s10 + $0x2c] sm:$0xff] (%p3027_p4) }
 0x1fe   : > { %2512 = vst [vmem:[%s3386_s10 + $0x3c] sm:$0xff] %v2765_v1  ;;  %2550 = vst [vmem:[%s2524_s14 + $0x50] sm:$0xff] (%p3027_p4), %v2549_v7 }
 0x1ff   : > { %v2543_v4 = vld [vmem:[%s3386_s10 + $0x10] sm:$0xff] }
 0x200   : > { %2544 = vst [vmem:[%s2524_s14 + $0x10] sm:$0xff] %v2543_v4 }
 0x201   : > { %v2551_v8 = vld [vmem:[%s3386_s10 + $0x34] sm:$0xff] }
 0x202   : > { %2552 = vst [vmem:[%s2524_s14 + $0x58] sm:$0xff] %v2551_v8 }
 0x203   : > { %v2545_v5 = vld [vmem:[%s3386_s10 + $0x18] sm:$0xff] }
 0x204   : > { %2546 = vst [vmem:[%s2524_s14 + $0x18] sm:$0xff] %v2545_v5 }
 0x205   : > { %v2553_v9 = vld [vmem:[%s3386_s10 + $0x3c] sm:$0xff] }
 0x206   : > { %2554 = vst [vmem:[%s2524_s14 + $0x60] sm:$0xff] %v2553_v9 }
 0x207 PF: > { %p10_p8 = scmp.ge.s32.totalorder %s3017_s16, 4   ;;  %s3431_s12 = smov %s2967_s13 }
 0x208   : > { %s3432_s13 = smov %s3025_s19  ;;  %s3433_s14 = smov %s3017_s16 }
 0x209   :  { %12 = sbr.rel (!%p10_p8) target bundleno = 2 (0x2), region = 102 }

// kernel: net1_forward.4
= control target key start
LH: loop header
LB: loop body
LE: loop exit
PB: predicated region body
PF: predicated region fallthrough
CT: control target
= control target key end

     0   :  { %s3793_s12 = smov 0   ;;  %s3795_s13 = smov 0   ;;  %s4356_s0 = inlined_call_operand.vmem [shape: bf16[16,2304], index: 0, kind: input, shape index: {}]   ;;  %s4357_s1 = inlined_call_operand.vmem [shape: bf16[9,32,16], index: 1, kind: input, shape index: {}]   ;;  %s4358_s2 = inlined_call_operand.vmem [shape: f32[32,1], index: 2, kind: input, shape index: {}]   ;;  %s4359_s3 = inlined_call_operand.vmem [shape: bf16[32,2304], index: 3, kind: output, shape index: {}]  }
   0x1   :  { %s3797_s14 = smov 0  }
   0x2 LB: > { %s3221_s15 = sadd.s32 4294967295, %s3762_s14   ;;  %s3810_s16 = sadd.s32 1, %s3762_s14   ;;  %s3762_s14 = sphi %s3797_s14, %s4363_s14   ;;  %s3758_s13 = sphi %s3795_s13, %s4362_s13   ;;  %s3754_s12 = sphi %s3793_s12, %s4361_s12  }
   0x3   : > { %s17_s17 = ssub.s32 %s3762_s14, %s3810_s16  ;;  %s20_s18 = sadd.s32 1, %s3758_s13 }
   0x4   : > { %p18_p0 = scmp.eq.s32.totalorder %s17_s17, 0  ;;  %p27_p1 = scmp.ne.s32.totalorder %s3758_s13, %s3754_s12 }
   0x5   : > { %p28_p2 = scmp.eq.s32.totalorder %s3762_s14, 0  ;;  %p99_p3 = scmp.eq.s32.totalorder %s3221_s15, 1 }
   0x6   : > { %s3821_s19 = scalar_select %p18_p0, %s3758_s13, %s20_s18  }
   0x7   : > { %p29_p4 = por %p28_p2, %p27_p1  ;;  %p3823_p5 = por %p99_p3, %p27_p1 }
   0x8   : > { %p3224_p6 = scmp.ge.s32.totalorder %s3762_s14, 2 }
   0xa   : > { %127 = sbr.rel (%p3224_p6) target bundleno = 27 (0x1b), region = 24 }
  0x11   : > { %130 = sbr.rel (!%p29_p4) target bundleno = 27 (0x1b), region = 28  ;;  %s132_s21 = sand.u32 (%p29_p4), 1, %s3758_s13  }
  0x12   : > { %s3397_s22 = smul.u32 (%p29_p4), 36, %s3762_s14 }
  0x13   : > { %s3671_s23 = smul.u32 (%p29_p4), 72, %s132_s21 }
  0x14   : > { %s137_s26 = scalar_lea.vmem (%p29_p4), %s4356_s0, %s3397_s22 }
  0x15   : > { %v152_v0 = vld [vmem:[%s137_s26] sm:$0xff] (%p29_p4)  ;;  %v154_v1 = vld [vmem:[%s137_s26 + $0x8] sm:$0xff] (%p29_p4)  ;;  %v156_v2 = vld [vmem:[%s137_s26 + $0x10] sm:$0xff] (%p29_p4)  ;;  %s134_s27 = scalar_lea.vmem (%p29_p4), [#allocation2], %s3671_s23 }
  0x16   : > { %153 = vst [vmem:[%s134_s27] sm:$0xff] (%p29_p4), %v152_v0  ;;  %155 = vst [vmem:[%s134_s27 + $0x8] sm:$0xff] (%p29_p4), %v154_v1  ;;  %v158_v3 = vld [vmem:[%s137_s26 + $0x18] sm:$0xff] (%p29_p4)  ;;  %v160_v4 = vld [vmem:[%s137_s26 + $0x48] sm:$0xff] (%p29_p4) }
  0x17   : > { %157 = vst [vmem:[%s134_s27 + $0x10] sm:$0xff] (%p29_p4), %v156_v2  ;;  %v162_v5 = vld [vmem:[%s137_s26 + $0x50] sm:$0xff] (%p29_p4)  ;;  %159 = vst [vmem:[%s134_s27 + $0x18] sm:$0xff] (%p29_p4), %v158_v3  ;;  %v164_v6 = vld [vmem:[%s137_s26 + $0x58] sm:$0xff] (%p29_p4) }
  0x18   : > { %161 = vst [vmem:[%s134_s27 + $0x24] sm:$0xff] %v160_v4  ;;  %163 = vst [vmem:[%s134_s27 + $0x2c] sm:$0xff] %v162_v5  ;;  %v166_v7 = vld [vmem:[%s137_s26 + $0x60] sm:$0xff]  ;;  %v3228_v9 = vld [vmem:[%s137_s26 + $0x68] sm:$0xf] }
  0x19   : > { %v3226_v8 = vld [vmem:[%s137_s26 + $0x20] sm:$0xf]  ;;  %165 = vst [vmem:[%s134_s27 + $0x34] sm:$0xff] %v164_v6  ;;  %167 = vst [vmem:[%s134_s27 + $0x3c] sm:$0xff] %v166_v7 }
  0x1a   : > { %3227 = vst [vmem:[%s134_s27 + $0x20] sm:$0xf] %v3226_v8  ;;  %3229 = vst [vmem:[%s134_s27 + $0x44] sm:$0xf] %v3228_v9 }
  0x1b PF: > { %p3230_p7 = scmp.ge.s32.totalorder %s3762_s14, 1  ;;  %p183_p8 = scmp.lt.s32.totalorder %s3762_s14, 3 }
  0x1d   : > { %p184_p9 = pnand %p3230_p7, %p183_p8 }
  0x1e   : > { %s190_s28 = sand.u32 (!%p184_p9), 1, %s3754_s12   ;;  %v3764_v10 = vmov (!%p184_p9), 0   ;;  %s3765_s4 = smov (!%p184_p9), 127   ;;  %vm307_vm0 = vcmask (!%p184_p9), 1039360   ;;  %v3722_v27 = vld [vmem:[%s4357_s1 + $0x10] sm:$0xff] (!%p184_p9)   ;;  %vm324_vm1 = vcmask (!%p184_p9), 130048  }
  0x1f   : > { %187 = sbr.rel (%p184_p9) target bundleno = 672 (0x2a0), region = 54  ;;  %416 = vmatprep.mubr.bf16.mxu1 (!%p184_p9), %v3764_v10  ;;  %363 = vmatprep.mubr.bf16.mxu0 (!%p184_p9), %v3764_v10  ;;  %s3766_s5 = smov (!%p184_p9), 126   ;;  %v3723_v34 = vld [vmem:[%s4357_s1 + $0x18] sm:$0xff] (!%p184_p9)   ;;  %v3724_v41 = vld [vmem:[%s4357_s1] sm:$0xff] (!%p184_p9)   ;;  %vm844_vm2 = vcmask (!%p184_p9), 1031168   ;;  %v3725_v46 = vld [vmem:[%s4357_s1 + $0x8] sm:$0xff] (!%p184_p9)  }
  0x20   : > { %s3672_s29 = smul.u32 (!%p184_p9), 72, %s190_s28  ;;  %3707 = vset.pattern.permute.xlu0 (!%p184_p9), %v3764_v10  ;;  %3708 = vset.pattern.permute.xlu1 (!%p184_p9), %v3764_v10  ;;  %s3767_s6 = smov (!%p184_p9), 96   ;;  %v3726_v58 = vld [vmem:[%s4357_s1 + $0x20] sm:$0xff] (!%p184_p9)   ;;  %vm1144_vm3 = vcmask (!%p184_p9), 785408   ;;  %v3727_v1 = vld [vmem:[%s4357_s1 + $0x28] sm:$0xff] (!%p184_p9)   ;;  %vm1444_vm4 = vcmask (!%p184_p9), 777216  }
  0x21   : > { %s3768_s7 = smov (!%p184_p9), 95   ;;  %s3769_s8 = smov (!%p184_p9), 94   ;;  %vm1744_vm5 = vcmask (!%p184_p9), 769024   ;;  %vm2044_vm6 = vcmask (!%p184_p9), 523264   ;;  %vm2344_vm7 = vcmask (!%p184_p9), 515072   ;;  %vm2644_vm8 = vcmask (!%p184_p9), 506880  }
  0x22   : > { %s192_s30 = scalar_lea.vmem (!%p184_p9), [#allocation2], %s3672_s29  ;;  %s3770_s9 = smov (!%p184_p9), 64  }
  0x23   : > { %v3842_v11 = vld [vmem:[%s192_s30 + $0xc] ss:$36 sps:$4 sm:$0xff] (!%p184_p9)   ;;  %v3844_v12 = vld [vmem:[%s192_s30 + $0x4] ss:$36 sps:$4 sm:$0xff] (!%p184_p9)   ;;  %v3853_v15 = vld [vmem:[%s192_s30 + $0x14] ss:$36 sps:$4 sm:$0xff] (!%p184_p9)  }
  0x24   : > { %295 = vrot.lane.b32.xlu1 (!%p184_p9), %v3842_v11, %s3765_s4  ;;  %v3847_v13 = vld [vmem:[%s192_s30 + $0x10] ss:$36 sps:$4 sm:$0xff] (!%p184_p9)   ;;  %291 = vrot.lane.b32.xlu0 (!%p184_p9), %v3844_v12, %s3765_s4  ;;  %v3850_v14 = vld [vmem:[%s192_s30 + $0x8] ss:$36 sps:$4 sm:$0xff] (!%p184_p9)   ;;  %s3771_s10 = smov (!%p184_p9), 63   ;;  %s3772_s18 = smov (!%p184_p9), 62  }
  0x25   : > { %v3855_v16 = vld [vmem:[%s192_s30] ss:$36 sps:$4 sm:$0xff] (!%p184_p9)   ;;  %v3860_v18 = vld [vmem:[%s192_s30 + $0x18] ss:$36 sps:$4 sm:$0xff] (!%p184_p9)   ;;  %s3673_s25 = smul.u32 (!%p184_p9), 144, %s190_s28 }
  0x26   : > { %v3858_v17 = vld [vmem:[%s192_s30 + $0x1c] ss:$36 sps:$4 sm:$0xff]   ;;  %s3414_s12 = smul.u32 (%p3823_p5), 36, %s3221_s15 }
  0x27   : > { %v3864_v19 = vld [vmem:[%s192_s30 + $0x20] ss:$36 sps:$4 sm:$0xff]   ;;  %s4231_s26 = scalar_lea.vmem [#allocation3], %s3673_s25 }
  0x28   : > { %297 = vrot.lane.b32.xlu1 %v3847_v13, %s3765_s4  ;;  %293 = vrot.lane.b32.xlu0 %v3850_v14, %s3765_s4  ;;  %3079 = vst [vmem:[%s4231_s26 + $0x20] sm:$0xf] %v3764_v10  ;;  %3080 = vst [vmem:[%s4231_s26 + $0x44] sm:$0xf] %v3764_v10  ;;  %s4310_s28 = scalar_lea.vmem (%p3823_p5), %s4359_s3, %s3414_s12 }
  0x29   : > { %3081 = vst [vmem:[%s4231_s26 + $0x68] sm:$0xf] %v3764_v10  ;;  %3082 = vst [vmem:[%s4231_s26 + $0x8c] sm:$0xf] %v3764_v10 }
  0x2c   : > { %299 = vrot.lane.b32.xlu1 %v3853_v15, %s3765_s4  ;;  %289 = vrot.lane.b32.xlu0 %v3855_v16, %s3765_s4 }
  0x30   : > { %303 = vrot.lane.b32.xlu1 %v3858_v17, %s3765_s4  ;;  %301 = vrot.lane.b32.xlu0 %v3860_v18, %s3765_s4 }
  0x34   : > { %828 = vrot.lane.b32.xlu1 %v3844_v12, %s3766_s5  ;;  %305 = vrot.lane.b32.xlu0 %v3864_v19, %s3765_s4 }
  0x38   : > { %832 = vrot.lane.b32.xlu1 %v3842_v11, %s3766_s5  ;;  %830 = vrot.lane.b32.xlu0 %v3850_v14, %s3766_s5 }
  0x3c   : > { %826 = vrot.lane.b32.xlu1 %v3855_v16, %s3766_s5  ;;  %834 = vrot.lane.b32.xlu0 %v3847_v13, %s3766_s5 }
  0x40   : > { %838 = vrot.lane.b32.xlu1 %v3860_v18, %s3766_s5  ;;  %836 = vrot.lane.b32.xlu0 %v3853_v15, %s3766_s5 }
  0x44   : > { %842 = vrot.lane.b32.xlu1 %v3864_v19, %s3766_s5  ;;  %840 = vrot.lane.b32.xlu0 %v3858_v17, %s3766_s5 }
  0x48   : > { %1130 = vrot.lane.b32.xlu1 %v3850_v14, %s3767_s6  ;;  %1128 = vrot.lane.b32.xlu0 %v3844_v12, %s3767_s6 }
  0x4c   : > { %1134 = vrot.lane.b32.xlu1 %v3847_v13, %s3767_s6  ;;  %1132 = vrot.lane.b32.xlu0 %v3842_v11, %s3767_s6 }
  0x50   : > { %1136 = vrot.lane.b32.xlu1 %v3853_v15, %s3767_s6  ;;  %1126 = vrot.lane.b32.xlu0 %v3855_v16, %s3767_s6 }
  0x54   : > { %1140 = vrot.lane.b32.xlu1 %v3858_v17, %s3767_s6  ;;  %1138 = vrot.lane.b32.xlu0 %v3860_v18, %s3767_s6 }
  0x58   : > { %1428 = vrot.lane.b32.xlu1 %v3844_v12, %s3768_s7  ;;  %1142 = vrot.lane.b32.xlu0 %v3864_v19, %s3767_s6 }
  0x5c   : > { %1432 = vrot.lane.b32.xlu1 %v3842_v11, %s3768_s7  ;;  %1430 = vrot.lane.b32.xlu0 %v3850_v14, %s3768_s7 }
  0x60   : > { %1426 = vrot.lane.b32.xlu1 %v3855_v16, %s3768_s7  ;;  %1434 = vrot.lane.b32.xlu0 %v3847_v13, %s3768_s7 }
  0x64   : > { %1438 = vrot.lane.b32.xlu1 %v3860_v18, %s3768_s7  ;;  %1436 = vrot.lane.b32.xlu0 %v3853_v15, %s3768_s7 }
  0x68   : > { %1442 = vrot.lane.b32.xlu1 %v3864_v19, %s3768_s7  ;;  %1440 = vrot.lane.b32.xlu0 %v3858_v17, %s3768_s7 }
  0x6c   : > { %1730 = vrot.lane.b32.xlu1 %v3850_v14, %s3769_s8  ;;  %1728 = vrot.lane.b32.xlu0 %v3844_v12, %s3769_s8 }
  0x70   : > { %1734 = vrot.lane.b32.xlu1 %v3847_v13, %s3769_s8  ;;  %1732 = vrot.lane.b32.xlu0 %v3842_v11, %s3769_s8 }
  0x74   : > { %1736 = vrot.lane.b32.xlu1 %v3853_v15, %s3769_s8  ;;  %1726 = vrot.lane.b32.xlu0 %v3855_v16, %s3769_s8 }
  0x78   : > { %1740 = vrot.lane.b32.xlu1 %v3858_v17, %s3769_s8  ;;  %1738 = vrot.lane.b32.xlu0 %v3860_v18, %s3769_s8 }
  0x7c   : > { %2028 = vrot.lane.b32.xlu1 %v3844_v12, %s3770_s9  ;;  %1742 = vrot.lane.b32.xlu0 %v3864_v19, %s3769_s8 }
  0x80   : > { %2032 = vrot.lane.b32.xlu1 %v3842_v11, %s3770_s9  ;;  %2030 = vrot.lane.b32.xlu0 %v3850_v14, %s3770_s9 }
  0x84   : > { %2026 = vrot.lane.b32.xlu1 %v3855_v16, %s3770_s9  ;;  %2034 = vrot.lane.b32.xlu0 %v3847_v13, %s3770_s9 }
  0x88   : > { %2038 = vrot.lane.b32.xlu1 %v3860_v18, %s3770_s9  ;;  %2036 = vrot.lane.b32.xlu0 %v3853_v15, %s3770_s9 }
  0x8c   : > { %2042 = vrot.lane.b32.xlu1 %v3864_v19, %s3770_s9  ;;  %2040 = vrot.lane.b32.xlu0 %v3858_v17, %s3770_s9 }
  0x90   : > { %2330 = vrot.lane.b32.xlu1 %v3850_v14, %s3771_s10  ;;  %2328 = vrot.lane.b32.xlu0 %v3844_v12, %s3771_s10 }
  0x94   : > { %2334 = vrot.lane.b32.xlu1 %v3847_v13, %s3771_s10  ;;  %2332 = vrot.lane.b32.xlu0 %v3842_v11, %s3771_s10 }
  0x96   : > { %v296_v20 = vpop.permute.xlu1 %295  ;;  %v292_v21 = vpop.permute.xlu0 %291 }
  0x98   : > { %2336 = vrot.lane.b32.xlu1 %v3853_v15, %s3771_s10  ;;  %2326 = vrot.lane.b32.xlu0 %v3855_v16, %s3771_s10 }
  0x9a   : > { %v298_v22 = vpop.permute.xlu1 %297  ;;  %v294_v23 = vpop.permute.xlu0 %293 }
  0x9b   : > { %v311_v24 = vsel %vm307_vm0, %v296_v20, %v298_v22  ;;  %v309_v25 = vsel %vm307_vm0, %v292_v21, %v294_v23  ;;  %v310_v26 = vsel %vm307_vm0, %v294_v23, %v296_v20 }
  0x9c   : > { %384 = vmatprep.subr.bf16.mxu1 %v311_v24  ;;  %2340 = vrot.lane.b32.xlu1 %v3858_v17, %s3771_s10 }
  0x9d   : > { %331 = vmatprep.subr.bf16.mxu0 %v309_v25  ;;  %385 = vmatpush1.bf16.msra.mxu1 %v310_v26 }
  0x9e   : > { %2338 = vrot.lane.b32.xlu0 %v3860_v18, %s3771_s10  ;;  %v290_v28 = vpop.permute.xlu0 %289  ;;  %v300_v29 = vpop.permute.xlu1 %299 }
  0x9f   : > { %v308_v30 = vsel %vm307_vm0, %v290_v28, %v292_v21  ;;  %v312_v35 = vsel %vm307_vm0, %v298_v22, %v300_v29  ;;  %v3729_v21 = vld [vmem:[%s4357_s1 + $0x38] sm:$0xff]  }
  0xa0   : > { %3248 = vmatmul.mubr.msk.bf16.vlgmr.msra.gmra.mrb[0].mxu1 %vm324_vm1, %v3722_v27  ;;  %2628 = vrot.lane.b32.xlu1 %v3844_v12, %s3772_s18 }
  0xa1   : > { %332 = vmatpush1.bf16.msra.mxu0 %v308_v30  ;;  %426 = vmatprep.mubr.bf16.mxu1 %v3764_v10 }
  0xa2   : > { %2342 = vrot.lane.b32.xlu0 %v3864_v19, %s3771_s10  ;;  %v302_v31 = vpop.permute.xlu0 %301  ;;  %v304_v32 = vpop.permute.xlu1 %303 }
  0xa3   : > { %v313_v33 = vsel %vm307_vm0, %v300_v29, %v302_v31  ;;  %v314_v36 = vsel %vm307_vm0, %v302_v31, %v304_v32 }
  0xa4   : > { %3246 = vmatmul.mubr.msk.bf16.vlgmr.msra.gmra.mrb[0].mxu0 %vm324_vm1, %v3722_v27  ;;  %2632 = vrot.lane.b32.xlu1 %v3842_v11, %s3772_s18 }
  0xa5   : > { %437 = vmatprep.subr.bf16.mxu0 %v313_v33  ;;  %373 = vmatprep.mubr.bf16.mxu0 %v3764_v10  ;;  %v3730_v33 = vld [vmem:[%s4357_s1 + $0x40] sm:$0xff]  }
  0xa6   : > { %438 = vmatpush1.bf16.msra.mxu0 %v312_v35  ;;  %2630 = vrot.lane.b32.xlu0 %v3850_v14, %s3772_s18  ;;  %v306_v37 = vpop.permute.xlu0 %305  ;;  %v829_v40 = vpop.permute.xlu1 %828 }
  0xa7   : > { %599 = vmatprep.subr.bf16.mxu0 %v3844_v12  ;;  %v315_v38 = vsel %vm307_vm0, %v304_v32, %v306_v37 }
  0xa8   : > { %3249 = vmatmul.mubr.msk.bf16.gmra.mrb[4].mxu1 %vm324_vm1, %v3723_v34  ;;  %2626 = vrot.lane.b32.xlu1 %v3855_v16, %s3772_s18 }
  0xa9   : > { %490 = vmatprep.subr.bf16.mxu1 %v315_v38  ;;  %522 = vmatprep.mubr.bf16.mxu1 %v3764_v10 }
  0xaa   : > { %491 = vmatpush1.bf16.msra.mxu1 %v314_v36  ;;  %2634 = vrot.lane.b32.xlu0 %v3847_v13, %s3772_s18  ;;  %v831_v39 = vpop.permute.xlu0 %830  ;;  %v833_v43 = vpop.permute.xlu1 %832 }
  0xab   : > { %652 = vmatprep.subr.bf16.mxu1 %v3842_v11  ;;  %v846_v45 = vsel %vm844_vm2, %v829_v40, %v831_v39  ;;  %v847_v52 = vsel %vm844_vm2, %v831_v39, %v833_v43 }
  0xac   : > { %3247 = vmatmul.mubr.msk.bf16.gmra.mrb[4].mxu0 %vm324_vm1, %v3723_v34  ;;  %2638 = vrot.lane.b32.xlu1 %v3860_v18, %s3772_s18 }
  0xad   : > { %469 = vmatprep.mubr.bf16.mxu0 %v3764_v10 }
  0xae   : > { %2636 = vrot.lane.b32.xlu0 %v3853_v15, %s3772_s18  ;;  %v835_v42 = vpop.permute.xlu0 %834  ;;  %v827_v47 = vpop.permute.xlu1 %826 }
  0xaf   : > { %v848_v44 = vsel %vm844_vm2, %v833_v43, %v835_v42  ;;  %v845_v54 = vsel %vm844_vm2, %v827_v47, %v829_v40  ;;  %v3731_v40 = vld [vmem:[%s4357_s1 + $0x48] sm:$0xff]  }
  0xb0   : > { %3252 = vmatmul.mubr.msk.bf16.vlgmr.msra.gmra.mrb[8].mxu1 %vm324_vm1, %v3722_v27  ;;  %2642 = vrot.lane.b32.xlu1 %v3864_v19, %s3772_s18 }
  0xb1   : > { %532 = vmatprep.mubr.bf16.mxu1 %v3764_v10  ;;  %653 = vmatpush1.bf16.msra.mxu1 %v3850_v14  ;;  %v3728_v14 = vld [vmem:[%s4357_s1 + $0x30] sm:$0xff]  }
  0xb2   : > { %758 = vmatprep.subr.bf16.mxu1 %v3858_v17  ;;  %2640 = vrot.lane.b32.xlu0 %v3858_v17, %s3772_s18  ;;  %v837_v48 = vpop.permute.xlu0 %836  ;;  %v839_v49 = vpop.permute.xlu1 %838 }
  0xb3   : > { %v850_v55 = vsel %vm844_vm2, %v837_v48, %v839_v49  ;;  %v849_v0 = vsel %vm844_vm2, %v835_v42, %v837_v48 }
  0xb4   : > { %3250 = vmatmul.mubr.msk.bf16.vlgmr.msra.gmra.mrb[8].mxu0 %vm324_vm1, %v3722_v27 }
  0xb5   : > { %600 = vmatpush1.bf16.msra.mxu0 %v3855_v16  ;;  %479 = vmatprep.mubr.bf16.mxu0 %v3764_v10 }
  0xb6   : > { %705 = vmatprep.subr.bf16.mxu0 %v3853_v15  ;;  %v843_v50 = vpop.permute.xlu1 %842  ;;  %v841_v51 = vpop.permute.xlu0 %840 }
  0xb7   : > { %v852_v53 = vsel %vm844_vm2, %v841_v51, %v843_v50  ;;  %v851_v60 = vsel %vm844_vm2, %v839_v49, %v841_v51 }
  0xb8   : > { %3253 = vmatmul.mubr.msk.bf16.gmra.mrb[12].mxu1 %vm324_vm1, %v3723_v34 }
  0xb9   : > { %684 = vmatprep.mubr.bf16.mxu1 %v3764_v10 }
  0xba   : > { %v1131_v56 = vpop.permute.xlu1 %1130  ;;  %v1129_v57 = vpop.permute.xlu0 %1128 }
  0xbb   : > { %v1146_v63 = vsel %vm1144_vm3, %v1129_v57, %v1131_v56 }
  0xbc   : > { %3251 = vmatmul.mubr.msk.bf16.gmra.mrb[12].mxu0 %vm324_vm1, %v3723_v34 }
  0xbd   : > { %631 = vmatprep.mubr.bf16.mxu0 %v3764_v10 }
  0xbe   : > { %v1135_v59 = vpop.permute.xlu1 %1134  ;;  %v1133_v61 = vpop.permute.xlu0 %1132 }
  0xbf   : > { %v1148_v62 = vsel %vm1144_vm3, %v1133_v61, %v1135_v59  ;;  %v1147_v7 = vsel %vm1144_vm3, %v1131_v56, %v1133_v61 }
  0xc0   : > { %3266 = vmatmul.mubr.msk.bf16.vlgmr.msra.gmra.mrb[0].mxu1 %vm324_vm1, %v3724_v41 }
  0xc1   : > { %694 = vmatprep.mubr.bf16.mxu1 %v3764_v10  ;;  %759 = vmatpush1.bf16.msra.mxu1 %v3860_v18 }
  0xc2   : > { %920 = vmatprep.subr.bf16.mxu1 %v848_v44  ;;  %v1127_v2 = vpop.permute.xlu0 %1126  ;;  %v1137_v3 = vpop.permute.xlu1 %1136 }
  0xc3   : > { %v1145_v9 = vsel %vm1144_vm3, %v1127_v2, %v1129_v57  ;;  %v1149_v20 = vsel %vm1144_vm3, %v1135_v59, %v1137_v3  ;;  %v2913_v59 = vld [vmem:[%s4358_s2 + $0x10] sm:$0xff] }
  0xc4   : > { %3264 = vmatmul.mubr.msk.bf16.vlgmr.msra.gmra.mrb[0].mxu0 %vm324_vm1, %v3724_v41 }
  0xc5   : > { %706 = vmatpush1.bf16.msra.mxu0 %v3847_v13  ;;  %641 = vmatprep.mubr.bf16.mxu0 %v3764_v10 }
  0xc6   : > { %867 = vmatprep.subr.bf16.mxu0 %v846_v45  ;;  %v1139_v4 = vpop.permute.xlu0 %1138  ;;  %v1141_v5 = vpop.permute.xlu1 %1140 }
  0xc7   : > { %v1150_v11 = vsel %vm1144_vm3, %v1137_v3, %v1139_v4  ;;  %v1151_v16 = vsel %vm1144_vm3, %v1139_v4, %v1141_v5 }
  0xc8   : > { %3267 = vmatmul.mubr.msk.bf16.gmra.mrb[4].mxu1 %vm324_vm1, %v3725_v46 }
  0xc9   : > { %790 = vmatprep.mubr.bf16.mxu1 %v3764_v10 }
  0xca   : > { %v1143_v6 = vpop.permute.xlu0 %1142  ;;  %v1429_v13 = vpop.permute.xlu1 %1428 }
  0xcb   : > { %v1152_v8 = vsel %vm1144_vm3, %v1141_v5, %v1143_v6 }
  0xcc   : > { %3265 = vmatmul.mubr.msk.bf16.gmra.mrb[4].mxu0 %vm324_vm1, %v3725_v46 }
  0xcd   : > { %737 = vmatprep.mubr.bf16.mxu0 %v3764_v10 }
  0xce   : > { %v1431_v12 = vpop.permute.xlu0 %1430  ;;  %v1433_v17 = vpop.permute.xlu1 %1432 }
  0xcf   : > { %v1446_v19 = vsel %vm1444_vm4, %v1429_v13, %v1431_v12  ;;  %v1447_v27 = vsel %vm1444_vm4, %v1431_v12, %v1433_v17  ;;  %v3734_v12 = vld [vmem:[%s4357_s1 + $0x60] sm:$0xff]  }
  0xd0   : > { %3270 = vmatmul.mubr.msk.bf16.vlgmr.msra.gmra.mrb[8].mxu1 %vm324_vm1, %v3724_v41 }
  0xd1   : > { %921 = vmatpush1.bf16.msra.mxu1 %v847_v52  ;;  %800 = vmatprep.mubr.bf16.mxu1 %v3764_v10  ;;  %v3732_v52 = vld [vmem:[%s4357_s1 + $0x50] sm:$0xff]  }
  0xd2   : > { %1026 = vmatprep.subr.bf16.mxu1 %v852_v53  ;;  %v1435_v15 = vpop.permute.xlu0 %1434  ;;  %v1427_v22 = vpop.permute.xlu1 %1426 }
  0xd3   : > { %v1448_v18 = vsel %vm1444_vm4, %v1433_v17, %v1435_v15  ;;  %v1445_v29 = vsel %vm1444_vm4, %v1427_v22, %v1429_v13 }
  0xd4   : > { %3268 = vmatmul.mubr.msk.bf16.vlgmr.msra.gmra.mrb[8].mxu0 %vm324_vm1, %v3724_v41 }
  0xd5   : > { %868 = vmatpush1.bf16.msra.mxu0 %v845_v54  ;;  %747 = vmatprep.mubr.bf16.mxu0 %v3764_v10  ;;  %v2911_v54 = vld [vmem:[%s4358_s2] sm:$0xff] }
  0xd6   : > { %973 = vmatprep.subr.bf16.mxu0 %v850_v55  ;;  %v1437_v23 = vpop.permute.xlu0 %1436  ;;  %v1439_v24 = vpop.permute.xlu1 %1438  ;;  %v2912_v55 = vld [vmem:[%s4358_s2 + $0x8] sm:$0xff]  ;;  %2917 = vperm.xlu0 %3707, %v2911_v54  }
  0xd7   : > { %v1450_v30 = vsel %vm1444_vm4, %v1437_v23, %v1439_v24  ;;  %v1449_v39 = vsel %vm1444_vm4, %v1435_v15, %v1437_v23  ;;  %2922 = vperm.xlu1 %3708, %v2912_v55  }
  0xd8   : > { %3271 = vmatmul.mubr.msk.bf16.gmra.mrb[12].mxu1 %vm324_vm1, %v3725_v46 }
  0xd9   : > { %952 = vmatprep.mubr.bf16.mxu1 %v3764_v10 }
  0xda   : > { %v1443_v25 = vpop.permute.xlu1 %1442  ;;  %v1441_v26 = vpop.permute.xlu0 %1440 }
  0xdb   : > { %v1452_v28 = vsel %vm1444_vm4, %v1441_v26, %v1443_v25  ;;  %v1451_v35 = vsel %vm1444_vm4, %v1439_v24, %v1441_v26  ;;  %2927 = vperm.xlu1 %3708, %v2913_v59  }
  0xdc   : > { %3269 = vmatmul.mubr.msk.bf16.gmra.mrb[12].mxu0 %vm324_vm1, %v3725_v46 }
  0xdd   : > { %899 = vmatprep.mubr.bf16.mxu0 %v3764_v10 }
  0xde   : > { %v1731_v31 = vpop.permute.xlu1 %1730  ;;  %v1729_v32 = vpop.permute.xlu0 %1728 }
  0xdf   : > { %v1746_v38 = vsel %vm1744_vm5, %v1729_v32, %v1731_v31 }
  0xe0   : > { %3280 = vmatmul.mubr.msk.bf16.vlgmr.msra.gmra.mrb[0].mxu1 %vm324_vm1, %v3726_v58 }
  0xe1   : > { %1027 = vmatpush1.bf16.msra.mxu1 %v851_v60  ;;  %962 = vmatprep.mubr.bf16.mxu1 %v3764_v10  ;;  %v2914_v60 = vld [vmem:[%s4358_s2 + $0x18] sm:$0xff] }
  0xe2   : > { %1220 = vmatprep.subr.bf16.mxu1 %v1148_v62  ;;  %v4069_v34 = vpop.permute.xlu1 %1734  ;;  %v1733_v36 = vpop.permute.xlu0 %1732  ;;  %2932 = vperm.xlu0 %3707, %v2914_v60  }
  0xe3   : > { %v1748_v37 = vsel %vm1744_vm5, %v1733_v36, %v4069_v34  ;;  %v1747_v46 = vsel %vm1744_vm5, %v1731_v31, %v1733_v36  ;;  %v3736_v31 = vld [vmem:[%s4357_s1 + $0x70] sm:$0xff]  }
  0xe4   : > { %3278 = vmatmul.mubr.msk.bf16.vlgmr.msra.gmra.mrb[0].mxu0 %vm324_vm1, %v3726_v58 }
  0xe5   : > { %974 = vmatpush1.bf16.msra.mxu0 %v849_v0  ;;  %909 = vmatprep.mubr.bf16.mxu0 %v3764_v10 }
  0xe6   : > { %1167 = vmatprep.subr.bf16.mxu0 %v1146_v63  ;;  %v1727_v41 = vpop.permute.xlu0 %1726  ;;  %v1737_v42 = vpop.permute.xlu1 %1736  ;;  %v3733_v63 = vld [vmem:[%s4357_s1 + $0x58] sm:$0xff]  }
  0xe7   : > { %v1745_v48 = vsel %vm1744_vm5, %v1727_v41, %v1729_v32  ;;  %v1749_v62 = vsel %vm1744_vm5, %v4069_v34, %v1737_v42 }
  0xe8   : > { %3281 = vmatmul.mubr.msk.bf16.gmra.mrb[4].mxu1 %vm324_vm1, %v3727_v1 }
  0xe9   : > { %1058 = vmatprep.mubr.bf16.mxu1 %v3764_v10 }
  0xea   : > { %v1739_v43 = vpop.permute.xlu0 %1738  ;;  %v1741_v44 = vpop.permute.xlu1 %1740 }
  0xeb   : > { %v1750_v49 = vsel %vm1744_vm5, %v1737_v42, %v1739_v43  ;;  %v1751_v56 = vsel %vm1744_vm5, %v1739_v43, %v1741_v44 }
  0xec   : > { %3279 = vmatmul.mubr.msk.bf16.gmra.mrb[4].mxu0 %vm324_vm1, %v3727_v1 }
  0xed   : > { %1005 = vmatprep.mubr.bf16.mxu0 %v3764_v10 }
  0xee   : > { %v1743_v45 = vpop.permute.xlu0 %1742  ;;  %v2029_v51 = vpop.permute.xlu1 %2028 }
  0xef   : > { %v1752_v47 = vsel %vm1744_vm5, %v1741_v44, %v1743_v45 }
  0xf0   : > { %3284 = vmatmul.mubr.msk.bf16.vlgmr.msra.gmra.mrb[8].mxu1 %vm324_vm1, %v3726_v58 }
  0xf1   : > { %1221 = vmatpush1.bf16.msra.mxu1 %v1147_v7  ;;  %1068 = vmatprep.mubr.bf16.mxu1 %v3764_v10 }
  0xf2   : > { %1326 = vmatprep.subr.bf16.mxu1 %v1152_v8  ;;  %v2031_v50 = vpop.permute.xlu0 %2030  ;;  %v2033_v57 = vpop.permute.xlu1 %2032 }
  0xf3   : > { %v2046_v61 = vsel %vm2044_vm6, %v2029_v51, %v2031_v50  ;;  %v2047_v5 = vsel %vm2044_vm6, %v2031_v50, %v2033_v57 }
  0xf4   : > { %3282 = vmatmul.mubr.msk.bf16.vlgmr.msra.gmra.mrb[8].mxu0 %vm324_vm1, %v3726_v58 }
  0xf5   : > { %1168 = vmatpush1.bf16.msra.mxu0 %v1145_v9  ;;  %1015 = vmatprep.mubr.bf16.mxu0 %v3764_v10 }
  0xf6   : > { %1273 = vmatprep.subr.bf16.mxu0 %v1150_v11  ;;  %v4102_v53 = vpop.permute.xlu0 %2034  ;;  %v2027_v0 = vpop.permute.xlu1 %2026 }
  0xf7   : > { %v2048_v58 = vsel %vm2044_vm6, %v2033_v57, %v4102_v53  ;;  %v2045_v7 = vsel %vm2044_vm6, %v2027_v0, %v2029_v51  ;;  %v3739_v51 = vld [vmem:[%s4357_s1 + $0x88] sm:$0xff]  }
  0xf8   : > { %3285 = vmatmul.mubr.msk.bf16.gmra.mrb[12].mxu1 %vm324_vm1, %v3727_v1 }
  0xf9   : > { %1252 = vmatprep.mubr.bf16.mxu1 %v3764_v10 }
  0xfa   : > { %v2039_v2 = vpop.permute.xlu1 %2038 }
  0xfc   : > { %3283 = vmatmul.mubr.msk.bf16.gmra.mrb[12].mxu0 %vm324_vm1, %v3727_v1  ;;  %v2037_v1 = vpop.permute.xlu0 %2036 }
  0xfd   : > { %1199 = vmatprep.mubr.bf16.mxu0 %v3764_v10  ;;  %v2050_v8 = vsel %vm2044_vm6, %v2037_v1, %v2039_v2 }
  0xfe   : > { %v2043_v3 = vpop.permute.xlu1 %2042 }
 0x100   : > { %3294 = vmatmul.mubr.msk.bf16.vlgmr.msra.gmra.mrb[0].mxu1 %vm324_vm1, %v3728_v14  ;;  %v2041_v4 = vpop.permute.xlu0 %2040 }
 0x101   : > { %1327 = vmatpush1.bf16.msra.mxu1 %v1151_v16  ;;  %1262 = vmatprep.mubr.bf16.mxu1 %v3764_v10  ;;  %v2052_v6 = vsel %vm2044_vm6, %v2041_v4, %v2043_v3 }
 0x102   : > { %1520 = vmatprep.subr.bf16.mxu1 %v1448_v18  ;;  %v2331_v9 = vpop.permute.xlu1 %2330  ;;  %v2049_v18 = vsel %vm2044_vm6, %v4102_v53, %v2037_v1 }
 0x104   : > { %3292 = vmatmul.mubr.msk.bf16.vlgmr.msra.gmra.mrb[0].mxu0 %vm324_vm1, %v3728_v14  ;;  %v2329_v11 = vpop.permute.xlu0 %2328 }
 0x105   : > { %1274 = vmatpush1.bf16.msra.mxu0 %v1149_v20  ;;  %1209 = vmatprep.mubr.bf16.mxu0 %v3764_v10  ;;  %v2346_v17 = vsel %vm2344_vm7, %v2329_v11, %v2331_v9 }
 0x106   : > { %1467 = vmatprep.subr.bf16.mxu0 %v1446_v19  ;;  %v2335_v13 = vpop.permute.xlu1 %2334  ;;  %v3735_v19 = vld [vmem:[%s4357_s1 + $0x68] sm:$0xff]  }
 0x108   : > { %3295 = vmatmul.mubr.msk.bf16.gmra.mrb[4].mxu1 %vm324_vm1, %v3729_v21  ;;  %v2333_v15 = vpop.permute.xlu0 %2332 }
 0x109   : > { %1358 = vmatprep.mubr.bf16.mxu1 %v3764_v10  ;;  %v2348_v16 = vsel %vm2344_vm7, %v2333_v15, %v2335_v13  ;;  %v2347_v25 = vsel %vm2344_vm7, %v2331_v9, %v2333_v15 }
 0x10c   : > { %3293 = vmatmul.mubr.msk.bf16.gmra.mrb[4].mxu0 %vm324_vm1, %v3729_v21  ;;  %v2327_v20 = vpop.permute.xlu0 %2326 }
 0x10d   : > { %1305 = vmatprep.mubr.bf16.mxu0 %v3764_v10 }
 0x110   : > { %3298 = vmatmul.mubr.msk.bf16.vlgmr.msra.gmra.mrb[8].mxu1 %vm324_vm1, %v3728_v14  ;;  %v2339_v22 = vpop.permute.xlu0 %2338 }
 0x111   : > { %1521 = vmatpush1.bf16.msra.mxu1 %v1447_v27  ;;  %1368 = vmatprep.mubr.bf16.mxu1 %v3764_v10  ;;  %v2345_v27 = vsel %vm2344_vm7, %v2327_v20, %v2329_v11 }
 0x112   : > { %1626 = vmatprep.subr.bf16.mxu1 %v1452_v28 }
 0x114   : > { %3296 = vmatmul.mubr.msk.bf16.vlgmr.msra.gmra.mrb[8].mxu0 %vm324_vm1, %v3728_v14  ;;  %v2051_v14 = vsel %vm2044_vm6, %v2039_v2, %v2041_v4  ;;  %v2343_v24 = vpop.permute.xlu0 %2342 }
 0x115   : > { %1468 = vmatpush1.bf16.msra.mxu0 %v1445_v29  ;;  %1315 = vmatprep.mubr.bf16.mxu0 %v3764_v10 }
 0x116   : > { %1573 = vmatprep.subr.bf16.mxu0 %v1450_v30 }
 0x118   : > { %3299 = vmatmul.mubr.msk.bf16.gmra.mrb[12].mxu1 %vm324_vm1, %v3729_v21  ;;  %v2631_v29 = vpop.permute.xlu0 %2630 }
 0x119   : > { %1552 = vmatprep.mubr.bf16.mxu1 %v3764_v10 }
 0x11c   : > { %3297 = vmatmul.mubr.msk.bf16.gmra.mrb[12].mxu0 %vm324_vm1, %v3729_v21  ;;  %v2337_v21 = vpop.permute.xlu1 %2336  ;;  %v2635_v32 = vpop.permute.xlu0 %2634 }
 0x11d   : > { %1499 = vmatprep.mubr.bf16.mxu0 %v3764_v10  ;;  %v2350_v28 = vsel %vm2344_vm7, %v2337_v21, %v2339_v22 }
 0x120   : > { %3308 = vmatmul.mubr.msk.bf16.vlgmr.msra.gmra.mrb[0].mxu1 %vm324_vm1, %v3730_v33  ;;  %v2341_v23 = vpop.permute.xlu1 %2340 }
 0x121   : > { %1627 = vmatpush1.bf16.msra.mxu1 %v1451_v35  ;;  %1562 = vmatprep.mubr.bf16.mxu1 %v3764_v10  ;;  %v2352_v26 = vsel %vm2344_vm7, %v2341_v23, %v2343_v24 }
 0x122   : > { %1820 = vmatprep.subr.bf16.mxu1 %v1748_v37  ;;  %v2349_v37 = vsel %vm2344_vm7, %v2335_v13, %v2337_v21 }
 0x124   : > { %3306 = vmatmul.mubr.msk.bf16.vlgmr.msra.gmra.mrb[0].mxu0 %vm324_vm1, %v3730_v33  ;;  %v2629_v30 = vpop.permute.xlu1 %2628 }
 0x125   : > { %1574 = vmatpush1.bf16.msra.mxu0 %v1449_v39  ;;  %1509 = vmatprep.mubr.bf16.mxu0 %v3764_v10  ;;  %v2646_v36 = vsel %vm2644_vm8, %v2629_v30, %v2631_v29 }
 0x126   : > { %1767 = vmatprep.subr.bf16.mxu0 %v1746_v38  ;;  %v3737_v38 = vld [vmem:[%s4357_s1 + $0x78] sm:$0xff]  }
 0x128   : > { %3309 = vmatmul.mubr.msk.bf16.gmra.mrb[4].mxu1 %vm324_vm1, %v3731_v40  ;;  %v2633_v34 = vpop.permute.xlu1 %2632 }
 0x129   : > { %1658 = vmatprep.mubr.bf16.mxu1 %v3764_v10  ;;  %v2648_v35 = vsel %vm2644_vm8, %v2633_v34, %v2635_v32  ;;  %v2647_v44 = vsel %vm2644_vm8, %v2631_v29, %v2633_v34 }
 0x12c   : > { %3307 = vmatmul.mubr.msk.bf16.gmra.mrb[4].mxu0 %vm324_vm1, %v3731_v40  ;;  %v2627_v39 = vpop.permute.xlu1 %2626 }
 0x12d   : > { %1605 = vmatprep.mubr.bf16.mxu0 %v3764_v10 }
 0x130   : > { %3312 = vmatmul.mubr.msk.bf16.vlgmr.msra.gmra.mrb[8].mxu1 %vm324_vm1, %v3730_v33  ;;  %v2639_v41 = vpop.permute.xlu1 %2638 }
 0x131   : > { %1821 = vmatpush1.bf16.msra.mxu1 %v1747_v46  ;;  %1668 = vmatprep.mubr.bf16.mxu1 %v3764_v10  ;;  %v2645_v46 = vsel %vm2644_vm8, %v2627_v39, %v2629_v30 }
 0x132   : > { %1926 = vmatprep.subr.bf16.mxu1 %v1752_v47 }
 0x134   : > { %3310 = vmatmul.mubr.msk.bf16.vlgmr.msra.gmra.mrb[8].mxu0 %vm324_vm1, %v3730_v33  ;;  %v2351_v33 = vsel %vm2344_vm7, %v2339_v22, %v2341_v23  ;;  %v2643_v42 = vpop.permute.xlu1 %2642 }
 0x135   : > { %1768 = vmatpush1.bf16.msra.mxu0 %v1745_v48  ;;  %1615 = vmatprep.mubr.bf16.mxu0 %v3764_v10  ;;  %v3738_v48 = vld [vmem:[%s4357_s1 + $0x80] sm:$0xff]  }
 0x136   : > { %1873 = vmatprep.subr.bf16.mxu0 %v1750_v49 }
 0x138   : > { %3313 = vmatmul.mubr.msk.bf16.gmra.mrb[12].mxu1 %vm324_vm1, %v3731_v40 }
 0x139   : > { %1852 = vmatprep.mubr.bf16.mxu1 %v3764_v10 }
 0x13c   : > { %3311 = vmatmul.mubr.msk.bf16.gmra.mrb[12].mxu0 %vm324_vm1, %v3731_v40  ;;  %v2637_v40 = vpop.permute.xlu0 %2636 }
 0x13d   : > { %1799 = vmatprep.mubr.bf16.mxu0 %v3764_v10  ;;  %v2650_v47 = vsel %vm2644_vm8, %v2637_v40, %v2639_v41  ;;  %v2649_v50 = vsel %vm2644_vm8, %v2635_v32, %v2637_v40 }
 0x140   : > { %3322 = vmatmul.mubr.msk.bf16.vlgmr.msra.gmra.mrb[0].mxu1 %vm324_vm1, %v3732_v52  ;;  %v2641_v43 = vpop.permute.xlu0 %2640 }
 0x141   : > { %1927 = vmatpush1.bf16.msra.mxu1 %v1751_v56  ;;  %1862 = vmatprep.mubr.bf16.mxu1 %v3764_v10  ;;  %v2652_v45 = vsel %vm2644_vm8, %v2641_v43, %v2643_v42  ;;  %v2651_v49 = vsel %vm2644_vm8, %v2639_v41, %v2641_v43 }
 0x142   : > { %2120 = vmatprep.subr.bf16.mxu1 %v2048_v58 }
 0x144   : > { %3320 = vmatmul.mubr.msk.bf16.vlgmr.msra.gmra.mrb[0].mxu0 %vm324_vm1, %v3732_v52 }
 0x145   : > { %1874 = vmatpush1.bf16.msra.mxu0 %v1749_v62  ;;  %1809 = vmatprep.mubr.bf16.mxu0 %v3764_v10 }
 0x146   : > { %2067 = vmatprep.subr.bf16.mxu0 %v2046_v61 }
 0x148   : > { %3323 = vmatmul.mubr.msk.bf16.gmra.mrb[4].mxu1 %vm324_vm1, %v3733_v63 }
 0x149   : > { %1958 = vmatprep.mubr.bf16.mxu1 %v3764_v10 }
 0x14c   : > { %3321 = vmatmul.mubr.msk.bf16.gmra.mrb[4].mxu0 %vm324_vm1, %v3733_v63 }
 0x14d   : > { %1905 = vmatprep.mubr.bf16.mxu0 %v3764_v10 }
 0x150   : > { %3326 = vmatmul.mubr.msk.bf16.vlgmr.msra.gmra.mrb[8].mxu1 %vm324_vm1, %v3732_v52 }
 0x151   : > { %2121 = vmatpush1.bf16.msra.mxu1 %v2047_v5  ;;  %1968 = vmatprep.mubr.bf16.mxu1 %v3764_v10 }
 0x152   : > { %2226 = vmatprep.subr.bf16.mxu1 %v2052_v6 }
 0x154   : > { %3324 = vmatmul.mubr.msk.bf16.vlgmr.msra.gmra.mrb[8].mxu0 %vm324_vm1, %v3732_v52 }
 0x155   : > { %2068 = vmatpush1.bf16.msra.mxu0 %v2045_v7  ;;  %1915 = vmatprep.mubr.bf16.mxu0 %v3764_v10  ;;  %v4241_v52 = vpop.permute.xlu0 %2917 }
 0x156   : > { %2173 = vmatprep.subr.bf16.mxu0 %v2050_v8  ;;  %v4243_v54 = vpop.permute.xlu1 %2922 }
 0x158   : > { %3327 = vmatmul.mubr.msk.bf16.gmra.mrb[12].mxu1 %vm324_vm1, %v3733_v63 }
 0x159   : > { %2152 = vmatprep.mubr.bf16.mxu1 %v3764_v10 }
 0x15a   : > { %v4252_v4 = vpop.permute.xlu1 %2927 }
 0x15c   : > { %3325 = vmatmul.mubr.msk.bf16.gmra.mrb[12].mxu0 %vm324_vm1, %v3733_v63 }
 0x15d   : > { %2099 = vmatprep.mubr.bf16.mxu0 %v3764_v10 }
 0x160   : > { %3336 = vmatmul.mubr.msk.bf16.vlgmr.msra.gmra.mrb[0].mxu1 %vm324_vm1, %v3734_v12 }
 0x161   : > { %2227 = vmatpush1.bf16.msra.mxu1 %v2051_v14  ;;  %2162 = vmatprep.mubr.bf16.mxu1 %v3764_v10  ;;  %v4257_v11 = vpop.permute.xlu0 %2932 }
 0x162   : > { %2420 = vmatprep.subr.bf16.mxu1 %v2348_v16 }
 0x164   : > { %3334 = vmatmul.mubr.msk.bf16.vlgmr.msra.gmra.mrb[0].mxu0 %vm324_vm1, %v3734_v12 }
 0x165   : > { %2174 = vmatpush1.bf16.msra.mxu0 %v2049_v18  ;;  %2109 = vmatprep.mubr.bf16.mxu0 %v3764_v10 }
 0x166   : > { %2367 = vmatprep.subr.bf16.mxu0 %v2346_v17 }
 0x168   : > { %3337 = vmatmul.mubr.msk.bf16.gmra.mrb[4].mxu1 %vm324_vm1, %v3735_v19 }
 0x169   : > { %2258 = vmatprep.mubr.bf16.mxu1 %v3764_v10 }
 0x16c   : > { %3335 = vmatmul.mubr.msk.bf16.gmra.mrb[4].mxu0 %vm324_vm1, %v3735_v19 }
 0x16d   : > { %2205 = vmatprep.mubr.bf16.mxu0 %v3764_v10 }
 0x170   : > { %3340 = vmatmul.mubr.msk.bf16.vlgmr.msra.gmra.mrb[8].mxu1 %vm324_vm1, %v3734_v12 }
 0x171   : > { %2421 = vmatpush1.bf16.msra.mxu1 %v2347_v25  ;;  %2268 = vmatprep.mubr.bf16.mxu1 %v3764_v10 }
 0x172   : > { %2526 = vmatprep.subr.bf16.mxu1 %v2352_v26 }
 0x174   : > { %3338 = vmatmul.mubr.msk.bf16.vlgmr.msra.gmra.mrb[8].mxu0 %vm324_vm1, %v3734_v12 }
 0x175   : > { %2368 = vmatpush1.bf16.msra.mxu0 %v2345_v27  ;;  %2215 = vmatprep.mubr.bf16.mxu0 %v3764_v10 }
 0x176   : > { %2473 = vmatprep.subr.bf16.mxu0 %v2350_v28 }
 0x178   : > { %3341 = vmatmul.mubr.msk.bf16.gmra.mrb[12].mxu1 %vm324_vm1, %v3735_v19 }
 0x179   : > { %2452 = vmatprep.mubr.bf16.mxu1 %v3764_v10 }
 0x17c   : > { %3339 = vmatmul.mubr.msk.bf16.gmra.mrb[12].mxu0 %vm324_vm1, %v3735_v19 }
 0x17d   : > { %2399 = vmatprep.mubr.bf16.mxu0 %v3764_v10 }
 0x180   : > { %3350 = vmatmul.mubr.msk.bf16.vlgmr.msra.gmra.mrb[0].mxu1 %vm324_vm1, %v3736_v31 }
 0x181   : > { %2527 = vmatpush1.bf16.msra.mxu1 %v2351_v33  ;;  %2462 = vmatprep.mubr.bf16.mxu1 %v3764_v10 }
 0x182   : > { %2720 = vmatprep.subr.bf16.mxu1 %v2648_v35 }
 0x184   : > { %3348 = vmatmul.mubr.msk.bf16.vlgmr.msra.gmra.mrb[0].mxu0 %vm324_vm1, %v3736_v31 }
 0x185   : > { %2474 = vmatpush1.bf16.msra.mxu0 %v2349_v37  ;;  %2409 = vmatprep.mubr.bf16.mxu0 %v3764_v10 }
 0x186   : > { %2667 = vmatprep.subr.bf16.mxu0 %v2646_v36 }
 0x188   : > { %3351 = vmatmul.mubr.msk.bf16.gmra.mrb[4].mxu1 %vm324_vm1, %v3737_v38 }
 0x189   : > { %2558 = vmatprep.mubr.bf16.mxu1 %v3764_v10 }
 0x18c   : > { %3349 = vmatmul.mubr.msk.bf16.gmra.mrb[4].mxu0 %vm324_vm1, %v3737_v38 }
 0x18d   : > { %2505 = vmatprep.mubr.bf16.mxu0 %v3764_v10 }
 0x190   : > { %3354 = vmatmul.mubr.msk.bf16.vlgmr.msra.gmra.mrb[8].mxu1 %vm324_vm1, %v3736_v31 }
 0x191   : > { %2721 = vmatpush1.bf16.msra.mxu1 %v2647_v44  ;;  %2568 = vmatprep.mubr.bf16.mxu1 %v3764_v10 }
 0x192   : > { %2826 = vmatprep.subr.bf16.mxu1 %v2652_v45 }
 0x194   : > { %3352 = vmatmul.mubr.msk.bf16.vlgmr.msra.gmra.mrb[8].mxu0 %vm324_vm1, %v3736_v31 }
 0x195   : > { %2668 = vmatpush1.bf16.msra.mxu0 %v2645_v46  ;;  %2515 = vmatprep.mubr.bf16.mxu0 %v3764_v10 }
 0x196   : > { %2773 = vmatprep.subr.bf16.mxu0 %v2650_v47 }
 0x198   : > { %3355 = vmatmul.mubr.msk.bf16.gmra.mrb[12].mxu1 %vm324_vm1, %v3737_v38 }
 0x199   : > { %2752 = vmatprep.mubr.bf16.mxu1 %v3764_v10 }
 0x19c   : > { %3353 = vmatmul.mubr.msk.bf16.gmra.mrb[12].mxu0 %vm324_vm1, %v3737_v38 }
 0x19d   : > { %2699 = vmatprep.mubr.bf16.mxu0 %v3764_v10 }
 0x1a0   : > { %3364 = vmatmul.mubr.msk.bf16.vlgmr.msra.gmra.mrb[0].mxu1 %vm324_vm1, %v3738_v48 }
 0x1a1   : > { %2827 = vmatpush1.bf16.msra.mxu1 %v2651_v49  ;;  %2762 = vmatprep.mubr.bf16.mxu1 %v3764_v10 }
 0x1a4   : > { %3362 = vmatmul.mubr.msk.bf16.vlgmr.msra.gmra.mrb[0].mxu0 %vm324_vm1, %v3738_v48 }
 0x1a5   : > { %2774 = vmatpush1.bf16.msra.mxu0 %v2649_v50  ;;  %2709 = vmatprep.mubr.bf16.mxu0 %v3764_v10 }
 0x1a8   : > { %3365 = vmatmul.mubr.msk.bf16.gmra.mrb[4].mxu1 %vm324_vm1, %v3739_v51 }
 0x1a9   : > { %2858 = vmatprep.mubr.bf16.mxu1 %v3764_v10 }
 0x1ac   : > { %3363 = vmatmul.mubr.msk.bf16.gmra.mrb[4].mxu0 %vm324_vm1, %v3739_v51 }
 0x1ad   : > { %2805 = vmatprep.mubr.bf16.mxu0 %v3764_v10 }
 0x1b0   : > { %3368 = vmatmul.mubr.msk.bf16.vlgmr.msra.gmra.mrb[8].mxu1 %vm324_vm1, %v3738_v48 }
 0x1b1   : > { %2868 = vmatprep.mubr.bf16.mxu1 %v3764_v10 }
 0x1b4   : > { %3366 = vmatmul.mubr.msk.bf16.vlgmr.msra.gmra.mrb[8].mxu0 %vm324_vm1, %v3738_v48 }
 0x1b5   : > { %2815 = vmatprep.mubr.bf16.mxu0 %v3764_v10 }
 0x1b8   : > { %3369 = vmatmul.mubr.msk.bf16.gmra.mrb[12].mxu1 %vm324_vm1, %v3739_v51 }
 0x1bc   : > { %3367 = vmatmul.mubr.msk.bf16.gmra.mrb[12].mxu0 %vm324_vm1, %v3739_v51 }
 0x273   : > { %v2754_v53 = vpop.f32.mrb[0].mxu1 }
 0x274   : > { %v2937_v55 = vadd.f32 %v4241_v52, %v2754_v53  ;;  %v2756_v56 = vpop.f32.mrb[1].mxu1 }
 0x275   : > { %v2938_v57 = vadd.f32 %v4241_v52, %v2756_v56  ;;  %v2758_v58 = vpop.f32.mrb[2].mxu1 }
 0x276   : > { %v2945_v59 = vadd.f32 %v4243_v54, %v2758_v58  ;;  %v2760_v60 = vpop.f32.mrb[3].mxu1 }
 0x277   : > { %v3399_v61 = vpack.c.bf16 %v2938_v57, %v2937_v55  ;;  %v2701_v62 = vpop.f32.mrb[0].mxu0  ;;  %v2946_v63 = vadd.f32 %v4243_v54, %v2760_v60 }
 0x278   : > { %v2935_v10 = vadd.f32 %v4241_v52, %v2701_v62  ;;  %v2703_v0 = vpop.f32.mrb[1].mxu0 }
 0x279   : > { %3064 = vst [vmem:[%s4231_s26 + $0x8] sm:$0xff] %v3399_v61  ;;  %v3403_v1 = vpack.c.bf16 %v2946_v63, %v2945_v59  ;;  %v2936_v2 = vadd.f32 %v4241_v52, %v2703_v0  ;;  %v2705_v3 = vpop.f32.mrb[2].mxu0 }
 0x27a   : > { %v2943_v5 = vadd.f32 %v4243_v54, %v2705_v3  ;;  %v2707_v6 = vpop.f32.mrb[3].mxu0 }
 0x27b   : > { %3068 = vst [vmem:[%s4231_s26 + $0x2c] sm:$0xff] %v3403_v1  ;;  %v3398_v7 = vpack.c.bf16 %v2936_v2, %v2935_v10  ;;  %v2944_v8 = vadd.f32 %v4243_v54, %v2707_v6  ;;  %v2764_v9 = vpop.f32.mrb[4].mxu1 }
 0x27c   : > { %v2953_v12 = vadd.f32 %v4252_v4, %v2764_v9  ;;  %v2766_v13 = vpop.f32.mrb[5].mxu1 }
 0x27d   : > { %3063 = vst [vmem:[%s4231_s26] sm:$0xff] %v3398_v7  ;;  %v3402_v14 = vpack.c.bf16 %v2944_v8, %v2943_v5  ;;  %v2954_v15 = vadd.f32 %v4252_v4, %v2766_v13  ;;  %v2768_v16 = vpop.f32.mrb[6].mxu1 }
 0x27e   : > { %v2961_v17 = vadd.f32 %v4257_v11, %v2768_v16  ;;  %v2770_v18 = vpop.f32.mrb[7].mxu1 }
 0x27f   : > { %3067 = vst [vmem:[%s4231_s26 + $0x24] sm:$0xff] %v3402_v14  ;;  %v3407_v19 = vpack.c.bf16 %v2954_v15, %v2953_v12  ;;  %v2711_v20 = vpop.f32.mrb[4].mxu0  ;;  %v2962_v21 = vadd.f32 %v4257_v11, %v2770_v18 }
 0x280   : > { %v2951_v22 = vadd.f32 %v4252_v4, %v2711_v20  ;;  %v2713_v23 = vpop.f32.mrb[5].mxu0  ;;  %v3109_v8 = vld [vmem:[%s4231_s26 + $0x8] sm:$0xff] (%p3823_p5) }
 0x281   : > { %3072 = vst [vmem:[%s4231_s26 + $0x50] sm:$0xff] %v3407_v19  ;;  %v3411_v24 = vpack.c.bf16 %v2962_v21, %v2961_v17  ;;  %v2952_v25 = vadd.f32 %v4252_v4, %v2713_v23  ;;  %v2715_v26 = vpop.f32.mrb[6].mxu0  ;;  %3110 = vst [vmem:[%s4310_s28 + $0x8] sm:$0xff] (%p3823_p5), %v3109_v8 }
 0x282   : > { %v2959_v27 = vadd.f32 %v4257_v11, %v2715_v26  ;;  %v2717_v28 = vpop.f32.mrb[7].mxu0  ;;  %v3117_v13 = vld [vmem:[%s4231_s26 + $0x2c] sm:$0xff] (%p3823_p5)  ;;  %v3391_v26 = vld [vmem:[%s4231_s26 + $0x68] sm:$0xf] (%p3823_p5) }
 0x283   : > { %3076 = vst [vmem:[%s4231_s26 + $0x74] sm:$0xff] %v3411_v24  ;;  %v3406_v29 = vpack.c.bf16 %v2952_v25, %v2951_v22  ;;  %v2960_v30 = vadd.f32 %v4257_v11, %v2717_v28  ;;  %v2860_v31 = vpop.f32.mrb[8].mxu1  ;;  %3118 = vst [vmem:[%s4310_s28 + $0x50] sm:$0xff] (%p3823_p5), %v3117_v13  ;;  %v3387_v24 = vld [vmem:[%s4231_s26 + $0x20] sm:$0xf] (%p3823_p5) }
 0x284   : > { %v2941_v32 = vadd.f32 %v4241_v52, %v2860_v31  ;;  %v2862_v33 = vpop.f32.mrb[9].mxu1  ;;  %v3389_v25 = vld [vmem:[%s4231_s26 + $0x44] sm:$0xf] (%p3823_p5)  ;;  %3388 = vst [vmem:[%s4310_s28 + $0x20] sm:$0xf] (%p3823_p5), %v3387_v24 }
 0x285   : > { %3071 = vst [vmem:[%s4231_s26 + $0x48] sm:$0xff] %v3406_v29  ;;  %v3410_v34 = vpack.c.bf16 %v2960_v30, %v2959_v27  ;;  %v2942_v35 = vadd.f32 %v4241_v52, %v2862_v33  ;;  %v2864_v36 = vpop.f32.mrb[10].mxu1  ;;  %3390 = vst [vmem:[%s4310_s28 + $0x68] sm:$0xf] (%p3823_p5), %v3389_v25  ;;  %v3393_v27 = vld [vmem:[%s4231_s26 + $0x8c] sm:$0xf] (%p3823_p5) }
 0x286   : > { %v2949_v37 = vadd.f32 %v4243_v54, %v2864_v36  ;;  %v2866_v38 = vpop.f32.mrb[11].mxu1  ;;  %v3115_v12 = vld [vmem:[%s4231_s26 + $0x24] sm:$0xff] (%p3823_p5)  ;;  %3392 = vst [vmem:[%s4310_s28 + $0xb0] sm:$0xf] (%p3823_p5), %v3391_v26  ;;  %3394 = vst [vmem:[%s4310_s28 + $0xf8] sm:$0xf] (%p3823_p5), %v3393_v27 }
 0x287   : > { %3075 = vst [vmem:[%s4231_s26 + $0x6c] sm:$0xff] %v3410_v34  ;;  %v3401_v39 = vpack.c.bf16 %v2942_v35, %v2941_v32  ;;  %v2807_v40 = vpop.f32.mrb[8].mxu0  ;;  %v2950_v41 = vadd.f32 %v4243_v54, %v2866_v38  ;;  %3116 = vst [vmem:[%s4310_s28 + $0x48] sm:$0xff] (%p3823_p5), %v3115_v12 }
 0x288   : > { %v2939_v42 = vadd.f32 %v4241_v52, %v2807_v40  ;;  %v2809_v43 = vpop.f32.mrb[9].mxu0  ;;  %v3125_v17 = vld [vmem:[%s4231_s26 + $0x50] sm:$0xff] (%p3823_p5) }
 0x289   : > { %3066 = vst [vmem:[%s4231_s26 + $0x18] sm:$0xff] %v3401_v39  ;;  %v3405_v44 = vpack.c.bf16 %v2950_v41, %v2949_v37  ;;  %v2940_v45 = vadd.f32 %v4241_v52, %v2809_v43  ;;  %v2811_v46 = vpop.f32.mrb[10].mxu0  ;;  %3126 = vst [vmem:[%s4310_s28 + $0x98] sm:$0xff] (%p3823_p5), %v3125_v17 }
 0x28a   : > { %v2947_v47 = vadd.f32 %v4243_v54, %v2811_v46  ;;  %v2813_v48 = vpop.f32.mrb[11].mxu0  ;;  %v3133_v21 = vld [vmem:[%s4231_s26 + $0x74] sm:$0xff] (%p3823_p5) }
 0x28b   : > { %3070 = vst [vmem:[%s4231_s26 + $0x3c] sm:$0xff] %v3405_v44  ;;  %v3400_v49 = vpack.c.bf16 %v2940_v45, %v2939_v42  ;;  %v2948_v50 = vadd.f32 %v4243_v54, %v2813_v48  ;;  %v2870_v51 = vpop.f32.mrb[12].mxu1  ;;  %3134 = vst [vmem:[%s4310_s28 + $0xe0] sm:$0xff] (%p3823_p5), %v3133_v21 }
 0x28c   : > { %v2957_v53 = vadd.f32 %v4252_v4, %v2870_v51  ;;  %v2872_v55 = vpop.f32.mrb[13].mxu1  ;;  %v3123_v16 = vld [vmem:[%s4231_s26 + $0x48] sm:$0xff] (%p3823_p5) }
 0x28d   : > { %3065 = vst [vmem:[%s4231_s26 + $0x10] sm:$0xff] %v3400_v49  ;;  %v3404_v56 = vpack.c.bf16 %v2948_v50, %v2947_v47  ;;  %v2958_v57 = vadd.f32 %v4252_v4, %v2872_v55  ;;  %v2874_v52 = vpop.f32.mrb[14].mxu1  ;;  %3124 = vst [vmem:[%s4310_s28 + $0x90] sm:$0xff] (%p3823_p5), %v3123_v16 }
 0x28e   : > { %v2965_v58 = vadd.f32 %v4257_v11, %v2874_v52  ;;  %v2876_v59 = vpop.f32.mrb[15].mxu1  ;;  %v3131_v20 = vld [vmem:[%s4231_s26 + $0x6c] sm:$0xff] (%p3823_p5) }
 0x28f   : > { %3069 = vst [vmem:[%s4231_s26 + $0x34] sm:$0xff] %v3404_v56  ;;  %v3409_v60 = vpack.c.bf16 %v2958_v57, %v2957_v53  ;;  %v2817_v61 = vpop.f32.mrb[12].mxu0  ;;  %v2966_v54 = vadd.f32 %v4257_v11, %v2876_v59  ;;  %3132 = vst [vmem:[%s4310_s28 + $0xd8] sm:$0xff] (%p3823_p5), %v3131_v20 }
 0x290   : > { %v2955_v62 = vadd.f32 %v4252_v4, %v2817_v61  ;;  %v2819_v63 = vpop.f32.mrb[13].mxu0 }
 0x291   : > { %3074 = vst [vmem:[%s4231_s26 + $0x60] sm:$0xff] %v3409_v60  ;;  %v3413_v10 = vpack.c.bf16 %v2966_v54, %v2965_v58  ;;  %v2956_v0 = vadd.f32 %v4252_v4, %v2819_v63  ;;  %v2821_v1 = vpop.f32.mrb[14].mxu0  ;;  %3089 = sbr.rel (!%p3823_p5) target bundleno = 672 (0x2a0), region = 62  ;;  %v3107_v4 = vld [vmem:[%s4231_s26] sm:$0xff] (%p3823_p5) }
 0x292   : > { %v2963_v2 = vadd.f32 %v4257_v11, %v2821_v1  ;;  %v2823_v3 = vpop.f32.mrb[15].mxu0  ;;  %v3121_v15 = vld [vmem:[%s4231_s26 + $0x3c] sm:$0xff] (%p3823_p5)  ;;  %3108 = vst [vmem:[%s4310_s28] sm:$0xff] (%p3823_p5), %v3107_v4 }
 0x293   : > { %3078 = vst [vmem:[%s4231_s26 + $0x84] sm:$0xff] %v3413_v10  ;;  %v3408_v5 = vpack.c.bf16 %v2956_v0, %v2955_v62  ;;  %v2964_v6 = vadd.f32 %v4257_v11, %v2823_v3  ;;  %v3113_v11 = vld [vmem:[%s4231_s26 + $0x18] sm:$0xff] (%p3823_p5)  ;;  %3122 = vst [vmem:[%s4310_s28 + $0x60] sm:$0xff] (%p3823_p5), %v3121_v15 }
 0x294   : > { %v3111_v9 = vld [vmem:[%s4231_s26 + $0x10] sm:$0xff] (%p3823_p5)  ;;  %3114 = vst [vmem:[%s4310_s28 + $0x18] sm:$0xff] (%p3823_p5), %v3113_v11 }
 0x295   : > { %3073 = vst [vmem:[%s4231_s26 + $0x58] sm:$0xff] %v3408_v5  ;;  %v3412_v7 = vpack.c.bf16 %v2964_v6, %v2963_v2  ;;  %3112 = vst [vmem:[%s4310_s28 + $0x10] sm:$0xff] (%p3823_p5), %v3111_v9 }
 0x296   : > { %v3119_v14 = vld [vmem:[%s4231_s26 + $0x34] sm:$0xff] (%p3823_p5) }
 0x297   : > { %3077 = vst [vmem:[%s4231_s26 + $0x7c] sm:$0xff] %v3412_v7  ;;  %3120 = vst [vmem:[%s4310_s28 + $0x58] sm:$0xff] (%p3823_p5), %v3119_v14 }
 0x298   : > { %v3129_v19 = vld [vmem:[%s4231_s26 + $0x60] sm:$0xff] }
 0x299   : > { %3130 = vst [vmem:[%s4310_s28 + $0xa8] sm:$0xff] %v3129_v19 }
 0x29a   : > { %v3137_v23 = vld [vmem:[%s4231_s26 + $0x84] sm:$0xff] }
 0x29b   : > { %3138 = vst [vmem:[%s4310_s28 + $0xf0] sm:$0xff] %v3137_v23 }
 0x29c   : > { %v3127_v18 = vld [vmem:[%s4231_s26 + $0x58] sm:$0xff] }
 0x29d   : > { %3128 = vst [vmem:[%s4310_s28 + $0xa0] sm:$0xff] %v3127_v18 }
 0x29e   : > { %v3135_v22 = vld [vmem:[%s4231_s26 + $0x7c] sm:$0xff] }
 0x29f   : > { %3136 = vst [vmem:[%s4310_s28 + $0xe8] sm:$0xff] %v3135_v22 }
 0x2a0 PF: > { %p10_p10 = scmp.ge.s32.totalorder %s3810_s16, 4   ;;  %s4361_s12 = smov %s3758_s13 }
 0x2a1   : > { %s4362_s13 = smov %s3821_s19  ;;  %s4363_s14 = smov %s3810_s16 }
 0x2a2   :  { %12 = sbr.rel (!%p10_p10) target bundleno = 2 (0x2), region = 139 }

// kernel: net1_forward.5
= control target key start
LH: loop header
LB: loop body
LE: loop exit
PB: predicated region body
PF: predicated region fallthrough
CT: control target
= control target key end

     0   :  { %vm5982_vm0 = vmmov 0   ;;  %s7327_s1 = inlined_call_operand.vmem [shape: bf16[6272,128], index: 1, kind: input, shape index: {}]   ;;  %s7328_s0 = inlined_call_operand.vmem [shape: bf16[8,6272], index: 0, kind: input, shape index: {}]   ;;  %s7329_s2 = inlined_call_operand.vmem [shape: f32[1,128], index: 2, kind: input, shape index: {}]   ;;  %s7330_s3 = inlined_call_operand.vmem [shape: bf16[128,128], index: 3, kind: input, shape index: {}]   ;;  %s7331_s4 = inlined_call_operand.vmem [shape: f32[1,128], index: 4, kind: input, shape index: {}]   ;;  %s7332_s5 = inlined_call_operand.vmem [shape: f32[8,128], index: 5, kind: output, shape index: {}]  }
   0x1   :  { %v5528_v0 = vld [vmem:[%s7327_s1 + $0x40] sm:$0xff]   ;;  %v5532_v4 = vld [vmem:[%s7327_s1 + $0x48] sm:$0xff]   ;;  %v5536_v8 = vld [vmem:[%s7327_s1 + $0x50] sm:$0xff]  }
   0x2   :  { %v5529_v1 = vld [vmem:[%s7327_s1] sm:$0xff]   ;;  %4940 = vmatprep.subr.bf16.mxu0 %v5528_v0  ;;  %v5533_v5 = vld [vmem:[%s7327_s1 + $0x8] sm:$0xff]   ;;  %v5537_v9 = vld [vmem:[%s7327_s1 + $0x10] sm:$0xff]  }
   0x3   :  { %v5530_v2 = vld [vmem:[%s7327_s1 + $0xc0] sm:$0xff]   ;;  %4941 = vmatpush3.bf16.msra.mxu0 %v5529_v1  ;;  %v5534_v6 = vld [vmem:[%s7327_s1 + $0xc8] sm:$0xff]   ;;  %v5538_v10 = vld [vmem:[%s7327_s1 + $0xd0] sm:$0xff]  }
   0x4   :  { %v5531_v3 = vld [vmem:[%s7327_s1 + $0x80] sm:$0xff]   ;;  %4962 = vmatprep.subr.bf16.mxu1 %v5530_v2  ;;  %4942 = vmatprep.subr.bf16.mxu0 %v5532_v4  ;;  %v5535_v7 = vld [vmem:[%s7327_s1 + $0x88] sm:$0xff]   ;;  %v5539_v11 = vld [vmem:[%s7327_s1 + $0x90] sm:$0xff]  }
   0x5   :  { %4963 = vmatpush3.bf16.msra.mxu1 %v5531_v3  ;;  %v5540_v12 = vld [vmem:[%s7327_s1 + $0x58] sm:$0xff]   ;;  %v5544_v16 = vld [vmem:[%s7327_s1 + $0x60] sm:$0xff]   ;;  %v5548_v20 = vld [vmem:[%s7327_s1 + $0x68] sm:$0xff]  }
   0x6   :  { %4964 = vmatprep.subr.bf16.mxu1 %v5534_v6  ;;  %v5541_v13 = vld [vmem:[%s7327_s1 + $0x18] sm:$0xff]   ;;  %v5545_v17 = vld [vmem:[%s7327_s1 + $0x20] sm:$0xff]   ;;  %v5549_v21 = vld [vmem:[%s7327_s1 + $0x28] sm:$0xff]  }
   0x7   :  { %4943 = vmatpush3.bf16.msra.mxu0 %v5533_v5  ;;  %v5542_v14 = vld [vmem:[%s7327_s1 + $0xd8] sm:$0xff]   ;;  %v5546_v18 = vld [vmem:[%s7327_s1 + $0xe0] sm:$0xff]   ;;  %v5550_v22 = vld [vmem:[%s7327_s1 + $0xe8] sm:$0xff]  }
   0x8   :  { %4944 = vmatprep.subr.bf16.mxu0 %v5536_v8  ;;  %v5543_v15 = vld [vmem:[%s7327_s1 + $0x98] sm:$0xff]   ;;  %v5547_v19 = vld [vmem:[%s7327_s1 + $0xa0] sm:$0xff]   ;;  %v5551_v23 = vld [vmem:[%s7327_s1 + $0xa8] sm:$0xff]  }
   0x9   :  { %4965 = vmatpush3.bf16.msra.mxu1 %v5535_v7  ;;  %v5552_v24 = vld [vmem:[%s7327_s1 + $0x70] sm:$0xff]   ;;  %v5556_v28 = vld [vmem:[%s7327_s1 + $0x78] sm:$0xff]   ;;  %v21_v31 = vld [vmem:[%s7328_s0] sm:$0xff] }
   0xa   :  { %4966 = vmatprep.subr.bf16.mxu1 %v5538_v10  ;;  %v5553_v25 = vld [vmem:[%s7327_s1 + $0x30] sm:$0xff]   ;;  %v5557_v29 = vld [vmem:[%s7327_s1 + $0x38] sm:$0xff]   ;;  %v4490_v32 = vcombine.low %v21_v31, %v21_v31  ;;  %v4491_v33 = vcombine.high %v21_v31, %v21_v31  ;;  %v5562_v35 = vld [vmem:[%s7327_s1 + $0x140] sm:$0xff]  }
   0xb   :  { %4945 = vmatpush3.bf16.msra.mxu0 %v5537_v9  ;;  %v5554_v26 = vld [vmem:[%s7327_s1 + $0xf0] sm:$0xff]   ;;  %v5558_v30 = vld [vmem:[%s7327_s1 + $0xf8] sm:$0xff]   ;;  %v22_v36 = vld [vmem:[%s7328_s0 + $0x8] sm:$0xff] }
   0xc   :  { %4946 = vmatprep.subr.bf16.mxu0 %v5540_v12  ;;  %v5555_v27 = vld [vmem:[%s7327_s1 + $0xb0] sm:$0xff]   ;;  %v5561_v34 = vld [vmem:[%s7327_s1 + $0xb8] sm:$0xff]   ;;  %3393 = vmatprep.mubr.bf16.mxu0 %v4491_v33  ;;  %v4492_v37 = vcombine.low %v22_v36, %v22_v36  ;;  %v4493_v38 = vcombine.high %v22_v36, %v22_v36  ;;  %v5565_v39 = vld [vmem:[%s7327_s1 + $0x100] sm:$0xff]  }
   0xd   :  { %4967 = vmatpush3.bf16.msra.mxu1 %v5539_v11  ;;  %v5566_v40 = vld [vmem:[%s7327_s1 + $0x1c0] sm:$0xff]   ;;  %v5568_v42 = vld [vmem:[%s7327_s1 + $0x148] sm:$0xff]   ;;  %v5572_v46 = vld [vmem:[%s7327_s1 + $0x150] sm:$0xff]  }
   0xe   :  { %4968 = vmatprep.subr.bf16.mxu1 %v5542_v14  ;;  %3433 = vmatprep.mubr.bf16.mxu1 %v4493_v38  ;;  %v5567_v41 = vld [vmem:[%s7327_s1 + $0x180] sm:$0xff]   ;;  %v5569_v43 = vld [vmem:[%s7327_s1 + $0x108] sm:$0xff]   ;;  %v5573_v47 = vld [vmem:[%s7327_s1 + $0x110] sm:$0xff]  }
   0xf   :  { %4947 = vmatpush3.bf16.msra.mxu0 %v5541_v13  ;;  %v5570_v44 = vld [vmem:[%s7327_s1 + $0x1c8] sm:$0xff]   ;;  %v5574_v48 = vld [vmem:[%s7327_s1 + $0x1d0] sm:$0xff]   ;;  %v5576_v50 = vld [vmem:[%s7327_s1 + $0x158] sm:$0xff]  }
  0x10   :  { %4948 = vmatprep.subr.bf16.mxu0 %v5544_v16  ;;  %v5571_v45 = vld [vmem:[%s7327_s1 + $0x188] sm:$0xff]   ;;  %v5575_v49 = vld [vmem:[%s7327_s1 + $0x190] sm:$0xff]   ;;  %v5577_v51 = vld [vmem:[%s7327_s1 + $0x118] sm:$0xff]  }
  0x11   :  { %4969 = vmatpush3.bf16.msra.mxu1 %v5543_v15  ;;  %v5578_v52 = vld [vmem:[%s7327_s1 + $0x1d8] sm:$0xff]   ;;  %v5580_v54 = vld [vmem:[%s7327_s1 + $0x160] sm:$0xff]   ;;  %v5584_v58 = vld [vmem:[%s7327_s1 + $0x168] sm:$0xff]  }
  0x12   :  { %4970 = vmatprep.subr.bf16.mxu1 %v5546_v18  ;;  %v5579_v53 = vld [vmem:[%s7327_s1 + $0x198] sm:$0xff]   ;;  %v5581_v55 = vld [vmem:[%s7327_s1 + $0x120] sm:$0xff]   ;;  %v5585_v59 = vld [vmem:[%s7327_s1 + $0x128] sm:$0xff]  }
  0x13   :  { %4949 = vmatpush3.bf16.msra.mxu0 %v5545_v17  ;;  %v5582_v56 = vld [vmem:[%s7327_s1 + $0x1e0] sm:$0xff]   ;;  %v5586_v60 = vld [vmem:[%s7327_s1 + $0x1e8] sm:$0xff]   ;;  %v5588_v62 = vld [vmem:[%s7327_s1 + $0x170] sm:$0xff]  }
  0x14   :  { %4950 = vmatprep.subr.bf16.mxu0 %v5548_v20  ;;  %v5583_v57 = vld [vmem:[%s7327_s1 + $0x1a0] sm:$0xff]   ;;  %v5587_v61 = vld [vmem:[%s7327_s1 + $0x1a8] sm:$0xff]   ;;  %v5589_v63 = vld [vmem:[%s7327_s1 + $0x130] sm:$0xff]  }
  0x15   :  { %4971 = vmatpush3.bf16.msra.mxu1 %v5547_v19  ;;  %v5590_v0 = vld [vmem:[%s7327_s1 + $0x1f0] sm:$0xff]   ;;  %v5592_v2 = vld [vmem:[%s7327_s1 + $0x178] sm:$0xff]   ;;  %v5598_v9 = vld [vmem:[%s7327_s1 + $0x240] sm:$0xff]  }
  0x16   :  { %4972 = vmatprep.subr.bf16.mxu1 %v5550_v22  ;;  %v5591_v1 = vld [vmem:[%s7327_s1 + $0x1b0] sm:$0xff]   ;;  %v5593_v3 = vld [vmem:[%s7327_s1 + $0x138] sm:$0xff]   ;;  %v5601_v13 = vld [vmem:[%s7327_s1 + $0x200] sm:$0xff]  }
  0x17   :  { %4951 = vmatpush3.bf16.msra.mxu0 %v5549_v21  ;;  %v5594_v4 = vld [vmem:[%s7327_s1 + $0x1f8] sm:$0xff]   ;;  %v23_v5 = vld [vmem:[%s7328_s0 + $0x10] sm:$0xff]  ;;  %v5602_v14 = vld [vmem:[%s7327_s1 + $0x2c0] sm:$0xff]  }
  0x18   :  { %4952 = vmatprep.subr.bf16.mxu0 %v5552_v24  ;;  %v4494_v6 = vcombine.low %v23_v5, %v23_v5  ;;  %v4495_v7 = vcombine.high %v23_v5, %v23_v5  ;;  %v5597_v8 = vld [vmem:[%s7327_s1 + $0x1b8] sm:$0xff]   ;;  %v5603_v15 = vld [vmem:[%s7327_s1 + $0x280] sm:$0xff]   ;;  %v5604_v16 = vld [vmem:[%s7327_s1 + $0x248] sm:$0xff]  }
  0x19   :  { %4973 = vmatpush3.bf16.msra.mxu1 %v5551_v23  ;;  %v24_v10 = vld [vmem:[%s7328_s0 + $0x18] sm:$0xff]  ;;  %v5605_v17 = vld [vmem:[%s7327_s1 + $0x208] sm:$0xff]   ;;  %v5608_v20 = vld [vmem:[%s7327_s1 + $0x250] sm:$0xff]  }
  0x1a   :  { %4974 = vmatprep.subr.bf16.mxu1 %v5554_v26  ;;  %v4496_v11 = vcombine.low %v24_v10, %v24_v10  ;;  %v4497_v12 = vcombine.high %v24_v10, %v24_v10  ;;  %v5606_v18 = vld [vmem:[%s7327_s1 + $0x2c8] sm:$0xff]   ;;  %v5609_v21 = vld [vmem:[%s7327_s1 + $0x210] sm:$0xff]   ;;  %v5612_v24 = vld [vmem:[%s7327_s1 + $0x258] sm:$0xff]  }
  0x1b   :  { %4953 = vmatpush3.bf16.msra.mxu0 %v5553_v25  ;;  %v5607_v19 = vld [vmem:[%s7327_s1 + $0x288] sm:$0xff]   ;;  %v5610_v22 = vld [vmem:[%s7327_s1 + $0x2d0] sm:$0xff]   ;;  %v5613_v25 = vld [vmem:[%s7327_s1 + $0x218] sm:$0xff]  }
  0x1c   :  { %4954 = vmatprep.subr.bf16.mxu0 %v5556_v28  ;;  %v5611_v23 = vld [vmem:[%s7327_s1 + $0x290] sm:$0xff]   ;;  %v5614_v26 = vld [vmem:[%s7327_s1 + $0x2d8] sm:$0xff]   ;;  %v5616_v28 = vld [vmem:[%s7327_s1 + $0x260] sm:$0xff]  }
  0x1d   :  { %4975 = vmatpush3.bf16.msra.mxu1 %v5555_v27  ;;  %v5615_v27 = vld [vmem:[%s7327_s1 + $0x298] sm:$0xff]   ;;  %v5619_v31 = vld [vmem:[%s7327_s1 + $0x2a0] sm:$0xff]   ;;  %v5621_v33 = vld [vmem:[%s7327_s1 + $0x228] sm:$0xff]  }
  0x1e   :  { %4976 = vmatprep.subr.bf16.mxu1 %v5558_v30  ;;  %v5618_v30 = vld [vmem:[%s7327_s1 + $0x2e0] sm:$0xff]   ;;  %v5624_v36 = vld [vmem:[%s7327_s1 + $0x270] sm:$0xff]  }
  0x1f   :  { %4955 = vmatpush3.bf16.msra.mxu0 %v5557_v29  ;;  %v5617_v29 = vld [vmem:[%s7327_s1 + $0x220] sm:$0xff]   ;;  %v5626_v38 = vld [vmem:[%s7327_s1 + $0x2f0] sm:$0xff]  }
  0x20   :  { %4984 = vmatprep.subr.bf16.mxu0 %v5562_v35  ;;  %v5623_v35 = vld [vmem:[%s7327_s1 + $0x2a8] sm:$0xff]   ;;  %v5655_v5 = vld [vmem:[%s7327_s1 + $0x3a0] sm:$0xff]   ;;  %v5660_v10 = vld [vmem:[%s7327_s1 + $0x370] sm:$0xff]  }
  0x21   :  { %4977 = vmatpush3.bf16.msra.mxu1 %v5561_v34  ;;  %v5622_v34 = vld [vmem:[%s7327_s1 + $0x2e8] sm:$0xff]  }
  0x22   :  { %3394 = vmatmul.mubr.bf16.vlgmr.msra.gmra.mrb[0].mxu0 %v4490_v32  ;;  %5006 = vmatprep.subr.bf16.mxu1 %v5566_v40  ;;  %v5620_v32 = vld [vmem:[%s7327_s1 + $0x268] sm:$0xff]   ;;  %v5628_v40 = vld [vmem:[%s7327_s1 + $0x278] sm:$0xff]  }
  0x23   :  { %4985 = vmatpush3.bf16.msra.mxu0 %v5565_v39  ;;  %3473 = vmatprep.mubr.bf16.mxu0 %v4495_v7  ;;  %v5627_v39 = vld [vmem:[%s7327_s1 + $0x2b0] sm:$0xff]   ;;  %v5657_v7 = vld [vmem:[%s7327_s1 + $0x328] sm:$0xff]  }
  0x24   :  { %3434 = vmatmul.mubr.bf16.vlgmr.msra.gmra.mrb[0].mxu1 %v4492_v37  ;;  %4986 = vmatprep.subr.bf16.mxu0 %v5568_v42  ;;  %v5625_v37 = vld [vmem:[%s7327_s1 + $0x230] sm:$0xff]   ;;  %v5630_v42 = vld [vmem:[%s7327_s1 + $0x2f8] sm:$0xff]  }
  0x25   :  { %5007 = vmatpush3.bf16.msra.mxu1 %v5567_v41  ;;  %3513 = vmatprep.mubr.bf16.mxu1 %v4497_v12  ;;  %v5629_v41 = vld [vmem:[%s7327_s1 + $0x238] sm:$0xff]   ;;  %v5662_v12 = vld [vmem:[%s7327_s1 + $0x3f0] sm:$0xff]  }
  0x26   :  { %5008 = vmatprep.subr.bf16.mxu1 %v5570_v44 }
  0x27   :  { %4987 = vmatpush3.bf16.msra.mxu0 %v5569_v43  ;;  %v25_v43 = vld [vmem:[%s7328_s0 + $0x20] sm:$0xff] }
  0x28   :  { %4988 = vmatprep.subr.bf16.mxu0 %v5572_v46  ;;  %v4498_v44 = vcombine.low %v25_v43, %v25_v43  ;;  %v5633_v46 = vld [vmem:[%s7327_s1 + $0x2b8] sm:$0xff]  }
  0x29   :  { %5009 = vmatpush3.bf16.msra.mxu1 %v5571_v45  ;;  %v4499_v45 = vcombine.high %v25_v43, %v25_v43  ;;  %v5691_v43 = vld [vmem:[%s7327_s1 + $0x4a0] sm:$0xff]  }
  0x2a   :  { %5010 = vmatprep.subr.bf16.mxu1 %v5574_v48  ;;  %v26_v48 = vld [vmem:[%s7328_s0 + $0x28] sm:$0xff] }
  0x2b   :  { %4989 = vmatpush3.bf16.msra.mxu0 %v5573_v47  ;;  %v5634_v47 = vld [vmem:[%s7327_s1 + $0x340] sm:$0xff]  }
  0x2c   :  { %4990 = vmatprep.subr.bf16.mxu0 %v5576_v50  ;;  %v4501_v50 = vcombine.high %v26_v48, %v26_v48 }
  0x2d   :  { %5011 = vmatpush3.bf16.msra.mxu1 %v5575_v49  ;;  %v4500_v49 = vcombine.low %v26_v48, %v26_v48  ;;  %v5696_v48 = vld [vmem:[%s7327_s1 + $0x470] sm:$0xff]  }
  0x2e   :  { %5012 = vmatprep.subr.bf16.mxu1 %v5578_v52  ;;  %v5638_v52 = vld [vmem:[%s7327_s1 + $0x3c0] sm:$0xff]  }
  0x2f   :  { %4991 = vmatpush3.bf16.msra.mxu0 %v5577_v51  ;;  %v5637_v51 = vld [vmem:[%s7327_s1 + $0x300] sm:$0xff]  }
  0x30   :  { %4992 = vmatprep.subr.bf16.mxu0 %v5580_v54  ;;  %v5640_v54 = vld [vmem:[%s7327_s1 + $0x348] sm:$0xff]  }
  0x31   :  { %5013 = vmatpush3.bf16.msra.mxu1 %v5579_v53  ;;  %v5639_v53 = vld [vmem:[%s7327_s1 + $0x380] sm:$0xff]  }
  0x32   :  { %5014 = vmatprep.subr.bf16.mxu1 %v5582_v56  ;;  %v5642_v56 = vld [vmem:[%s7327_s1 + $0x3c8] sm:$0xff]  }
  0x33   :  { %4993 = vmatpush3.bf16.msra.mxu0 %v5581_v55  ;;  %v5641_v55 = vld [vmem:[%s7327_s1 + $0x308] sm:$0xff]  }
  0x34   :  { %4994 = vmatprep.subr.bf16.mxu0 %v5584_v58  ;;  %v5644_v58 = vld [vmem:[%s7327_s1 + $0x350] sm:$0xff]  }
  0x35   :  { %5015 = vmatpush3.bf16.msra.mxu1 %v5583_v57  ;;  %v5643_v57 = vld [vmem:[%s7327_s1 + $0x388] sm:$0xff]  }
  0x36   :  { %5016 = vmatprep.subr.bf16.mxu1 %v5586_v60  ;;  %v5646_v60 = vld [vmem:[%s7327_s1 + $0x3d0] sm:$0xff]  }
  0x37   :  { %4995 = vmatpush3.bf16.msra.mxu0 %v5585_v59  ;;  %v5645_v59 = vld [vmem:[%s7327_s1 + $0x310] sm:$0xff]  }
  0x38   :  { %4996 = vmatprep.subr.bf16.mxu0 %v5588_v62  ;;  %v5648_v62 = vld [vmem:[%s7327_s1 + $0x358] sm:$0xff]  }
  0x39   :  { %5017 = vmatpush3.bf16.msra.mxu1 %v5587_v61  ;;  %v5647_v61 = vld [vmem:[%s7327_s1 + $0x390] sm:$0xff]  }
  0x3a   :  { %5018 = vmatprep.subr.bf16.mxu1 %v5590_v0  ;;  %v5650_v0 = vld [vmem:[%s7327_s1 + $0x3d8] sm:$0xff]  }
  0x3b   :  { %4997 = vmatpush3.bf16.msra.mxu0 %v5589_v63  ;;  %v5649_v63 = vld [vmem:[%s7327_s1 + $0x318] sm:$0xff]  }
  0x3c   :  { %4998 = vmatprep.subr.bf16.mxu0 %v5592_v2  ;;  %v5652_v2 = vld [vmem:[%s7327_s1 + $0x360] sm:$0xff]  }
  0x3d   :  { %5019 = vmatpush3.bf16.msra.mxu1 %v5591_v1  ;;  %v5651_v1 = vld [vmem:[%s7327_s1 + $0x398] sm:$0xff]  }
  0x3e   :  { %5020 = vmatprep.subr.bf16.mxu1 %v5594_v4  ;;  %v5654_v4 = vld [vmem:[%s7327_s1 + $0x3e0] sm:$0xff]  }
  0x3f   :  { %4999 = vmatpush3.bf16.msra.mxu0 %v5593_v3  ;;  %v5653_v3 = vld [vmem:[%s7327_s1 + $0x320] sm:$0xff]  }
  0x40   :  { %5028 = vmatprep.subr.bf16.mxu0 %v5598_v9  ;;  %v5659_v9 = vld [vmem:[%s7327_s1 + $0x3a8] sm:$0xff]  }
  0x41   :  { %5021 = vmatpush3.bf16.msra.mxu1 %v5597_v8  ;;  %v5658_v8 = vld [vmem:[%s7327_s1 + $0x3e8] sm:$0xff]  }
  0x42   :  { %3474 = vmatmul.mubr.bf16.vlgmr.msra.gmra.mrb[4].mxu0 %v4494_v6  ;;  %5050 = vmatprep.subr.bf16.mxu1 %v5602_v14  ;;  %v5656_v6 = vld [vmem:[%s7327_s1 + $0x368] sm:$0xff]   ;;  %v5664_v14 = vld [vmem:[%s7327_s1 + $0x378] sm:$0xff]  }
  0x43   :  { %5029 = vmatpush3.bf16.msra.mxu0 %v5601_v13  ;;  %3553 = vmatprep.mubr.bf16.mxu0 %v4499_v45  ;;  %v5663_v13 = vld [vmem:[%s7327_s1 + $0x3b0] sm:$0xff]   ;;  %v5693_v45 = vld [vmem:[%s7327_s1 + $0x428] sm:$0xff]  }
  0x44   :  { %3514 = vmatmul.mubr.bf16.vlgmr.msra.gmra.mrb[4].mxu1 %v4496_v11  ;;  %5030 = vmatprep.subr.bf16.mxu0 %v5604_v16  ;;  %v5661_v11 = vld [vmem:[%s7327_s1 + $0x330] sm:$0xff]   ;;  %v5666_v16 = vld [vmem:[%s7327_s1 + $0x3f8] sm:$0xff]  }
  0x45   :  { %5051 = vmatpush3.bf16.msra.mxu1 %v5603_v15  ;;  %3593 = vmatprep.mubr.bf16.mxu1 %v4501_v50  ;;  %v5665_v15 = vld [vmem:[%s7327_s1 + $0x338] sm:$0xff]   ;;  %v5698_v50 = vld [vmem:[%s7327_s1 + $0x4f0] sm:$0xff]  }
  0x46   :  { %5052 = vmatprep.subr.bf16.mxu1 %v5606_v18 }
  0x47   :  { %5031 = vmatpush3.bf16.msra.mxu0 %v5605_v17  ;;  %v27_v17 = vld [vmem:[%s7328_s0 + $0x30] sm:$0xff] }
  0x48   :  { %5032 = vmatprep.subr.bf16.mxu0 %v5608_v20  ;;  %v4502_v18 = vcombine.low %v27_v17, %v27_v17  ;;  %v5669_v20 = vld [vmem:[%s7327_s1 + $0x3b8] sm:$0xff]  }
  0x49   :  { %5053 = vmatpush3.bf16.msra.mxu1 %v5607_v19  ;;  %v4503_v19 = vcombine.high %v27_v17, %v27_v17  ;;  %v5727_v17 = vld [vmem:[%s7327_s1 + $0x5a0] sm:$0xff]  }
  0x4a   :  { %5054 = vmatprep.subr.bf16.mxu1 %v5610_v22  ;;  %v28_v22 = vld [vmem:[%s7328_s0 + $0x38] sm:$0xff] }
  0x4b   :  { %5033 = vmatpush3.bf16.msra.mxu0 %v5609_v21  ;;  %v5670_v21 = vld [vmem:[%s7327_s1 + $0x440] sm:$0xff]  }
  0x4c   :  { %5034 = vmatprep.subr.bf16.mxu0 %v5612_v24  ;;  %v4505_v24 = vcombine.high %v28_v22, %v28_v22 }
  0x4d   :  { %5055 = vmatpush3.bf16.msra.mxu1 %v5611_v23  ;;  %v4504_v23 = vcombine.low %v28_v22, %v28_v22  ;;  %v5732_v22 = vld [vmem:[%s7327_s1 + $0x570] sm:$0xff]  }
  0x4e   :  { %5056 = vmatprep.subr.bf16.mxu1 %v5614_v26  ;;  %v5674_v26 = vld [vmem:[%s7327_s1 + $0x4c0] sm:$0xff]  }
  0x4f   :  { %5035 = vmatpush3.bf16.msra.mxu0 %v5613_v25  ;;  %v5673_v25 = vld [vmem:[%s7327_s1 + $0x400] sm:$0xff]  }
  0x50   :  { %5036 = vmatprep.subr.bf16.mxu0 %v5616_v28  ;;  %v5676_v28 = vld [vmem:[%s7327_s1 + $0x448] sm:$0xff]  }
  0x51   :  { %5057 = vmatpush3.bf16.msra.mxu1 %v5615_v27  ;;  %v5675_v27 = vld [vmem:[%s7327_s1 + $0x480] sm:$0xff]  }
  0x52   :  { %5058 = vmatprep.subr.bf16.mxu1 %v5618_v30  ;;  %v5678_v30 = vld [vmem:[%s7327_s1 + $0x4c8] sm:$0xff]  }
  0x53   :  { %5037 = vmatpush3.bf16.msra.mxu0 %v5617_v29  ;;  %v5677_v29 = vld [vmem:[%s7327_s1 + $0x408] sm:$0xff]  }
  0x54   :  { %5038 = vmatprep.subr.bf16.mxu0 %v5620_v32  ;;  %v5680_v32 = vld [vmem:[%s7327_s1 + $0x450] sm:$0xff]  }
  0x55   :  { %5059 = vmatpush3.bf16.msra.mxu1 %v5619_v31  ;;  %v5679_v31 = vld [vmem:[%s7327_s1 + $0x488] sm:$0xff]  }
  0x56   :  { %5060 = vmatprep.subr.bf16.mxu1 %v5622_v34  ;;  %v5682_v34 = vld [vmem:[%s7327_s1 + $0x4d0] sm:$0xff]  }
  0x57   :  { %5039 = vmatpush3.bf16.msra.mxu0 %v5621_v33  ;;  %v5681_v33 = vld [vmem:[%s7327_s1 + $0x410] sm:$0xff]  }
  0x58   :  { %5040 = vmatprep.subr.bf16.mxu0 %v5624_v36  ;;  %v5684_v36 = vld [vmem:[%s7327_s1 + $0x458] sm:$0xff]  }
  0x59   :  { %5061 = vmatpush3.bf16.msra.mxu1 %v5623_v35  ;;  %v5683_v35 = vld [vmem:[%s7327_s1 + $0x490] sm:$0xff]  }
  0x5a   :  { %5062 = vmatprep.subr.bf16.mxu1 %v5626_v38  ;;  %v5686_v38 = vld [vmem:[%s7327_s1 + $0x4d8] sm:$0xff]  }
  0x5b   :  { %5041 = vmatpush3.bf16.msra.mxu0 %v5625_v37  ;;  %v5685_v37 = vld [vmem:[%s7327_s1 + $0x418] sm:$0xff]  }
  0x5c   :  { %5042 = vmatprep.subr.bf16.mxu0 %v5628_v40  ;;  %v5688_v40 = vld [vmem:[%s7327_s1 + $0x460] sm:$0xff]  }
  0x5d   :  { %5063 = vmatpush3.bf16.msra.mxu1 %v5627_v39  ;;  %v5687_v39 = vld [vmem:[%s7327_s1 + $0x498] sm:$0xff]  }
  0x5e   :  { %5064 = vmatprep.subr.bf16.mxu1 %v5630_v42  ;;  %v5690_v42 = vld [vmem:[%s7327_s1 + $0x4e0] sm:$0xff]  }
  0x5f   :  { %5043 = vmatpush3.bf16.msra.mxu0 %v5629_v41  ;;  %v5689_v41 = vld [vmem:[%s7327_s1 + $0x420] sm:$0xff]  }
  0x60   :  { %5072 = vmatprep.subr.bf16.mxu0 %v5634_v47  ;;  %v5695_v47 = vld [vmem:[%s7327_s1 + $0x4a8] sm:$0xff]  }
  0x61   :  { %5065 = vmatpush3.bf16.msra.mxu1 %v5633_v46  ;;  %v5694_v46 = vld [vmem:[%s7327_s1 + $0x4e8] sm:$0xff]  }
  0x62   :  { %3554 = vmatmul.mubr.bf16.vlgmr.msra.gmra.mrb[8].mxu0 %v4498_v44  ;;  %5094 = vmatprep.subr.bf16.mxu1 %v5638_v52  ;;  %v5692_v44 = vld [vmem:[%s7327_s1 + $0x468] sm:$0xff]   ;;  %v5700_v52 = vld [vmem:[%s7327_s1 + $0x478] sm:$0xff]  }
  0x63   :  { %5073 = vmatpush3.bf16.msra.mxu0 %v5637_v51  ;;  %3633 = vmatprep.mubr.bf16.mxu0 %v4503_v19  ;;  %v5699_v51 = vld [vmem:[%s7327_s1 + $0x4b0] sm:$0xff]   ;;  %v5729_v19 = vld [vmem:[%s7327_s1 + $0x528] sm:$0xff]  }
  0x64   :  { %3594 = vmatmul.mubr.bf16.vlgmr.msra.gmra.mrb[8].mxu1 %v4500_v49  ;;  %5074 = vmatprep.subr.bf16.mxu0 %v5640_v54  ;;  %v5697_v49 = vld [vmem:[%s7327_s1 + $0x430] sm:$0xff]   ;;  %v5702_v54 = vld [vmem:[%s7327_s1 + $0x4f8] sm:$0xff]  }
  0x65   :  { %5095 = vmatpush3.bf16.msra.mxu1 %v5639_v53  ;;  %3673 = vmatprep.mubr.bf16.mxu1 %v4505_v24  ;;  %v5701_v53 = vld [vmem:[%s7327_s1 + $0x438] sm:$0xff]   ;;  %v5734_v24 = vld [vmem:[%s7327_s1 + $0x5f0] sm:$0xff]  }
  0x66   :  { %5096 = vmatprep.subr.bf16.mxu1 %v5642_v56 }
  0x67   :  { %5075 = vmatpush3.bf16.msra.mxu0 %v5641_v55  ;;  %v29_v55 = vld [vmem:[%s7328_s0 + $0x40] sm:$0xff] }
  0x68   :  { %5076 = vmatprep.subr.bf16.mxu0 %v5644_v58  ;;  %v4506_v56 = vcombine.low %v29_v55, %v29_v55  ;;  %v5705_v58 = vld [vmem:[%s7327_s1 + $0x4b8] sm:$0xff]  }
  0x69   :  { %5097 = vmatpush3.bf16.msra.mxu1 %v5643_v57  ;;  %v4507_v57 = vcombine.high %v29_v55, %v29_v55  ;;  %v5763_v55 = vld [vmem:[%s7327_s1 + $0x6a0] sm:$0xff]  }
  0x6a   :  { %5098 = vmatprep.subr.bf16.mxu1 %v5646_v60  ;;  %v30_v60 = vld [vmem:[%s7328_s0 + $0x48] sm:$0xff] }
  0x6b   :  { %5077 = vmatpush3.bf16.msra.mxu0 %v5645_v59  ;;  %v5706_v59 = vld [vmem:[%s7327_s1 + $0x540] sm:$0xff]  }
  0x6c   :  { %5078 = vmatprep.subr.bf16.mxu0 %v5648_v62  ;;  %v4509_v62 = vcombine.high %v30_v60, %v30_v60 }
  0x6d   :  { %5099 = vmatpush3.bf16.msra.mxu1 %v5647_v61  ;;  %v4508_v61 = vcombine.low %v30_v60, %v30_v60  ;;  %v5768_v60 = vld [vmem:[%s7327_s1 + $0x670] sm:$0xff]  }
  0x6e   :  { %5100 = vmatprep.subr.bf16.mxu1 %v5650_v0  ;;  %v5710_v0 = vld [vmem:[%s7327_s1 + $0x5c0] sm:$0xff]  }
  0x6f   :  { %5079 = vmatpush3.bf16.msra.mxu0 %v5649_v63  ;;  %v5709_v63 = vld [vmem:[%s7327_s1 + $0x500] sm:$0xff]  }
  0x70   :  { %5080 = vmatprep.subr.bf16.mxu0 %v5652_v2  ;;  %v5712_v2 = vld [vmem:[%s7327_s1 + $0x548] sm:$0xff]  }
  0x71   :  { %5101 = vmatpush3.bf16.msra.mxu1 %v5651_v1  ;;  %v5711_v1 = vld [vmem:[%s7327_s1 + $0x580] sm:$0xff]  }
  0x72   :  { %5102 = vmatprep.subr.bf16.mxu1 %v5654_v4  ;;  %v5714_v4 = vld [vmem:[%s7327_s1 + $0x5c8] sm:$0xff]  }
  0x73   :  { %5081 = vmatpush3.bf16.msra.mxu0 %v5653_v3  ;;  %v5713_v3 = vld [vmem:[%s7327_s1 + $0x508] sm:$0xff]  }
  0x74   :  { %5082 = vmatprep.subr.bf16.mxu0 %v5656_v6  ;;  %v5716_v6 = vld [vmem:[%s7327_s1 + $0x550] sm:$0xff]  }
  0x75   :  { %5103 = vmatpush3.bf16.msra.mxu1 %v5655_v5  ;;  %v5715_v5 = vld [vmem:[%s7327_s1 + $0x588] sm:$0xff]  }
  0x76   :  { %5104 = vmatprep.subr.bf16.mxu1 %v5658_v8  ;;  %v5718_v8 = vld [vmem:[%s7327_s1 + $0x5d0] sm:$0xff]  }
  0x77   :  { %5083 = vmatpush3.bf16.msra.mxu0 %v5657_v7  ;;  %v5717_v7 = vld [vmem:[%s7327_s1 + $0x510] sm:$0xff]  }
  0x78   :  { %5084 = vmatprep.subr.bf16.mxu0 %v5660_v10  ;;  %v5720_v10 = vld [vmem:[%s7327_s1 + $0x558] sm:$0xff]  }
  0x79   :  { %5105 = vmatpush3.bf16.msra.mxu1 %v5659_v9  ;;  %v5719_v9 = vld [vmem:[%s7327_s1 + $0x590] sm:$0xff]  }
  0x7a   :  { %5106 = vmatprep.subr.bf16.mxu1 %v5662_v12  ;;  %v5722_v12 = vld [vmem:[%s7327_s1 + $0x5d8] sm:$0xff]  }
  0x7b   :  { %5085 = vmatpush3.bf16.msra.mxu0 %v5661_v11  ;;  %v5721_v11 = vld [vmem:[%s7327_s1 + $0x518] sm:$0xff]  }
  0x7c   :  { %5086 = vmatprep.subr.bf16.mxu0 %v5664_v14  ;;  %v5724_v14 = vld [vmem:[%s7327_s1 + $0x560] sm:$0xff]  }
  0x7d   :  { %5107 = vmatpush3.bf16.msra.mxu1 %v5663_v13  ;;  %v5723_v13 = vld [vmem:[%s7327_s1 + $0x598] sm:$0xff]  }
  0x7e   :  { %5108 = vmatprep.subr.bf16.mxu1 %v5666_v16  ;;  %v5726_v16 = vld [vmem:[%s7327_s1 + $0x5e0] sm:$0xff]  }
  0x7f   :  { %5087 = vmatpush3.bf16.msra.mxu0 %v5665_v15  ;;  %v5725_v15 = vld [vmem:[%s7327_s1 + $0x520] sm:$0xff]  }
  0x80   :  { %5116 = vmatprep.subr.bf16.mxu0 %v5670_v21  ;;  %v5731_v21 = vld [vmem:[%s7327_s1 + $0x5a8] sm:$0xff]  }
  0x81   :  { %5109 = vmatpush3.bf16.msra.mxu1 %v5669_v20  ;;  %v5730_v20 = vld [vmem:[%s7327_s1 + $0x5e8] sm:$0xff]  }
  0x82   :  { %3634 = vmatmul.mubr.bf16.vlgmr.msra.gmra.mrb[12].mxu0 %v4502_v18  ;;  %5138 = vmatprep.subr.bf16.mxu1 %v5674_v26  ;;  %v5728_v18 = vld [vmem:[%s7327_s1 + $0x568] sm:$0xff]   ;;  %v5736_v26 = vld [vmem:[%s7327_s1 + $0x578] sm:$0xff]  }
  0x83   :  { %5117 = vmatpush3.bf16.msra.mxu0 %v5673_v25  ;;  %3713 = vmatprep.mubr.bf16.mxu0 %v4507_v57  ;;  %v5735_v25 = vld [vmem:[%s7327_s1 + $0x5b0] sm:$0xff]   ;;  %v5765_v57 = vld [vmem:[%s7327_s1 + $0x628] sm:$0xff]  }
  0x84   :  { %3674 = vmatmul.mubr.bf16.vlgmr.msra.gmra.mrb[12].mxu1 %v4504_v23  ;;  %5118 = vmatprep.subr.bf16.mxu0 %v5676_v28  ;;  %v5733_v23 = vld [vmem:[%s7327_s1 + $0x530] sm:$0xff]   ;;  %v5738_v28 = vld [vmem:[%s7327_s1 + $0x5f8] sm:$0xff]  }
  0x85   :  { %5139 = vmatpush3.bf16.msra.mxu1 %v5675_v27  ;;  %3753 = vmatprep.mubr.bf16.mxu1 %v4509_v62  ;;  %v5737_v27 = vld [vmem:[%s7327_s1 + $0x538] sm:$0xff]   ;;  %v5770_v62 = vld [vmem:[%s7327_s1 + $0x6f0] sm:$0xff]  }
  0x86   :  { %5140 = vmatprep.subr.bf16.mxu1 %v5678_v30 }
  0x87   :  { %5119 = vmatpush3.bf16.msra.mxu0 %v5677_v29  ;;  %v31_v29 = vld [vmem:[%s7328_s0 + $0x50] sm:$0xff] }
  0x88   :  { %5120 = vmatprep.subr.bf16.mxu0 %v5680_v32  ;;  %v4510_v30 = vcombine.low %v31_v29, %v31_v29  ;;  %v5741_v32 = vld [vmem:[%s7327_s1 + $0x5b8] sm:$0xff]  }
  0x89   :  { %5141 = vmatpush3.bf16.msra.mxu1 %v5679_v31  ;;  %v4511_v31 = vcombine.high %v31_v29, %v31_v29  ;;  %v5798_v29 = vld [vmem:[%s7327_s1 + $0x7e0] sm:$0xff]  }
  0x8a   :  { %5142 = vmatprep.subr.bf16.mxu1 %v5682_v34  ;;  %v32_v34 = vld [vmem:[%s7328_s0 + $0x58] sm:$0xff] }
  0x8b   :  { %5121 = vmatpush3.bf16.msra.mxu0 %v5681_v33  ;;  %v5742_v33 = vld [vmem:[%s7327_s1 + $0x640] sm:$0xff]  }
  0x8c   :  { %5122 = vmatprep.subr.bf16.mxu0 %v5684_v36  ;;  %v4513_v36 = vcombine.high %v32_v34, %v32_v34 }
  0x8d   :  { %5143 = vmatpush3.bf16.msra.mxu1 %v5683_v35  ;;  %v4512_v35 = vcombine.low %v32_v34, %v32_v34 }
  0x8e   :  { %5144 = vmatprep.subr.bf16.mxu1 %v5686_v38  ;;  %v5746_v38 = vld [vmem:[%s7327_s1 + $0x6c0] sm:$0xff]  }
  0x8f   :  { %5123 = vmatpush3.bf16.msra.mxu0 %v5685_v37  ;;  %v5745_v37 = vld [vmem:[%s7327_s1 + $0x600] sm:$0xff]  }
  0x90   :  { %5124 = vmatprep.subr.bf16.mxu0 %v5688_v40  ;;  %v5748_v40 = vld [vmem:[%s7327_s1 + $0x648] sm:$0xff]  }
  0x91   :  { %5145 = vmatpush3.bf16.msra.mxu1 %v5687_v39  ;;  %v5747_v39 = vld [vmem:[%s7327_s1 + $0x680] sm:$0xff]  }
  0x92   :  { %5146 = vmatprep.subr.bf16.mxu1 %v5690_v42  ;;  %v5750_v42 = vld [vmem:[%s7327_s1 + $0x6c8] sm:$0xff]  }
  0x93   :  { %5125 = vmatpush3.bf16.msra.mxu0 %v5689_v41  ;;  %v5749_v41 = vld [vmem:[%s7327_s1 + $0x608] sm:$0xff]  }
  0x94   :  { %5126 = vmatprep.subr.bf16.mxu0 %v5692_v44  ;;  %v5752_v44 = vld [vmem:[%s7327_s1 + $0x650] sm:$0xff]  }
  0x95   :  { %5147 = vmatpush3.bf16.msra.mxu1 %v5691_v43  ;;  %v5751_v43 = vld [vmem:[%s7327_s1 + $0x688] sm:$0xff]  }
  0x96   :  { %5148 = vmatprep.subr.bf16.mxu1 %v5694_v46  ;;  %v5754_v46 = vld [vmem:[%s7327_s1 + $0x6d0] sm:$0xff]  }
  0x97   :  { %5127 = vmatpush3.bf16.msra.mxu0 %v5693_v45  ;;  %v5753_v45 = vld [vmem:[%s7327_s1 + $0x610] sm:$0xff]  }
  0x98   :  { %5128 = vmatprep.subr.bf16.mxu0 %v5696_v48  ;;  %v5756_v48 = vld [vmem:[%s7327_s1 + $0x658] sm:$0xff]  }
  0x99   :  { %5149 = vmatpush3.bf16.msra.mxu1 %v5695_v47  ;;  %v5755_v47 = vld [vmem:[%s7327_s1 + $0x690] sm:$0xff]  }
  0x9a   :  { %5150 = vmatprep.subr.bf16.mxu1 %v5698_v50  ;;  %v5758_v50 = vld [vmem:[%s7327_s1 + $0x6d8] sm:$0xff]  }
  0x9b   :  { %5129 = vmatpush3.bf16.msra.mxu0 %v5697_v49  ;;  %v5757_v49 = vld [vmem:[%s7327_s1 + $0x618] sm:$0xff]  }
  0x9c   :  { %5130 = vmatprep.subr.bf16.mxu0 %v5700_v52  ;;  %v5760_v52 = vld [vmem:[%s7327_s1 + $0x660] sm:$0xff]  }
  0x9d   :  { %5151 = vmatpush3.bf16.msra.mxu1 %v5699_v51  ;;  %v5759_v51 = vld [vmem:[%s7327_s1 + $0x698] sm:$0xff]  }
  0x9e   :  { %5152 = vmatprep.subr.bf16.mxu1 %v5702_v54  ;;  %v5762_v54 = vld [vmem:[%s7327_s1 + $0x6e0] sm:$0xff]  }
  0x9f   :  { %5131 = vmatpush3.bf16.msra.mxu0 %v5701_v53  ;;  %v5761_v53 = vld [vmem:[%s7327_s1 + $0x620] sm:$0xff]  }
  0xa0   :  { %5160 = vmatprep.subr.bf16.mxu0 %v5706_v59  ;;  %v5767_v59 = vld [vmem:[%s7327_s1 + $0x6a8] sm:$0xff]  }
  0xa1   :  { %5153 = vmatpush3.bf16.msra.mxu1 %v5705_v58  ;;  %v5766_v58 = vld [vmem:[%s7327_s1 + $0x6e8] sm:$0xff]  }
  0xa2   :  { %3714 = vmatmul.mubr.bf16.vlgmr.msra.gmra.mrb[16].mxu0 %v4506_v56  ;;  %5182 = vmatprep.subr.bf16.mxu1 %v5710_v0  ;;  %v5764_v56 = vld [vmem:[%s7327_s1 + $0x668] sm:$0xff]   ;;  %v5772_v0 = vld [vmem:[%s7327_s1 + $0x678] sm:$0xff]  }
  0xa3   :  { %5161 = vmatpush3.bf16.msra.mxu0 %v5709_v63  ;;  %3793 = vmatprep.mubr.bf16.mxu0 %v4511_v31  ;;  %v5771_v63 = vld [vmem:[%s7327_s1 + $0x6b0] sm:$0xff]   ;;  %v5799_v31 = vld [vmem:[%s7327_s1 + $0x7a0] sm:$0xff]  }
  0xa4   :  { %3754 = vmatmul.mubr.bf16.vlgmr.msra.gmra.mrb[16].mxu1 %v4508_v61  ;;  %5162 = vmatprep.subr.bf16.mxu0 %v5712_v2  ;;  %v5769_v61 = vld [vmem:[%s7327_s1 + $0x630] sm:$0xff]   ;;  %v5774_v2 = vld [vmem:[%s7327_s1 + $0x6f8] sm:$0xff]  }
  0xa5   :  { %5183 = vmatpush3.bf16.msra.mxu1 %v5711_v1  ;;  %3833 = vmatprep.mubr.bf16.mxu1 %v4513_v36  ;;  %v5773_v1 = vld [vmem:[%s7327_s1 + $0x638] sm:$0xff]  }
  0xa6   :  { %5184 = vmatprep.subr.bf16.mxu1 %v5714_v4 }
  0xa7   :  { %5163 = vmatpush3.bf16.msra.mxu0 %v5713_v3  ;;  %v33_v3 = vld [vmem:[%s7328_s0 + $0x60] sm:$0xff] }
  0xa8   :  { %5164 = vmatprep.subr.bf16.mxu0 %v5716_v6  ;;  %v4514_v4 = vcombine.low %v33_v3, %v33_v3  ;;  %v5777_v6 = vld [vmem:[%s7327_s1 + $0x6b8] sm:$0xff]  }
  0xa9   :  { %5185 = vmatpush3.bf16.msra.mxu1 %v5715_v5  ;;  %v4515_v5 = vcombine.high %v33_v3, %v33_v3  ;;  %v5822_v3 = vld [vmem:[%s7327_s1 + $0x8c8] sm:$0xff]  }
  0xaa   :  { %5186 = vmatprep.subr.bf16.mxu1 %v5718_v8  ;;  %v34_v8 = vld [vmem:[%s7328_s0 + $0x68] sm:$0xff] }
  0xab   :  { %5165 = vmatpush3.bf16.msra.mxu0 %v5717_v7  ;;  %v5778_v7 = vld [vmem:[%s7327_s1 + $0x740] sm:$0xff]  }
  0xac   :  { %5166 = vmatprep.subr.bf16.mxu0 %v5720_v10  ;;  %v4517_v10 = vcombine.high %v34_v8, %v34_v8 }
  0xad   :  { %5187 = vmatpush3.bf16.msra.mxu1 %v5719_v9  ;;  %v4516_v9 = vcombine.low %v34_v8, %v34_v8  ;;  %v5827_v8 = vld [vmem:[%s7327_s1 + $0x890] sm:$0xff]  }
  0xae   :  { %5188 = vmatprep.subr.bf16.mxu1 %v5722_v12  ;;  %v5782_v12 = vld [vmem:[%s7327_s1 + $0x7c0] sm:$0xff]  }
  0xaf   :  { %5167 = vmatpush3.bf16.msra.mxu0 %v5721_v11  ;;  %v5781_v11 = vld [vmem:[%s7327_s1 + $0x700] sm:$0xff]  }
  0xb0   :  { %5168 = vmatprep.subr.bf16.mxu0 %v5724_v14  ;;  %v5784_v14 = vld [vmem:[%s7327_s1 + $0x748] sm:$0xff]  }
  0xb1   :  { %5189 = vmatpush3.bf16.msra.mxu1 %v5723_v13  ;;  %v5783_v13 = vld [vmem:[%s7327_s1 + $0x780] sm:$0xff]  }
  0xb2   :  { %5190 = vmatprep.subr.bf16.mxu1 %v5726_v16  ;;  %v5786_v16 = vld [vmem:[%s7327_s1 + $0x7c8] sm:$0xff]  }
  0xb3   :  { %5169 = vmatpush3.bf16.msra.mxu0 %v5725_v15  ;;  %v5785_v15 = vld [vmem:[%s7327_s1 + $0x708] sm:$0xff]  }
  0xb4   :  { %5170 = vmatprep.subr.bf16.mxu0 %v5728_v18  ;;  %v5788_v18 = vld [vmem:[%s7327_s1 + $0x750] sm:$0xff]  }
  0xb5   :  { %5191 = vmatpush3.bf16.msra.mxu1 %v5727_v17  ;;  %v5787_v17 = vld [vmem:[%s7327_s1 + $0x788] sm:$0xff]  }
  0xb6   :  { %5192 = vmatprep.subr.bf16.mxu1 %v5730_v20  ;;  %v5790_v20 = vld [vmem:[%s7327_s1 + $0x7d0] sm:$0xff]  }
  0xb7   :  { %5171 = vmatpush3.bf16.msra.mxu0 %v5729_v19  ;;  %v5789_v19 = vld [vmem:[%s7327_s1 + $0x710] sm:$0xff]  }
  0xb8   :  { %5172 = vmatprep.subr.bf16.mxu0 %v5732_v22  ;;  %v5792_v22 = vld [vmem:[%s7327_s1 + $0x758] sm:$0xff]  }
  0xb9   :  { %5193 = vmatpush3.bf16.msra.mxu1 %v5731_v21  ;;  %v5791_v21 = vld [vmem:[%s7327_s1 + $0x790] sm:$0xff]  }
  0xba   :  { %5194 = vmatprep.subr.bf16.mxu1 %v5734_v24  ;;  %v5794_v24 = vld [vmem:[%s7327_s1 + $0x7d8] sm:$0xff]  }
  0xbb   :  { %5173 = vmatpush3.bf16.msra.mxu0 %v5733_v23  ;;  %v5793_v23 = vld [vmem:[%s7327_s1 + $0x718] sm:$0xff]  }
  0xbc   :  { %5174 = vmatprep.subr.bf16.mxu0 %v5736_v26  ;;  %v5796_v26 = vld [vmem:[%s7327_s1 + $0x760] sm:$0xff]  }
  0xbd   :  { %5195 = vmatpush3.bf16.msra.mxu1 %v5735_v25  ;;  %v5795_v25 = vld [vmem:[%s7327_s1 + $0x798] sm:$0xff]  }
  0xbe   :  { %5196 = vmatprep.subr.bf16.mxu1 %v5738_v28 }
  0xbf   :  { %5175 = vmatpush3.bf16.msra.mxu0 %v5737_v27  ;;  %v5797_v27 = vld [vmem:[%s7327_s1 + $0x720] sm:$0xff]  }
  0xc0   :  { %5204 = vmatprep.subr.bf16.mxu0 %v5742_v33 }
  0xc1   :  { %5197 = vmatpush3.bf16.msra.mxu1 %v5741_v32  ;;  %v4489_v32 = vld [vmem:[%s7329_s2] ss:$0 sm:$0xff] }
  0xc2   :  { %3794 = vmatmul.mubr.bf16.vlgmr.msra.gmra.mrb[20].mxu0 %v4510_v30  ;;  %5226 = vmatprep.subr.bf16.mxu1 %v5746_v38  ;;  %v5801_v38 = vld [vmem:[%s7327_s1 + $0x728] sm:$0xff]  }
  0xc3   :  { %5205 = vmatpush3.bf16.msra.mxu0 %v5745_v37  ;;  %3873 = vmatprep.mubr.bf16.mxu0 %v4515_v5  ;;  %v5824_v5 = vld [vmem:[%s7327_s1 + $0x850] sm:$0xff]  }
  0xc4   :  { %3834 = vmatmul.mubr.bf16.vlgmr.msra.gmra.mrb[20].mxu1 %v4512_v35  ;;  %5206 = vmatprep.subr.bf16.mxu0 %v5748_v40  ;;  %v5800_v35 = vld [vmem:[%s7327_s1 + $0x768] sm:$0xff]  }
  0xc5   :  { %5227 = vmatpush3.bf16.msra.mxu1 %v5747_v39  ;;  %3913 = vmatprep.mubr.bf16.mxu1 %v4517_v10  ;;  %v5829_v10 = vld [vmem:[%s7327_s1 + $0x818] sm:$0xff]  }
  0xc6   :  { %5228 = vmatprep.subr.bf16.mxu1 %v5750_v42 }
  0xc7   :  { %5207 = vmatpush3.bf16.msra.mxu0 %v5749_v41  ;;  %v5802_v41 = vld [vmem:[%s7327_s1 + $0x7e8] sm:$0xff]  }
  0xc8   :  { %5208 = vmatprep.subr.bf16.mxu0 %v5752_v44 }
  0xc9   :  { %5229 = vmatpush3.bf16.msra.mxu1 %v5751_v43  ;;  %v5803_v43 = vld [vmem:[%s7327_s1 + $0x7a8] sm:$0xff]  }
  0xca   :  { %5230 = vmatprep.subr.bf16.mxu1 %v5754_v46 }
  0xcb   :  { %5209 = vmatpush3.bf16.msra.mxu0 %v5753_v45  ;;  %v5804_v45 = vld [vmem:[%s7327_s1 + $0x770] sm:$0xff]  }
  0xcc   :  { %5210 = vmatprep.subr.bf16.mxu0 %v5756_v48  ;;  %v5805_v48 = vld [vmem:[%s7327_s1 + $0x730] sm:$0xff]  }
  0xcd   :  { %5231 = vmatpush3.bf16.msra.mxu1 %v5755_v47 }
  0xce   :  { %5232 = vmatprep.subr.bf16.mxu1 %v5758_v50  ;;  %v5807_v50 = vld [vmem:[%s7327_s1 + $0x7b0] sm:$0xff]  }
  0xcf   :  { %5211 = vmatpush3.bf16.msra.mxu0 %v5757_v49  ;;  %v5806_v49 = vld [vmem:[%s7327_s1 + $0x7f0] sm:$0xff]  }
  0xd0   :  { %5212 = vmatprep.subr.bf16.mxu0 %v5760_v52  ;;  %v5809_v52 = vld [vmem:[%s7327_s1 + $0x738] sm:$0xff]  }
  0xd1   :  { %5233 = vmatpush3.bf16.msra.mxu1 %v5759_v51  ;;  %v5808_v51 = vld [vmem:[%s7327_s1 + $0x778] sm:$0xff]  }
  0xd2   :  { %5234 = vmatprep.subr.bf16.mxu1 %v5762_v54  ;;  %v35_v54 = vld [vmem:[%s7328_s0 + $0x70] sm:$0xff] }
  0xd3   :  { %5213 = vmatpush3.bf16.msra.mxu0 %v5761_v53  ;;  %v5810_v53 = vld [vmem:[%s7327_s1 + $0x7f8] sm:$0xff]  }
  0xd4   :  { %5214 = vmatprep.subr.bf16.mxu0 %v5764_v56  ;;  %v4519_v56 = vcombine.high %v35_v54, %v35_v54 }
  0xd5   :  { %5235 = vmatpush3.bf16.msra.mxu1 %v5763_v55  ;;  %v4518_v55 = vcombine.low %v35_v54, %v35_v54  ;;  %v5859_v54 = vld [vmem:[%s7327_s1 + $0x988] sm:$0xff]  }
  0xd6   :  { %5236 = vmatprep.subr.bf16.mxu1 %v5766_v58  ;;  %v5814_v58 = vld [vmem:[%s7327_s1 + $0x840] sm:$0xff]  }
  0xd7   :  { %5215 = vmatpush3.bf16.msra.mxu0 %v5765_v57  ;;  %v5813_v57 = vld [vmem:[%s7327_s1 + $0x7b8] sm:$0xff]  }
  0xd8   :  { %5216 = vmatprep.subr.bf16.mxu0 %v5768_v60 }
  0xd9   :  { %5237 = vmatpush3.bf16.msra.mxu1 %v5767_v59  ;;  %v36_v59 = vld [vmem:[%s7328_s0 + $0x78] sm:$0xff] }
  0xda   :  { %5238 = vmatprep.subr.bf16.mxu1 %v5770_v62  ;;  %v4520_v60 = vcombine.low %v36_v59, %v36_v59  ;;  %v5817_v62 = vld [vmem:[%s7327_s1 + $0x800] sm:$0xff]  }
  0xdb   :  { %5217 = vmatpush3.bf16.msra.mxu0 %v5769_v61  ;;  %v4521_v61 = vcombine.high %v36_v59, %v36_v59  ;;  %v5864_v59 = vld [vmem:[%s7327_s1 + $0x958] sm:$0xff]  }
  0xdc   :  { %5218 = vmatprep.subr.bf16.mxu0 %v5772_v0  ;;  %v5819_v0 = vld [vmem:[%s7327_s1 + $0x880] sm:$0xff]  }
  0xdd   :  { %5239 = vmatpush3.bf16.msra.mxu1 %v5771_v63  ;;  %v5818_v63 = vld [vmem:[%s7327_s1 + $0x8c0] sm:$0xff]  }
  0xde   :  { %5240 = vmatprep.subr.bf16.mxu1 %v5774_v2  ;;  %v5821_v2 = vld [vmem:[%s7327_s1 + $0x808] sm:$0xff]  }
  0xdf   :  { %5219 = vmatpush3.bf16.msra.mxu0 %v5773_v1  ;;  %v5820_v1 = vld [vmem:[%s7327_s1 + $0x848] sm:$0xff]  }
  0xe0   :  { %5248 = vmatprep.subr.bf16.mxu0 %v5778_v7  ;;  %v5826_v7 = vld [vmem:[%s7327_s1 + $0x8d0] sm:$0xff]  }
  0xe1   :  { %5241 = vmatpush3.bf16.msra.mxu1 %v5777_v6  ;;  %v5825_v6 = vld [vmem:[%s7327_s1 + $0x810] sm:$0xff]  }
  0xe2   :  { %3874 = vmatmul.mubr.bf16.vlgmr.msra.gmra.mrb[24].mxu0 %v4514_v4  ;;  %5270 = vmatprep.subr.bf16.mxu1 %v5782_v12  ;;  %v5823_v4 = vld [vmem:[%s7327_s1 + $0x888] sm:$0xff]   ;;  %v5831_v12 = vld [vmem:[%s7327_s1 + $0x898] sm:$0xff]  }
  0xe3   :  { %5249 = vmatpush3.bf16.msra.mxu0 %v5781_v11  ;;  %3953 = vmatprep.mubr.bf16.mxu0 %v4519_v56  ;;  %v5830_v11 = vld [vmem:[%s7327_s1 + $0x8d8] sm:$0xff]   ;;  %v5861_v56 = vld [vmem:[%s7327_s1 + $0x910] sm:$0xff]  }
  0xe4   :  { %3914 = vmatmul.mubr.bf16.vlgmr.msra.gmra.mrb[24].mxu1 %v4516_v9  ;;  %5250 = vmatprep.subr.bf16.mxu0 %v5784_v14  ;;  %v5828_v9 = vld [vmem:[%s7327_s1 + $0x858] sm:$0xff]  }
  0xe5   :  { %5271 = vmatpush3.bf16.msra.mxu1 %v5783_v13  ;;  %3993 = vmatprep.mubr.bf16.mxu1 %v4521_v61  ;;  %v5832_v13 = vld [vmem:[%s7327_s1 + $0x860] sm:$0xff]   ;;  %v5866_v61 = vld [vmem:[%s7327_s1 + $0x9d8] sm:$0xff]  }
  0xe6   :  { %5272 = vmatprep.subr.bf16.mxu1 %v5786_v16 }
  0xe7   :  { %5251 = vmatpush3.bf16.msra.mxu0 %v5785_v15  ;;  %v5833_v15 = vld [vmem:[%s7327_s1 + $0x820] sm:$0xff]  }
  0xe8   :  { %5252 = vmatprep.subr.bf16.mxu0 %v5788_v18 }
  0xe9   :  { %5273 = vmatpush3.bf16.msra.mxu1 %v5787_v17  ;;  %v5834_v17 = vld [vmem:[%s7327_s1 + $0x8e0] sm:$0xff]  }
  0xea   :  { %5274 = vmatprep.subr.bf16.mxu1 %v5790_v20  ;;  %v5835_v20 = vld [vmem:[%s7327_s1 + $0x8a0] sm:$0xff]  }
  0xeb   :  { %5253 = vmatpush3.bf16.msra.mxu0 %v5789_v19 }
  0xec   :  { %5254 = vmatprep.subr.bf16.mxu0 %v5792_v22 }
  0xed   :  { %5275 = vmatpush3.bf16.msra.mxu1 %v5791_v21 }
  0xee   :  { %5276 = vmatprep.subr.bf16.mxu1 %v5794_v24 }
  0xef   :  { %5255 = vmatpush3.bf16.msra.mxu0 %v5793_v23  ;;  %v5836_v23 = vld [vmem:[%s7327_s1 + $0x868] sm:$0xff]  }
  0xf0   :  { %5256 = vmatprep.subr.bf16.mxu0 %v5796_v26 }
  0xf1   :  { %5277 = vmatpush3.bf16.msra.mxu1 %v5795_v25  ;;  %v5837_v25 = vld [vmem:[%s7327_s1 + $0x828] sm:$0xff]  }
  0xf2   :  { %5278 = vmatprep.subr.bf16.mxu1 %v5798_v29 }
  0xf3   :  { %5257 = vmatpush3.bf16.msra.mxu0 %v5797_v27 }
  0xf4   :  { %5258 = vmatprep.subr.bf16.mxu0 %v5800_v35  ;;  %v5842_v35 = vld [vmem:[%s7327_s1 + $0x8f0] sm:$0xff]  }
  0xf5   :  { %v4956_v28 = vpop.f32.mrb[0].mxu0  ;;  %5279 = vmatpush3.bf16.msra.mxu1 %v5799_v31 }
  0xf6   :  { %v4957_v30 = vpop.f32.mrb[1].mxu0  ;;  %5280 = vmatprep.subr.bf16.mxu1 %v5802_v41 }
  0xf7   :  { %v4958_v33 = vadd.f32 %v4957_v30, %v4956_v28  ;;  %v4959_v34 = vpop.f32.mrb[2].mxu0  ;;  %v4978_v36 = vpop.f32.mrb[0].mxu1  ;;  %5259 = vmatpush3.bf16.msra.mxu0 %v5801_v38  ;;  %v5838_v28 = vld [vmem:[%s7327_s1 + $0x8e8] sm:$0xff]   ;;  %v5845_v38 = vld [vmem:[%s7327_s1 + $0x838] sm:$0xff]  }
  0xf8   :  { %v4960_v39 = vpop.f32.mrb[3].mxu0  ;;  %v4979_v40 = vpop.f32.mrb[1].mxu1  ;;  %5260 = vmatprep.subr.bf16.mxu0 %v5804_v45  ;;  %v5839_v30 = vld [vmem:[%s7327_s1 + $0x8a8] sm:$0xff]   ;;  %v5841_v34 = vld [vmem:[%s7327_s1 + $0x830] sm:$0xff]  }
  0xf9   :  { %v3396_v37 = vadd.f32 %v4958_v33, %v4489_v32  ;;  %v4980_v42 = vadd.f32 %v4979_v40, %v4978_v36  ;;  %v4981_v44 = vpop.f32.mrb[2].mxu1  ;;  %5281 = vmatpush3.bf16.msra.mxu1 %v5803_v43  ;;  %v5840_v33 = vld [vmem:[%s7327_s1 + $0x870] sm:$0xff]   ;;  %v5846_v39 = vld [vmem:[%s7327_s1 + $0x8f8] sm:$0xff]   ;;  %v37_v40 = vld [vmem:[%s7328_s0 + $0x80] sm:$0xff] }
  0xfa   :  { %v4982_v46 = vpop.f32.mrb[3].mxu1  ;;  %5282 = vmatprep.subr.bf16.mxu1 %v5806_v49  ;;  %v5843_v36 = vld [vmem:[%s7327_s1 + $0x8b0] sm:$0xff]   ;;  %v4522_v41 = vcombine.low %v37_v40, %v37_v40  ;;  %v5849_v43 = vld [vmem:[%s7327_s1 + $0x8b8] sm:$0xff]   ;;  %v5850_v44 = vld [vmem:[%s7327_s1 + $0x940] sm:$0xff]  }
  0xfb   :  { %v6805_v47 = vadd.f32 %v4980_v42, %v3396_v37  ;;  %5261 = vmatpush3.bf16.msra.mxu0 %v5805_v48  ;;  %v5844_v37 = vld [vmem:[%s7327_s1 + $0x878] sm:$0xff]   ;;  %v4523_v42 = vcombine.high %v37_v40, %v37_v40  ;;  %v38_v45 = vld [vmem:[%s7328_s0 + $0x88] sm:$0xff]  ;;  %v5853_v48 = vld [vmem:[%s7327_s1 + $0x900] sm:$0xff]  }
  0xfc   :  { %5262 = vmatprep.subr.bf16.mxu0 %v5808_v51  ;;  %v4524_v46 = vcombine.low %v38_v45, %v38_v45  ;;  %v5854_v49 = vld [vmem:[%s7327_s1 + $0x9c0] sm:$0xff]   ;;  %v5856_v51 = vld [vmem:[%s7327_s1 + $0x948] sm:$0xff]  }
  0xfd   :  { %5283 = vmatpush3.bf16.msra.mxu1 %v5807_v50  ;;  %v5855_v50 = vld [vmem:[%s7327_s1 + $0x980] sm:$0xff]   ;;  %v5895_v40 = vld [vmem:[%s7327_s1 + $0xa88] sm:$0xff]  }
  0xfe   :  { %5284 = vmatprep.subr.bf16.mxu1 %v5810_v53  ;;  %v5858_v53 = vld [vmem:[%s7327_s1 + $0x9c8] sm:$0xff]  }
  0xff   :  { %5263 = vmatpush3.bf16.msra.mxu0 %v5809_v52  ;;  %v5857_v52 = vld [vmem:[%s7327_s1 + $0x908] sm:$0xff]  }
 0x100   :  { %5292 = vmatprep.subr.bf16.mxu0 %v5814_v58  ;;  %v5863_v58 = vld [vmem:[%s7327_s1 + $0x990] sm:$0xff]  }
 0x101   :  { %5285 = vmatpush3.bf16.msra.mxu1 %v5813_v57  ;;  %v5862_v57 = vld [vmem:[%s7327_s1 + $0x9d0] sm:$0xff]  }
 0x102   :  { %3954 = vmatmul.mubr.bf16.vlgmr.msra.gmra.mrb[28].mxu0 %v4518_v55  ;;  %5314 = vmatprep.subr.bf16.mxu1 %v5818_v63  ;;  %v5860_v55 = vld [vmem:[%s7327_s1 + $0x950] sm:$0xff]   ;;  %v5868_v63 = vld [vmem:[%s7327_s1 + $0x960] sm:$0xff]  }
 0x103   :  { %5293 = vmatpush3.bf16.msra.mxu0 %v5817_v62  ;;  %4033 = vmatprep.mubr.bf16.mxu0 %v4523_v42  ;;  %v5867_v62 = vld [vmem:[%s7327_s1 + $0x998] sm:$0xff]   ;;  %v5897_v42 = vld [vmem:[%s7327_s1 + $0xa10] sm:$0xff]  }
 0x104   :  { %3994 = vmatmul.mubr.bf16.vlgmr.msra.gmra.mrb[28].mxu1 %v4520_v60  ;;  %5294 = vmatprep.subr.bf16.mxu0 %v5820_v1  ;;  %v5865_v60 = vld [vmem:[%s7327_s1 + $0x918] sm:$0xff]   ;;  %v5869_v1 = vld [vmem:[%s7327_s1 + $0x920] sm:$0xff]  }
 0x105   :  { %5315 = vmatpush3.bf16.msra.mxu1 %v5819_v0 }
 0x106   :  { %5316 = vmatprep.subr.bf16.mxu1 %v5822_v3  ;;  %v5870_v3 = vld [vmem:[%s7327_s1 + $0x9e0] sm:$0xff]  }
 0x107   :  { %5295 = vmatpush3.bf16.msra.mxu0 %v5821_v2 }
 0x108   :  { %5296 = vmatprep.subr.bf16.mxu0 %v5824_v5 }
 0x109   :  { %5317 = vmatpush3.bf16.msra.mxu1 %v5823_v4 }
 0x10a   :  { %5318 = vmatprep.subr.bf16.mxu1 %v5826_v7 }
 0x10b   :  { %5297 = vmatpush3.bf16.msra.mxu0 %v5825_v6  ;;  %v5871_v6 = vld [vmem:[%s7327_s1 + $0x9a0] sm:$0xff]  }
 0x10c   :  { %5298 = vmatprep.subr.bf16.mxu0 %v5828_v9  ;;  %v5872_v9 = vld [vmem:[%s7327_s1 + $0x968] sm:$0xff]  }
 0x10d   :  { %5319 = vmatpush3.bf16.msra.mxu1 %v5827_v8 }
 0x10e   :  { %5320 = vmatprep.subr.bf16.mxu1 %v5830_v11  ;;  %v5873_v11 = vld [vmem:[%s7327_s1 + $0x928] sm:$0xff]  }
 0x10f   :  { %5299 = vmatpush3.bf16.msra.mxu0 %v5829_v10 }
 0x110   :  { %5300 = vmatprep.subr.bf16.mxu0 %v5832_v13 }
 0x111   :  { %5321 = vmatpush3.bf16.msra.mxu1 %v5831_v12 }
 0x112   :  { %5322 = vmatprep.subr.bf16.mxu1 %v5834_v17 }
 0x113   :  { %5301 = vmatpush3.bf16.msra.mxu0 %v5833_v15 }
 0x114   :  { %5302 = vmatprep.subr.bf16.mxu0 %v5836_v23  ;;  %v5880_v23 = vld [vmem:[%s7327_s1 + $0x978] sm:$0xff]  }
 0x115   :  { %v5000_v14 = vpop.f32.mrb[4].mxu0  ;;  %5323 = vmatpush3.bf16.msra.mxu1 %v5835_v20  ;;  %v5877_v20 = vld [vmem:[%s7327_s1 + $0x930] sm:$0xff]  }
 0x116   :  { %v5001_v16 = vpop.f32.mrb[5].mxu0  ;;  %5324 = vmatprep.subr.bf16.mxu1 %v5838_v28 }
 0x117   :  { %v5002_v18 = vadd.f32 %v5001_v16, %v5000_v14  ;;  %v5003_v19 = vpop.f32.mrb[6].mxu0  ;;  %v5022_v21 = vpop.f32.mrb[4].mxu1  ;;  %5303 = vmatpush3.bf16.msra.mxu0 %v5837_v25  ;;  %v5874_v14 = vld [vmem:[%s7327_s1 + $0x9e8] sm:$0xff]   ;;  %v5882_v25 = vld [vmem:[%s7327_s1 + $0x9f8] sm:$0xff]  }
 0x118   :  { %v5004_v24 = vpop.f32.mrb[7].mxu0  ;;  %v5023_v26 = vpop.f32.mrb[5].mxu1  ;;  %5304 = vmatprep.subr.bf16.mxu0 %v5840_v33  ;;  %v5875_v16 = vld [vmem:[%s7327_s1 + $0x9a8] sm:$0xff]   ;;  %v5876_v19 = vld [vmem:[%s7327_s1 + $0x970] sm:$0xff]  }
 0x119   :  { %v3476_v22 = vadd.f32 %v5002_v18, %v6805_v47  ;;  %v5024_v27 = vadd.f32 %v5023_v26, %v5022_v21  ;;  %v5025_v29 = vpop.f32.mrb[6].mxu1  ;;  %5325 = vmatpush3.bf16.msra.mxu1 %v5839_v30  ;;  %v4525_v47 = vcombine.high %v38_v45, %v38_v45  ;;  %v5878_v21 = vld [vmem:[%s7327_s1 + $0x9f0] sm:$0xff]   ;;  %v5881_v24 = vld [vmem:[%s7327_s1 + $0x938] sm:$0xff]   ;;  %v5886_v30 = vld [vmem:[%s7327_s1 + $0xa40] sm:$0xff]  }
 0x11a   :  { %v5026_v31 = vpop.f32.mrb[7].mxu1  ;;  %5326 = vmatprep.subr.bf16.mxu1 %v5842_v35  ;;  %v39_v26 = vld [vmem:[%s7328_s0 + $0x90] sm:$0xff]  ;;  %v5885_v29 = vld [vmem:[%s7327_s1 + $0x9b8] sm:$0xff]   ;;  %v5890_v35 = vld [vmem:[%s7327_s1 + $0xac0] sm:$0xff]  }
 0x11b   :  { %v6907_v32 = vadd.f32 %v5024_v27, %v3476_v22  ;;  %5305 = vmatpush3.bf16.msra.mxu0 %v5841_v34  ;;  %4073 = vmatprep.mubr.bf16.mxu1 %v4525_v47  ;;  %v5879_v22 = vld [vmem:[%s7327_s1 + $0x9b0] sm:$0xff]   ;;  %v4526_v27 = vcombine.low %v39_v26, %v39_v26  ;;  %v4527_v28 = vcombine.high %v39_v26, %v39_v26  ;;  %v40_v31 = vld [vmem:[%s7328_s0 + $0x98] sm:$0xff]  ;;  %v5889_v34 = vld [vmem:[%s7327_s1 + $0xa00] sm:$0xff]  }
 0x11c   :  { %5306 = vmatprep.subr.bf16.mxu0 %v5844_v37  ;;  %v4529_v33 = vcombine.high %v40_v31, %v40_v31  ;;  %v5892_v37 = vld [vmem:[%s7327_s1 + $0xa48] sm:$0xff]   ;;  %v5900_v45 = vld [vmem:[%s7327_s1 + $0xa58] sm:$0xff]  }
 0x11d   :  { %5327 = vmatpush3.bf16.msra.mxu1 %v5843_v36  ;;  %v5891_v36 = vld [vmem:[%s7327_s1 + $0xa80] sm:$0xff]   ;;  %v5902_v47 = vld [vmem:[%s7327_s1 + $0xad8] sm:$0xff]   ;;  %v5931_v26 = vld [vmem:[%s7327_s1 + $0xb88] sm:$0xff]  }
 0x11e   :  { %5328 = vmatprep.subr.bf16.mxu1 %v5846_v39  ;;  %v5894_v39 = vld [vmem:[%s7327_s1 + $0xac8] sm:$0xff]  }
 0x11f   :  { %5307 = vmatpush3.bf16.msra.mxu0 %v5845_v38  ;;  %v5893_v38 = vld [vmem:[%s7327_s1 + $0xa08] sm:$0xff]  }
 0x120   :  { %5336 = vmatprep.subr.bf16.mxu0 %v5850_v44  ;;  %v5899_v44 = vld [vmem:[%s7327_s1 + $0xa90] sm:$0xff]  }
 0x121   :  { %5329 = vmatpush3.bf16.msra.mxu1 %v5849_v43  ;;  %v5898_v43 = vld [vmem:[%s7327_s1 + $0xad0] sm:$0xff]  }
 0x122   :  { %4034 = vmatmul.mubr.bf16.vlgmr.msra.gmra.mrb[32].mxu0 %v4522_v41  ;;  %5358 = vmatprep.subr.bf16.mxu1 %v5854_v49  ;;  %v5896_v41 = vld [vmem:[%s7327_s1 + $0xa50] sm:$0xff]   ;;  %v5904_v49 = vld [vmem:[%s7327_s1 + $0xa60] sm:$0xff]  }
 0x123   :  { %5337 = vmatpush3.bf16.msra.mxu0 %v5853_v48  ;;  %4113 = vmatprep.mubr.bf16.mxu0 %v4527_v28  ;;  %v5903_v48 = vld [vmem:[%s7327_s1 + $0xa98] sm:$0xff]   ;;  %v5933_v28 = vld [vmem:[%s7327_s1 + $0xb10] sm:$0xff]  }
 0x124   :  { %4074 = vmatmul.mubr.bf16.vlgmr.msra.gmra.mrb[32].mxu1 %v4524_v46  ;;  %5338 = vmatprep.subr.bf16.mxu0 %v5856_v51  ;;  %v5901_v46 = vld [vmem:[%s7327_s1 + $0xa18] sm:$0xff]  }
 0x125   :  { %5359 = vmatpush3.bf16.msra.mxu1 %v5855_v50  ;;  %4153 = vmatprep.mubr.bf16.mxu1 %v4529_v33  ;;  %v5905_v50 = vld [vmem:[%s7327_s1 + $0xa20] sm:$0xff]   ;;  %v5938_v33 = vld [vmem:[%s7327_s1 + $0xbd8] sm:$0xff]  }
 0x126   :  { %5360 = vmatprep.subr.bf16.mxu1 %v5858_v53 }
 0x127   :  { %5339 = vmatpush3.bf16.msra.mxu0 %v5857_v52  ;;  %v5906_v52 = vld [vmem:[%s7327_s1 + $0xae0] sm:$0xff]  }
 0x128   :  { %5340 = vmatprep.subr.bf16.mxu0 %v5860_v55 }
 0x129   :  { %5361 = vmatpush3.bf16.msra.mxu1 %v5859_v54  ;;  %v5907_v54 = vld [vmem:[%s7327_s1 + $0xaa0] sm:$0xff]  }
 0x12a   :  { %5362 = vmatprep.subr.bf16.mxu1 %v5862_v57  ;;  %v5908_v57 = vld [vmem:[%s7327_s1 + $0xa68] sm:$0xff]  }
 0x12b   :  { %5341 = vmatpush3.bf16.msra.mxu0 %v5861_v56 }
 0x12c   :  { %5342 = vmatprep.subr.bf16.mxu0 %v5864_v59 }
 0x12d   :  { %5363 = vmatpush3.bf16.msra.mxu1 %v5863_v58 }
 0x12e   :  { %5364 = vmatprep.subr.bf16.mxu1 %v5866_v61 }
 0x12f   :  { %5343 = vmatpush3.bf16.msra.mxu0 %v5865_v60  ;;  %v5909_v60 = vld [vmem:[%s7327_s1 + $0xa28] sm:$0xff]  }
 0x130   :  { %5344 = vmatprep.subr.bf16.mxu0 %v5868_v63  ;;  %v5910_v63 = vld [vmem:[%s7327_s1 + $0xae8] sm:$0xff]  }
 0x131   :  { %5365 = vmatpush3.bf16.msra.mxu1 %v5867_v62 }
 0x132   :  { %5366 = vmatprep.subr.bf16.mxu1 %v5870_v3  ;;  %v5912_v3 = vld [vmem:[%s7327_s1 + $0xa70] sm:$0xff]  }
 0x133   :  { %5345 = vmatpush3.bf16.msra.mxu0 %v5869_v1  ;;  %v5911_v1 = vld [vmem:[%s7327_s1 + $0xaa8] sm:$0xff]  }
 0x134   :  { %5346 = vmatprep.subr.bf16.mxu0 %v5872_v9  ;;  %v5916_v9 = vld [vmem:[%s7327_s1 + $0xa78] sm:$0xff]  }
 0x135   :  { %v5044_v0 = vpop.f32.mrb[8].mxu0  ;;  %5367 = vmatpush3.bf16.msra.mxu1 %v5871_v6  ;;  %v5913_v6 = vld [vmem:[%s7327_s1 + $0xa30] sm:$0xff]  }
 0x136   :  { %v5045_v2 = vpop.f32.mrb[9].mxu0  ;;  %5368 = vmatprep.subr.bf16.mxu1 %v5874_v14 }
 0x137   :  { %v5046_v4 = vadd.f32 %v5045_v2, %v5044_v0  ;;  %v5047_v5 = vpop.f32.mrb[10].mxu0  ;;  %v5066_v7 = vpop.f32.mrb[8].mxu1  ;;  %5347 = vmatpush3.bf16.msra.mxu0 %v5873_v11  ;;  %v5918_v11 = vld [vmem:[%s7327_s1 + $0xaf8] sm:$0xff]  }
 0x138   :  { %v5048_v10 = vpop.f32.mrb[11].mxu0  ;;  %v5067_v12 = vpop.f32.mrb[9].mxu1  ;;  %5348 = vmatprep.subr.bf16.mxu0 %v5876_v19 }
 0x139   :  { %v3556_v8 = vadd.f32 %v5046_v4, %v6907_v32  ;;  %v5068_v13 = vadd.f32 %v5067_v12, %v5066_v7  ;;  %v5069_v15 = vpop.f32.mrb[10].mxu1  ;;  %5369 = vmatpush3.bf16.msra.mxu1 %v5875_v16  ;;  %v4528_v32 = vcombine.low %v40_v31, %v40_v31  ;;  %v5914_v7 = vld [vmem:[%s7327_s1 + $0xaf0] sm:$0xff]   ;;  %v5917_v10 = vld [vmem:[%s7327_s1 + $0xa38] sm:$0xff]   ;;  %v41_v12 = vld [vmem:[%s7328_s0 + $0xa0] sm:$0xff] }
 0x13a   :  { %v5070_v17 = vpop.f32.mrb[11].mxu1  ;;  %5370 = vmatprep.subr.bf16.mxu1 %v5878_v21  ;;  %v4531_v14 = vcombine.high %v41_v12, %v41_v12  ;;  %v5921_v15 = vld [vmem:[%s7327_s1 + $0xab8] sm:$0xff]   ;;  %v5922_v16 = vld [vmem:[%s7327_s1 + $0xb40] sm:$0xff]  }
 0x13b   :  { %v7012_v18 = vadd.f32 %v5068_v13, %v3556_v8  ;;  %5349 = vmatpush3.bf16.msra.mxu0 %v5877_v20  ;;  %v5915_v8 = vld [vmem:[%s7327_s1 + $0xab0] sm:$0xff]   ;;  %v4530_v13 = vcombine.low %v41_v12, %v41_v12  ;;  %v42_v17 = vld [vmem:[%s7328_s0 + $0xa8] sm:$0xff]  ;;  %v5925_v20 = vld [vmem:[%s7327_s1 + $0xb00] sm:$0xff]  }
 0x13c   :  { %5350 = vmatprep.subr.bf16.mxu0 %v5880_v23  ;;  %v4533_v19 = vcombine.high %v42_v17, %v42_v17  ;;  %v5926_v21 = vld [vmem:[%s7327_s1 + $0xbc0] sm:$0xff]   ;;  %v5928_v23 = vld [vmem:[%s7327_s1 + $0xb48] sm:$0xff]   ;;  %v5936_v31 = vld [vmem:[%s7327_s1 + $0xb58] sm:$0xff]  }
 0x13d   :  { %5371 = vmatpush3.bf16.msra.mxu1 %v5879_v22  ;;  %v5927_v22 = vld [vmem:[%s7327_s1 + $0xb80] sm:$0xff]  }
 0x13e   :  { %5372 = vmatprep.subr.bf16.mxu1 %v5882_v25  ;;  %v5930_v25 = vld [vmem:[%s7327_s1 + $0xbc8] sm:$0xff]  }
 0x13f   :  { %5351 = vmatpush3.bf16.msra.mxu0 %v5881_v24  ;;  %v5929_v24 = vld [vmem:[%s7327_s1 + $0xb08] sm:$0xff]  }
 0x140   :  { %5380 = vmatprep.subr.bf16.mxu0 %v5886_v30  ;;  %v5935_v30 = vld [vmem:[%s7327_s1 + $0xb90] sm:$0xff]  }
 0x141   :  { %5373 = vmatpush3.bf16.msra.mxu1 %v5885_v29  ;;  %v5934_v29 = vld [vmem:[%s7327_s1 + $0xbd0] sm:$0xff]  }
 0x142   :  { %4114 = vmatmul.mubr.bf16.vlgmr.msra.gmra.mrb[36].mxu0 %v4526_v27  ;;  %5402 = vmatprep.subr.bf16.mxu1 %v5890_v35  ;;  %v5932_v27 = vld [vmem:[%s7327_s1 + $0xb50] sm:$0xff]   ;;  %v5940_v35 = vld [vmem:[%s7327_s1 + $0xb60] sm:$0xff]  }
 0x143   :  { %5381 = vmatpush3.bf16.msra.mxu0 %v5889_v34  ;;  %4193 = vmatprep.mubr.bf16.mxu0 %v4531_v14  ;;  %v5939_v34 = vld [vmem:[%s7327_s1 + $0xb98] sm:$0xff]  }
 0x144   :  { %4154 = vmatmul.mubr.bf16.vlgmr.msra.gmra.mrb[36].mxu1 %v4528_v32  ;;  %5382 = vmatprep.subr.bf16.mxu0 %v5892_v37  ;;  %v5937_v32 = vld [vmem:[%s7327_s1 + $0xb18] sm:$0xff]   ;;  %v5941_v37 = vld [vmem:[%s7327_s1 + $0xb20] sm:$0xff]  }
 0x145   :  { %5403 = vmatpush3.bf16.msra.mxu1 %v5891_v36  ;;  %4233 = vmatprep.mubr.bf16.mxu1 %v4533_v19 }
 0x146   :  { %5404 = vmatprep.subr.bf16.mxu1 %v5894_v39  ;;  %v5942_v39 = vld [vmem:[%s7327_s1 + $0xbe0] sm:$0xff]  }
 0x147   :  { %5383 = vmatpush3.bf16.msra.mxu0 %v5893_v38 }
 0x148   :  { %5384 = vmatprep.subr.bf16.mxu0 %v5896_v41 }
 0x149   :  { %5405 = vmatpush3.bf16.msra.mxu1 %v5895_v40 }
 0x14a   :  { %5406 = vmatprep.subr.bf16.mxu1 %v5898_v43 }
 0x14b   :  { %5385 = vmatpush3.bf16.msra.mxu0 %v5897_v42  ;;  %v5943_v42 = vld [vmem:[%s7327_s1 + $0xba0] sm:$0xff]  }
 0x14c   :  { %5386 = vmatprep.subr.bf16.mxu0 %v5900_v45  ;;  %v5944_v45 = vld [vmem:[%s7327_s1 + $0xb68] sm:$0xff]  }
 0x14d   :  { %5407 = vmatpush3.bf16.msra.mxu1 %v5899_v44 }
 0x14e   :  { %5408 = vmatprep.subr.bf16.mxu1 %v5902_v47  ;;  %v5945_v47 = vld [vmem:[%s7327_s1 + $0xb28] sm:$0xff]  }
 0x14f   :  { %5387 = vmatpush3.bf16.msra.mxu0 %v5901_v46 }
 0x150   :  { %5388 = vmatprep.subr.bf16.mxu0 %v5904_v49 }
 0x151   :  { %5409 = vmatpush3.bf16.msra.mxu1 %v5903_v48 }
 0x152   :  { %5410 = vmatprep.subr.bf16.mxu1 %v5906_v52  ;;  %v5947_v52 = vld [vmem:[%s7327_s1 + $0xba8] sm:$0xff]  }
 0x153   :  { %5389 = vmatpush3.bf16.msra.mxu0 %v5905_v50  ;;  %v5946_v50 = vld [vmem:[%s7327_s1 + $0xbe8] sm:$0xff]  }
 0x154   :  { %5390 = vmatprep.subr.bf16.mxu0 %v5908_v57  ;;  %v5950_v57 = vld [vmem:[%s7327_s1 + $0xbf0] sm:$0xff]  }
 0x155   :  { %v5088_v51 = vpop.f32.mrb[12].mxu0  ;;  %5411 = vmatpush3.bf16.msra.mxu1 %v5907_v54 }
 0x156   :  { %v5089_v53 = vpop.f32.mrb[13].mxu0  ;;  %5412 = vmatprep.subr.bf16.mxu1 %v5910_v63 }
 0x157   :  { %v5090_v55 = vadd.f32 %v5089_v53, %v5088_v51  ;;  %v5091_v56 = vpop.f32.mrb[14].mxu0  ;;  %v5110_v58 = vpop.f32.mrb[12].mxu1  ;;  %5391 = vmatpush3.bf16.msra.mxu0 %v5909_v60  ;;  %v5953_v60 = vld [vmem:[%s7327_s1 + $0xb38] sm:$0xff]  }
 0x158   :  { %v5092_v61 = vpop.f32.mrb[15].mxu0  ;;  %v5111_v62 = vpop.f32.mrb[13].mxu1  ;;  %5392 = vmatprep.subr.bf16.mxu0 %v5912_v3  ;;  %v5949_v56 = vld [vmem:[%s7327_s1 + $0xb30] sm:$0xff]   ;;  %v44_v3 = vld [vmem:[%s7328_s0 + $0xb8] sm:$0xff] }
 0x159   :  { %v3636_v59 = vadd.f32 %v5090_v55, %v7012_v18  ;;  %v5112_v0 = vadd.f32 %v5111_v62, %v5110_v58  ;;  %v5113_v2 = vpop.f32.mrb[14].mxu1  ;;  %5413 = vmatpush3.bf16.msra.mxu1 %v5911_v1  ;;  %v4532_v18 = vcombine.low %v42_v17, %v42_v17  ;;  %v5948_v55 = vld [vmem:[%s7327_s1 + $0xb70] sm:$0xff]   ;;  %v5954_v61 = vld [vmem:[%s7327_s1 + $0xbf8] sm:$0xff]  }
 0x15a   :  { %v5114_v4 = vpop.f32.mrb[15].mxu1  ;;  %5414 = vmatprep.subr.bf16.mxu1 %v5914_v7  ;;  %v5951_v58 = vld [vmem:[%s7327_s1 + $0xbb0] sm:$0xff]   ;;  %v5957_v1 = vld [vmem:[%s7327_s1 + $0xbb8] sm:$0xff]   ;;  %v5981_v2 = vmov 0.0   ;;  %v5961_v7 = vld [vmem:[%s7327_s1 + $0xc08] sm:$0xff]  }
 0x15b   :  { %v7120_v5 = vadd.f32 %v5112_v0, %v3636_v59  ;;  %5393 = vmatpush3.bf16.msra.mxu0 %v5913_v6  ;;  %v5952_v59 = vld [vmem:[%s7327_s1 + $0xb78] sm:$0xff]   ;;  %v43_v62 = vld [vmem:[%s7328_s0 + $0xb0] sm:$0xff]  ;;  %v4536_v4 = vcombine.low %v44_v3, %v44_v3  ;;  %v5960_v6 = vld [vmem:[%s7327_s1 + $0xc00] sm:$0xff]  }
 0x15c   :  { %5394 = vmatprep.subr.bf16.mxu0 %v5916_v9  ;;  %v4534_v63 = vcombine.low %v43_v62, %v43_v62  ;;  %v4535_v0 = vcombine.high %v43_v62, %v43_v62  ;;  %v5963_v9 = vld [vmem:[%s7327_s1 + $0xc18] sm:$0xff]  }
 0x15d   :  { %5415 = vmatpush3.bf16.msra.mxu1 %v5915_v8  ;;  %v5962_v8 = vld [vmem:[%s7327_s1 + $0xc10] sm:$0xff]  }
 0x15e   :  { %5416 = vmatprep.subr.bf16.mxu1 %v5918_v11 }
 0x15f   :  { %5395 = vmatpush3.bf16.msra.mxu0 %v5917_v10  ;;  %v5964_v10 = vld [vmem:[%s7327_s1 + $0xc20] sm:$0xff]  }
 0x160   :  { %5424 = vmatprep.subr.bf16.mxu0 %v5922_v16  ;;  %v5965_v16 = vld [vmem:[%s7327_s1 + $0xc28] sm:$0xff]  }
 0x161   :  { %5417 = vmatpush3.bf16.msra.mxu1 %v5921_v15 }
 0x162   :  { %4194 = vmatmul.mubr.bf16.vlgmr.msra.gmra.mrb[40].mxu0 %v4530_v13  ;;  %5446 = vmatprep.subr.bf16.mxu1 %v5926_v21 }
 0x163   :  { %5425 = vmatpush3.bf16.msra.mxu0 %v5925_v20  ;;  %4273 = vmatprep.mubr.bf16.mxu0 %v4535_v0 }
 0x164   :  { %4234 = vmatmul.mubr.bf16.vlgmr.msra.gmra.mrb[40].mxu1 %v4532_v18  ;;  %5426 = vmatprep.subr.bf16.mxu0 %v5928_v23 }
 0x165   :  { %5447 = vmatpush3.bf16.msra.mxu1 %v5927_v22 }
 0x166   :  { %5448 = vmatprep.subr.bf16.mxu1 %v5930_v25  ;;  %v5967_v25 = vld [vmem:[%s7327_s1 + $0xc38] sm:$0xff]  }
 0x167   :  { %5427 = vmatpush3.bf16.msra.mxu0 %v5929_v24  ;;  %v5966_v24 = vld [vmem:[%s7327_s1 + $0xc30] sm:$0xff]  }
 0x168   :  { %5428 = vmatprep.subr.bf16.mxu0 %v5932_v27 }
 0x169   :  { %5449 = vmatpush3.bf16.msra.mxu1 %v5931_v26  ;;  %v5968_v26 = vld [vmem:[%s7328_s0 + $0xc0] ss:$0 sps:$4 sm:$0xff]  }
 0x16a   :  { %5450 = vmatprep.subr.bf16.mxu1 %v5934_v29 }
 0x16b   :  { %5429 = vmatpush3.bf16.msra.mxu0 %v5933_v28 }
 0x16c   :  { %5430 = vmatprep.subr.bf16.mxu0 %v5936_v31 }
 0x16d   :  { %5451 = vmatpush3.bf16.msra.mxu1 %v5935_v30 }
 0x16e   :  { %5452 = vmatprep.subr.bf16.mxu1 %v5938_v33 }
 0x16f   :  { %5431 = vmatpush3.bf16.msra.mxu0 %v5937_v32 }
 0x170   :  { %5432 = vmatprep.subr.bf16.mxu0 %v5940_v35 }
 0x171   :  { %5453 = vmatpush3.bf16.msra.mxu1 %v5939_v34 }
 0x172   :  { %5454 = vmatprep.subr.bf16.mxu1 %v5942_v39 }
 0x173   :  { %5433 = vmatpush3.bf16.msra.mxu0 %v5941_v37 }
 0x174   :  { %5434 = vmatprep.subr.bf16.mxu0 %v5944_v45 }
 0x175   :  { %v5132_v36 = vpop.f32.mrb[16].mxu0  ;;  %5455 = vmatpush3.bf16.msra.mxu1 %v5943_v42 }
 0x176   :  { %v5133_v38 = vpop.f32.mrb[17].mxu0  ;;  %5456 = vmatprep.subr.bf16.mxu1 %v5946_v50 }
 0x177   :  { %v5134_v40 = vadd.f32 %v5133_v38, %v5132_v36  ;;  %v5135_v41 = vpop.f32.mrb[18].mxu0  ;;  %v5154_v43 = vpop.f32.mrb[16].mxu1  ;;  %5435 = vmatpush3.bf16.msra.mxu0 %v5945_v47 }
 0x178   :  { %v5136_v46 = vpop.f32.mrb[19].mxu0  ;;  %v5155_v48 = vpop.f32.mrb[17].mxu1  ;;  %5436 = vmatprep.subr.bf16.mxu0 %v5948_v55  ;;  %v5973_v55 = vld [vmem:[%s7330_s3 + $0x20] sm:$0xff]  }
 0x179   :  { %v3716_v44 = vadd.f32 %v5134_v40, %v7120_v5  ;;  %v5156_v49 = vadd.f32 %v5155_v48, %v5154_v43  ;;  %v5157_v51 = vpop.f32.mrb[18].mxu1  ;;  %5457 = vmatpush3.bf16.msra.mxu1 %v5947_v52  ;;  %v4537_v5 = vcombine.high %v44_v3, %v44_v3  ;;  %v5970_v52 = vld [vmem:[%s7330_s3 + $0x8] sm:$0xff]   ;;  %v5976_v3 = vld [vmem:[%s7330_s3 + $0x38] sm:$0xff]  }
 0x17a   :  { %v5158_v53 = vpop.f32.mrb[19].mxu1  ;;  %5458 = vmatprep.subr.bf16.mxu1 %v5950_v57  ;;  %v5969_v51 = vld [vmem:[%s7330_s3] sm:$0xff]  }
 0x17b   :  { %v3756_v54 = vadd.f32 %v5156_v49, %v3716_v44  ;;  %5437 = vmatpush3.bf16.msra.mxu0 %v5949_v56  ;;  %4313 = vmatprep.mubr.bf16.mxu1 %v4537_v5  ;;  %v5971_v53 = vld [vmem:[%s7330_s3 + $0x10] sm:$0xff]   ;;  %v5974_v56 = vld [vmem:[%s7330_s3 + $0x28] sm:$0xff]  }
 0x17c   :  { %5438 = vmatprep.subr.bf16.mxu0 %v5952_v59 }
 0x17d   :  { %5459 = vmatpush3.bf16.msra.mxu1 %v5951_v58  ;;  %v5975_v58 = vld [vmem:[%s7330_s3 + $0x30] sm:$0xff]  }
 0x17e   :  { %5460 = vmatprep.subr.bf16.mxu1 %v5954_v61 }
 0x17f   :  { %5439 = vmatpush3.bf16.msra.mxu0 %v5953_v60 }
 0x180   :  { %5486 = vmatprep.subr.bf16.mxu0 %v5981_v2 }
 0x181   :  { %5461 = vmatpush3.bf16.msra.mxu1 %v5957_v1 }
 0x182   :  { %4274 = vmatmul.mubr.bf16.vlgmr.msra.gmra.mrb[44].mxu0 %v4534_v63  ;;  %5506 = vmatprep.subr.bf16.mxu1 %v5981_v2 }
 0x183   :  { %5487 = vmatpush3.bf16.msra.mxu0 %v5960_v6  ;;  %5502 = vmatprep.mubr.msk.bf16.mxu0 %vm5982_vm0, %v5981_v2 }
 0x184   :  { %4314 = vmatmul.mubr.bf16.vlgmr.msra.gmra.mrb[44].mxu1 %v4536_v4  ;;  %5488 = vmatprep.subr.bf16.mxu0 %v5981_v2 }
 0x185   :  { %5522 = vmatprep.mubr.msk.bf16.mxu1 %vm5982_vm0, %v5981_v2  ;;  %5507 = vmatpush3.bf16.msra.mxu1 %v5969_v51 }
 0x186   :  { %5508 = vmatprep.subr.bf16.mxu1 %v5981_v2 }
 0x187   :  { %5489 = vmatpush3.bf16.msra.mxu0 %v5961_v7 }
 0x188   :  { %5490 = vmatprep.subr.bf16.mxu0 %v5981_v2 }
 0x189   :  { %5509 = vmatpush3.bf16.msra.mxu1 %v5970_v52 }
 0x18a   :  { %5510 = vmatprep.subr.bf16.mxu1 %v5981_v2 }
 0x18b   :  { %5491 = vmatpush3.bf16.msra.mxu0 %v5962_v8 }
 0x18c   :  { %5492 = vmatprep.subr.bf16.mxu0 %v5981_v2 }
 0x18d   :  { %5511 = vmatpush3.bf16.msra.mxu1 %v5971_v53 }
 0x18e   :  { %5512 = vmatprep.subr.bf16.mxu1 %v5981_v2 }
 0x18f   :  { %5493 = vmatpush3.bf16.msra.mxu0 %v5963_v9 }
 0x190   :  { %5494 = vmatprep.subr.bf16.mxu0 %v5981_v2 }
 0x193   :  { %5495 = vmatpush3.bf16.msra.mxu0 %v5964_v10 }
 0x194   :  { %5496 = vmatprep.subr.bf16.mxu0 %v5981_v2 }
 0x195   :  { %v5176_v11 = vpop.f32.mrb[20].mxu0 }
 0x196   :  { %v5177_v12 = vpop.f32.mrb[21].mxu0 }
 0x197   :  { %v5178_v13 = vadd.f32 %v5177_v12, %v5176_v11  ;;  %v5179_v14 = vpop.f32.mrb[22].mxu0  ;;  %v5198_v15 = vpop.f32.mrb[20].mxu1  ;;  %5497 = vmatpush3.bf16.msra.mxu0 %v5965_v16 }
 0x198   :  { %v5180_v17 = vpop.f32.mrb[23].mxu0  ;;  %v5199_v18 = vpop.f32.mrb[21].mxu1  ;;  %5498 = vmatprep.subr.bf16.mxu0 %v5981_v2 }
 0x199   :  { %v3796_v19 = vadd.f32 %v5178_v13, %v3756_v54  ;;  %v5200_v20 = vadd.f32 %v5199_v18, %v5198_v15  ;;  %v5201_v21 = vpop.f32.mrb[22].mxu1  ;;  %v5972_v54 = vld [vmem:[%s7330_s3 + $0x18] sm:$0xff]  }
 0x19a   :  { %v5202_v22 = vpop.f32.mrb[23].mxu1  ;;  %5513 = vmatpush3.bf16.msra.mxu1 %v5972_v54 }
 0x19b   :  { %v3836_v23 = vadd.f32 %v5200_v20, %v3796_v19  ;;  %5499 = vmatpush3.bf16.msra.mxu0 %v5966_v24  ;;  %5514 = vmatprep.subr.bf16.mxu1 %v5981_v2 }
 0x19c   :  { %5500 = vmatprep.subr.bf16.mxu0 %v5981_v2 }
 0x19e   :  { %5515 = vmatpush3.bf16.msra.mxu1 %v5973_v55 }
 0x19f   :  { %5501 = vmatpush3.bf16.msra.mxu0 %v5967_v25  ;;  %5516 = vmatprep.subr.bf16.mxu1 %v5981_v2 }
 0x1a2   :  { %5503 = vmatmul.mubr.bf16.vlgmr.msra.gmra.mrb[48].mxu0 %v5968_v26  ;;  %5517 = vmatpush3.bf16.msra.mxu1 %v5974_v56 }
 0x1a3   :  { %5518 = vmatprep.subr.bf16.mxu1 %v5981_v2 }
 0x1a6   :  { %5519 = vmatpush3.bf16.msra.mxu1 %v5975_v58 }
 0x1a7   :  { %5520 = vmatprep.subr.bf16.mxu1 %v5981_v2 }
 0x1aa   :  { %5521 = vmatpush3.bf16.msra.mxu1 %v5976_v3 }
 0x1b5   :  { %v5220_v27 = vpop.f32.mrb[24].mxu0 }
 0x1b6   :  { %v5221_v28 = vpop.f32.mrb[25].mxu0 }
 0x1b7   :  { %v5222_v29 = vadd.f32 %v5221_v28, %v5220_v27  ;;  %v5223_v30 = vpop.f32.mrb[26].mxu0  ;;  %v5242_v31 = vpop.f32.mrb[24].mxu1 }
 0x1b8   :  { %v5224_v32 = vpop.f32.mrb[27].mxu0  ;;  %v5243_v33 = vpop.f32.mrb[25].mxu1 }
 0x1b9   :  { %v3876_v34 = vadd.f32 %v5222_v29, %v3836_v23  ;;  %v5244_v35 = vadd.f32 %v5243_v33, %v5242_v31  ;;  %v5245_v36 = vpop.f32.mrb[26].mxu1 }
 0x1ba   :  { %v5246_v37 = vpop.f32.mrb[27].mxu1 }
 0x1bb   :  { %v3916_v38 = vadd.f32 %v5244_v35, %v3876_v34 }
 0x1d5   :  { %v5264_v39 = vpop.f32.mrb[28].mxu0 }
 0x1d6   :  { %v5265_v40 = vpop.f32.mrb[29].mxu0 }
 0x1d7   :  { %v5266_v41 = vadd.f32 %v5265_v40, %v5264_v39  ;;  %v5267_v42 = vpop.f32.mrb[30].mxu0  ;;  %v5286_v43 = vpop.f32.mrb[28].mxu1 }
 0x1d8   :  { %v5268_v44 = vpop.f32.mrb[31].mxu0  ;;  %v5287_v45 = vpop.f32.mrb[29].mxu1 }
 0x1d9   :  { %v3956_v46 = vadd.f32 %v5266_v41, %v3916_v38  ;;  %v5288_v47 = vadd.f32 %v5287_v45, %v5286_v43  ;;  %v5289_v48 = vpop.f32.mrb[30].mxu1 }
 0x1da   :  { %v5290_v49 = vpop.f32.mrb[31].mxu1 }
 0x1db   :  { %v3996_v50 = vadd.f32 %v5288_v47, %v3956_v46 }
 0x1f5   :  { %v5308_v57 = vpop.f32.mrb[32].mxu0 }
 0x1f6   :  { %v5309_v59 = vpop.f32.mrb[33].mxu0 }
 0x1f7   :  { %v5310_v60 = vadd.f32 %v5309_v59, %v5308_v57  ;;  %v5311_v61 = vpop.f32.mrb[34].mxu0  ;;  %v5330_v62 = vpop.f32.mrb[32].mxu1 }
 0x1f8   :  { %v5312_v63 = vpop.f32.mrb[35].mxu0  ;;  %v5331_v1 = vpop.f32.mrb[33].mxu1 }
 0x1f9   :  { %v4036_v0 = vadd.f32 %v5310_v60, %v3996_v50  ;;  %v5332_v4 = vadd.f32 %v5331_v1, %v5330_v62  ;;  %v5333_v5 = vpop.f32.mrb[34].mxu1  ;;  %v4931_v50 = vld [vmem:[%s7331_s4] ss:$0 sm:$0xff] }
 0x1fa   :  { %v5334_v6 = vpop.f32.mrb[35].mxu1 }
 0x1fb   :  { %v4076_v7 = vadd.f32 %v5332_v4, %v4036_v0 }
 0x215   :  { %v5352_v8 = vpop.f32.mrb[36].mxu0 }
 0x216   :  { %v5353_v9 = vpop.f32.mrb[37].mxu0 }
 0x217   :  { %v5354_v10 = vadd.f32 %v5353_v9, %v5352_v8  ;;  %v5355_v11 = vpop.f32.mrb[38].mxu0  ;;  %v5374_v12 = vpop.f32.mrb[36].mxu1 }
 0x218   :  { %v5356_v13 = vpop.f32.mrb[39].mxu0  ;;  %v5375_v14 = vpop.f32.mrb[37].mxu1 }
 0x219   :  { %v4116_v15 = vadd.f32 %v5354_v10, %v4076_v7  ;;  %v5376_v2 = vadd.f32 %v5375_v14, %v5374_v12  ;;  %v5377_v16 = vpop.f32.mrb[38].mxu1 }
 0x21a   :  { %v5378_v17 = vpop.f32.mrb[39].mxu1 }
 0x21b   :  { %v4156_v18 = vadd.f32 %v5376_v2, %v4116_v15 }
 0x235   :  { %v5396_v19 = vpop.f32.mrb[40].mxu0 }
 0x236   :  { %v5397_v20 = vpop.f32.mrb[41].mxu0 }
 0x237   :  { %v5398_v21 = vadd.f32 %v5397_v20, %v5396_v19  ;;  %v5399_v22 = vpop.f32.mrb[42].mxu0  ;;  %v5418_v23 = vpop.f32.mrb[40].mxu1 }
 0x238   :  { %v5400_v24 = vpop.f32.mrb[43].mxu0  ;;  %v5419_v25 = vpop.f32.mrb[41].mxu1 }
 0x239   :  { %v4196_v26 = vadd.f32 %v5398_v21, %v4156_v18  ;;  %v5420_v27 = vadd.f32 %v5419_v25, %v5418_v23  ;;  %v5421_v28 = vpop.f32.mrb[42].mxu1 }
 0x23a   :  { %v5422_v29 = vpop.f32.mrb[43].mxu1 }
 0x23b   :  { %v4236_v30 = vadd.f32 %v5420_v27, %v4196_v26 }
 0x255   :  { %v5440_v31 = vpop.f32.mrb[44].mxu0 }
 0x256   :  { %v5441_v32 = vpop.f32.mrb[45].mxu0 }
 0x257   :  { %v5442_v33 = vadd.f32 %v5441_v32, %v5440_v31  ;;  %v5443_v34 = vpop.f32.mrb[46].mxu0  ;;  %v5462_v35 = vpop.f32.mrb[44].mxu1 }
 0x258   :  { %v5444_v36 = vpop.f32.mrb[47].mxu0  ;;  %v5463_v37 = vpop.f32.mrb[45].mxu1 }
 0x259   :  { %v4276_v38 = vadd.f32 %v5442_v33, %v4236_v30  ;;  %v5464_v39 = vadd.f32 %v5463_v37, %v5462_v35  ;;  %v5465_v40 = vpop.f32.mrb[46].mxu1 }
 0x25a   :  { %v5466_v41 = vpop.f32.mrb[47].mxu1 }
 0x25b   :  { %v4316_v42 = vadd.f32 %v5464_v39, %v4276_v38 }
 0x275   :  { %v4355_v43 = vpop.f32.mrb[48].mxu0 }
 0x276   :  { %v4356_v44 = vadd.f32 %v4355_v43, %v4316_v42  ;;  %v5504_v45 = vpop.f32.mrb[49].mxu0 }
 0x277   :  { %v4358_v46 = vpop.f32.mrb[50].mxu0 }
 0x278   :  { %v4361_v47 = vmax.f32 %v4356_v44, 0.0  ;;  %v5505_v48 = vpop.f32.mrb[51].mxu0 }
 0x27a   :  { %v4362_v49 = vpack.c.bf16 %v4361_v47, %v4361_v47 }
 0x27c   :  { %5523 = vmatmul.mubr.bf16.vlgmr.msra.gmra.mrb[48].mxu1 %v4362_v49 }
 0x34f   :  { %v4468_v51 = vpop.f32.mrb[48].mxu1 }
 0x350   :  { %v4469_v52 = vadd.f32 %v4931_v50, %v4468_v51  ;;  %v5524_v53 = vpop.f32.mrb[49].mxu1 }
 0x351   :  { %v4471_v54 = vpop.f32.mrb[50].mxu1 }
 0x352   :  { %4474 = vmax.xlane.f32.xlu0 %v4469_v52  ;;  %v5525_v55 = vpop.f32.mrb[51].mxu1 }
 0x3df   :  { %v4475_v56 = vpop.xlane.xlu0 %4474 }
 0x3e0   :  { %v4476_v57 = vsub.f32 %v4469_v52, %v4475_v56 }
 0x3e2   :  { %v4477_v58 = vmul.f32 1.442695, %v4476_v57 }
 0x3e4   :  { %5977 = vpow2.f32 %v4477_v58 }
 0x3ee   :  { %v5978_v59 = vpop.eup %5977 }
 0x3ef   :  { %4479 = vadd.xlane.f32.xlu0 %v5978_v59 }
 0x47c   :  { %v4480_v60 = vpop.xlane.xlu0 %4479 }
 0x47d   :  { %5979 = vlog2.f32 %v4480_v60 }
 0x487   :  { %v5980_v61 = vpop.eup %5979 }
 0x488   :  { %v4482_v62 = vmul.f32 0.6931472, %v5980_v61 }
 0x48a   :  { %v4483_v63 = vsub.f32 %v4476_v57, %v4482_v62 }
 0x48c   :  { %4484 = vst [vmem:[%s7332_s5] sm:$0xff] %v4483_v63 }

</bundles_post_ra>
